<compile_context>
chip_gen: v7x
topology: tpu7x:2x2x1
jax: 0.10.0
libtpu: 0.0.40
codegen_flags: <defaults>
</compile_context>

<pallas_src>
import functools

import jax
import jax.numpy as jnp
from jax import lax
from jax.experimental import pallas as pl
from jax.experimental.pallas import tpu as pltpu


# ----------------------- generation-aware sizing ------------------------------

def _query_vmem_capacity():
    try:
        info = pltpu.get_tpu_info()
        cap = getattr(info, "vmem_capacity_bytes", None)
        if cap:
            return int(cap)
    except Exception:
        pass
    return 128 * 1024 * 1024          # v5e / v6e default


_VMEM_CAP = _query_vmem_capacity()
# Keep in-flight VMEM (double-buffered tiles + resident weights) well under the
# per-core budget: ~32 MiB on v7x (64 MiB physical), ~64 MiB on v5e/v6e.
_VMEM_LIMIT = int(min(_VMEM_CAP // 2, 64 * 1024 * 1024))
_ROW_TILE_TARGET = 4096 if _VMEM_CAP >= (96 << 20) else 2048
_HEAD_TILE_TARGET = 1024
_SPEC_GROUP_WEIGHT_CAP = (2 << 20) if _VMEM_CAP >= (96 << 20) else (1 << 20)
_FC0_IN_PAD = 32                      # pad 18 input features to 32 -> pack*K = 128


def _cparams():
    return pltpu.CompilerParams(dimension_semantics=("parallel",),
                                vmem_limit_bytes=_VMEM_LIMIT)


def _round_up(n, m):
    return ((n + m - 1) // m) * m


def _row_tile(mp, target):
    # Balanced row tiles: >= 2 grid steps when possible (v7x megacore sharding)
    # and no mostly-padding last block.
    nblk = max(2, -(-mp // target))
    tm = _round_up(-(-mp // nblk), 8)
    return mp if tm >= mp else tm


# ----------------------------- GELU (in-kernel) -------------------------------

_SQRT_HALF = 0.7071067811865476


def _erf_poly(x):
    # Abramowitz & Stegun 7.1.26, |error| < 1.5e-7.  Only exp/mul/add/where/div
    # -> always lowers inside Mosaic, deterministic across jax builds.
    a1, a2, a3, a4, a5 = (0.254829592, -0.284496736, 1.421413741,
                          -1.453152027, 1.061405429)
    p = 0.3275911
    s = jnp.where(x < 0.0, -1.0, 1.0)
    z = jnp.abs(x)
    t = 1.0 / (1.0 + p * z)
    poly = ((((a5 * t + a4) * t + a3) * t + a2) * t + a1) * t
    return s * (1.0 - poly * jnp.exp(-z * z))


def _gelu(x):
    # exact-erf GELU (matches torch F.gelu default) to ~1e-7.  NOTE: padded
    # rows of a partial last block may hold garbage; their GELU is discarded by
    # the masked output writeback, so inf/NaN there is harmless.
    return 0.5 * x * (1.0 + _erf_poly(x * _SQRT_HALF))


# ------------------------------ Pallas kernels --------------------------------

def _linear_kernel(x_ref, w_ref, b_ref, o_ref, *, apply_gelu):
    y = (jnp.dot(x_ref[...], w_ref[...], preferred_element_type=jnp.float32)
         + b_ref[...])
    if apply_gelu:
        y = _gelu(y)
    o_ref[...] = y


def _residual_kernel(x_ref, spec_ref, w_ref, b_ref, o_ref, *, apply_gelu):
    # y = spectral_branch + (x @ w + b)   (1x1-conv branch, fused add + GELU)
    y = (spec_ref[...]
         + jnp.dot(x_ref[...], w_ref[...], preferred_element_type=jnp.float32)
         + b_ref[...])
    if apply_gelu:
        y = _gelu(y)
    o_ref[...] = y


def _head_kernel(x_ref, w1_ref, b1_ref, w2_ref, b2_ref, o_ref, *, n1_chunk):
    # Fused fc1 -> GELU -> fc2.  fc1 columns (= fc2 rows) are processed in
    # 128-lane chunks so only a (tm, n1_chunk) intermediate is live (no spill
    # of a (tm, pack*128) slab).  Static slices are zero-cost ref views.
    x = x_ref[...]
    n1 = w1_ref.shape[1]
    acc = jnp.zeros((x.shape[0], w2_ref.shape[1]), jnp.float32)
    for j in range(n1 // n1_chunk):
        lo, hi = j * n1_chunk, (j + 1) * n1_chunk
        h = (jnp.dot(x, w1_ref[:, lo:hi], preferred_element_type=jnp.float32)
             + b1_ref[:, lo:hi])
        acc = acc + jnp.dot(_gelu(h), w2_ref[lo:hi, :],
                            preferred_element_type=jnp.float32)
    # TODO(synk): fc2 output tile is (tm, pack) < 128 lanes (masked store);
    # negligible here since the final output is tiny.
    o_ref[...] = acc + b2_ref[...]


def _spectral_kernel(x_ref, w_ref, o_ref):
    # One block-diagonal mode group per grid step: (B, Kg) @ (Kg, Ng) with
    # Kg, Ng lane-dense multiples of 128 -> unmasked stores, streaming MXU.
    o_ref[...] = jnp.dot(x_ref[...], w_ref[...],
                         preferred_element_type=jnp.float32)


# ------------------------------ Pallas wrappers -------------------------------

def pallas_linear(x2d, wp, bp, *, pack, apply_gelu):
    """x2d: (M, K); wp: (pack*K, pack*N) block-diagonal; bp: (pack*N,)."""
    M, K = x2d.shape
    Mp, Kp = M // pack, K * pack
    Np = wp.shape[1]
    xp = x2d.reshape(Mp, Kp)                   # free row-major re-view
    tm = _row_tile(Mp, _ROW_TILE_TARGET)
    out = pl.pallas_call(
        functools.partial(_linear_kernel, apply_gelu=apply_gelu),
        out_shape=jax.ShapeDtypeStruct((Mp, Np), jnp.float32),
        grid=(pl.cdiv(Mp, tm),),
        in_specs=[pl.BlockSpec((tm, Kp), lambda i: (i, 0)),
                  pl.BlockSpec((Kp, Np), lambda i: (0, 0)),
                  pl.BlockSpec((1, Np), lambda i: (0, 0))],
        out_specs=pl.BlockSpec((tm, Np), lambda i: (i, 0)),
        compiler_params=_cparams(),
    )(xp, wp, bp.reshape(1, Np))
    return out.reshape(M, Np // pack)


def pallas_residual(x, spec, wp, bp, *, pack, apply_gelu):
    """Fused 1x1-conv + residual add (+GELU).  x, spec: (B,H,W,C)."""
    B, H, W, C = x.shape
    M = B * H * W
    Mp, Kp = M // pack, C * pack
    Np = wp.shape[1]
    xp = x.reshape(Mp, Kp)
    sp = spec.reshape(Mp, Np)
    tm = _row_tile(Mp, _ROW_TILE_TARGET)
    out = pl.pallas_call(
        functools.partial(_residual_kernel, apply_gelu=apply_gelu),
        out_shape=jax.ShapeDtypeStruct((Mp, Np), jnp.float32),
        grid=(pl.cdiv(Mp, tm),),
        in_specs=[pl.BlockSpec((tm, Kp), lambda i: (i, 0)),
                  pl.BlockSpec((tm, Np), lambda i: (i, 0)),
                  pl.BlockSpec((Kp, Np), lambda i: (0, 0)),
                  pl.BlockSpec((1, Np), lambda i: (0, 0))],
        out_specs=pl.BlockSpec((tm, Np), lambda i: (i, 0)),
        compiler_params=_cparams(),
    )(xp, sp, wp, bp.reshape(1, Np))
    return out.reshape(B, H, W, Np // pack)


def pallas_head(x2d, w1p, b1p, w2p, b2p, *, pack):
    """Fused fc1 -> GELU -> fc2.  x2d: (M, width) -> (M, 1)."""
    M, K = x2d.shape
    Mp, Kp = M // pack, K * pack
    N1p, N2p = w1p.shape[1], w2p.shape[1]
    xp = x2d.reshape(Mp, Kp)
    tm = _row_tile(Mp, _HEAD_TILE_TARGET)
    n1_chunk = 128 if N1p % 128 == 0 else N1p
    out = pl.pallas_call(
        functools.partial(_head_kernel, n1_chunk=n1_chunk),
        out_shape=jax.ShapeDtypeStruct((Mp, N2p), jnp.float32),
        grid=(pl.cdiv(Mp, tm),),
        in_specs=[pl.BlockSpec((tm, Kp), lambda i: (i, 0)),
                  pl.BlockSpec((Kp, N1p), lambda i: (0, 0)),
                  pl.BlockSpec((1, N1p), lambda i: (0, 0)),
                  pl.BlockSpec((N1p, N2p), lambda i: (0, 0)),
                  pl.BlockSpec((1, N2p), lambda i: (0, 0))],
        out_specs=pl.BlockSpec((tm, N2p), lambda i: (i, 0)),
        compiler_params=_cparams(),
    )(xp, w1p, b1p.reshape(1, N1p), w2p, b2p.reshape(1, N2p))
    return out.reshape(M, N2p // pack)


def pallas_spectral(x2d, w_groups):
    """x2d: (B, n_groups*Kg) f32; w_groups: (n_groups, Kg, Ng) block-diagonal."""
    B = x2d.shape[0]
    n_groups, Kg, Ng = w_groups.shape
    return pl.pallas_call(
        _spectral_kernel,
        out_shape=jax.ShapeDtypeStruct((B, n_groups * Ng), jnp.float32),
        grid=(n_groups,),
        in_specs=[pl.BlockSpec((B, Kg), lambda i: (0, i)),
                  pl.BlockSpec((None, Kg, Ng), lambda i: (i, 0, 0))],
        out_specs=pl.BlockSpec((B, Ng), lambda i: (0, i)),
        compiler_params=_cparams(),
    )(x2d, w_groups)


# ------------------------------- model pieces ---------------------------------

def spectral_conv2d(x, w_groups, m1, m2, width):
    """SpectralConv2d forward on NHWC x: (B,H,W,C) -> (B,H,W,Co)."""
    B, H, W, C = x.shape
    Co = width
    Wf = W // 2 + 1
    assert 2 * m1 <= H and m2 <= Wf, "modes exceed spatial spectrum size"
    # TODO(synk): rfft2/irfft2 have no Pallas primitive; XLA FFT is used.
    x_ft = jnp.fft.rfft2(x, axes=(1, 2))                          # (B,H,Wf,C) c64
    blk = jnp.concatenate([x_ft[:, :m1, :m2, :],                  # corner 1
                           x_ft[:, H - m1:, :m2, :]], axis=1)     # corner 2
    Mtot = 2 * m1 * m2
    blk = blk.reshape(B, Mtot, C)
    # Per-mode [real | imag] columns; batch stays leading so no transposes are
    # needed around the Pallas call (modes*channels live on the lane axis).
    x_pack = jnp.concatenate([jnp.real(blk), jnp.imag(blk)], axis=-1)  # (B,Mtot,2C)
    x_pack = x_pack.reshape(B, Mtot * 2 * C)
    out = pallas_spectral(x_pack, w_groups)                       # (B, Mtot*2Co)
    out = out.reshape(B, Mtot, 2 * Co)
    out_c = lax.complex(out[..., :Co], out[..., Co:])              # (B,Mtot,Co)
    out_c = out_c.reshape(B, 2 * m1, m2, Co)
    # Assemble the full spectrum by pad + concat (no zeros-buffer scatters).
    zero_w = jnp.zeros((B, m1, Wf - m2, Co), jnp.complex64)
    top = jnp.concatenate([out_c[:, :m1], zero_w], axis=2)         # (B,m1,Wf,Co)
    bot = jnp.concatenate([out_c[:, m1:], zero_w], axis=2)         # (B,m1,Wf,Co)
    mid = jnp.zeros((B, H - 2 * m1, Wf, Co), jnp.complex64)
    out_ft = jnp.concatenate([top, mid, bot], axis=1)              # (B,H,Wf,Co)
    return jnp.fft.irfft2(out_ft, s=(H, W), axes=(1, 2))


def fno_forward(params, x, *, modes1, modes2, width, pack):
    """x: (B, H, W, 16) f32 -> (B, H, W, 1) f32."""
    B, H, W, _ = x.shape
    gridx = jnp.linspace(0.0, 1.0, W, dtype=jnp.float32).reshape(1, 1, W, 1)
    gridy = jnp.linspace(0.0, 1.0, H, dtype=jnp.float32).reshape(1, H, 1, 1)
    gx = jnp.broadcast_to(gridx, (B, H, W, 1))
    gy = jnp.broadcast_to(gridy, (B, H, W, 1))
    feat = jnp.concatenate([x, gx, gy], axis=-1)                   # (B,H,W,18)
    # zero-pad features 18 -> 32 so packed K = pack*32 = 128 (lane-dense fc0)
    feat = jnp.pad(feat, ((0, 0), (0, 0), (0, 0),
                          (0, _FC0_IN_PAD - feat.shape[-1])))
    M = B * H * W
    h = pallas_linear(feat.reshape(M, _FC0_IN_PAD),
                      params['fc0_w'], params['fc0_b'],
                      pack=pack, apply_gelu=False)
    h = h.reshape(B, H, W, width)

    for k in range(4):
        spec = spectral_conv2d(h, params[f'spec{k}_w'], modes1, modes2, width)
        h = pallas_residual(h, spec, params[f'w{k}_w'], params[f'w{k}_b'],
                            pack=pack, apply_gelu=(k < 3))          # no GELU last

    out = pallas_head(h.reshape(M, width),
                      params['fc1_w'], params['fc1_b'],
                      params['fc2_w'], params['fc2_b'], pack=pack)
    return out.reshape(B, H, W, 1)


# ------------------------ parameter init & packing -----------------------------

def _pack_factor(width, m_rows):
    if width >= 128 or 128 % width != 0:
        p = 1
    else:
        p = 128 // width
    while p > 1 and m_rows % p != 0:
        p -= 1
    return p


def _block_diag(w, p):
    """(K, N) -> (p*K, p*N) block-diagonal (row-pack weight expansion)."""
    if p == 1:
        return w
    K, N = w.shape
    eye = jnp.eye(p, dtype=w.dtype)
    return jnp.einsum('gh,kn->gkhn', eye, w).reshape(p * K, p * N)


def _tile_bias(b, p):
    return jnp.tile(b, p)


def _choose_spectral_group(mtot, two_ci, two_co, weight_cap):
    """Modes per block-diagonal group: smallest divisor making K lane-dense,
    grown while there are too many grid steps and the group weight stays small."""
    divs = [d for d in range(1, mtot + 1) if mtot % d == 0]
    g = divs[-1]
    for d in divs:
        if d * two_ci >= 128:
            g = d
            break
    for d in divs:
        if d <= g:
            continue
        if (d * two_ci) * (d * two_co) * 4 > weight_cap:
            break
        if mtot // g <= 8:          # already few enough grid steps
            break
        if mtot // d < 2:           # keep >= 2 steps for v7x megacore sharding
            break
        g = d
    return g


def _pack_spectral(w1r, w1i, w2r, w2i, group):
    """4x (Ci,Co,m1,m2) -> (n_groups, group*2Ci, group*2Co) block-diag packed
    [[wr, wi], [-wi, wr]] real weights (complex mul as one real matmul)."""
    def per_mode(wr, wi):
        Ci, Co = wr.shape[0], wr.shape[1]
        wr_m = jnp.transpose(wr, (2, 3, 0, 1)).reshape(-1, Ci, Co)
        wi_m = jnp.transpose(wi, (2, 3, 0, 1)).reshape(-1, Ci, Co)
        top = jnp.concatenate([wr_m, wi_m], axis=-1)      # real-input rows
        bot = jnp.concatenate([-wi_m, wr_m], axis=-1)     # imag-input rows
        return jnp.concatenate([top, bot], axis=1)        # (m1*m2, 2Ci, 2Co)
    w_all = jnp.concatenate([per_mode(w1r, w1i), per_mode(w2r, w2i)], axis=0)
    mtot, K2, N2 = w_all.shape
    n_groups = mtot // group
    w_all = w_all.reshape(n_groups, group, K2, N2)
    eye = jnp.eye(group, dtype=w_all.dtype)
    wbd = jnp.einsum('jl,gjmn->gjmln', eye, w_all)        # block-diag expand
    return wbd.reshape(n_groups, group * K2, group * N2)


def init_raw_params(key, width, modes1, modes2, in_feats=18):
    keys = iter(jax.random.split(key, 64))

    def u(shape, scale=0.1):
        return scale * jax.random.uniform(next(keys), shape, dtype=jnp.float32)

    p = {}
    p['fc0_w'] = u((in_feats, width))
    p['fc0_b'] = u((width,))
    spec_scale = 1.0 / (width * width)
    for k in range(4):
        p[f'conv{k}_w1r'] = u((width, width, modes1, modes2), spec_scale)
        p[f'conv{k}_w1i'] = u((width, width, modes1, modes2), spec_scale)
        p[f'conv{k}_w2r'] = u((width, width, modes1, modes2), spec_scale)
        p[f'conv{k}_w2i'] = u((width, width, modes1, modes2), spec_scale)
        p[f'w{k}_w'] = u((width, width))     # 1x1 Conv2d weight stored (in, out)
        p[f'w{k}_b'] = u((width,))
    p['fc1_w'] = u((width, 128))
    p['fc1_b'] = u((128,))
    p['fc2_w'] = u((128, 1))
    p['fc2_b'] = u((1,))
    return p


def pack_params(raw, pack, modes1, modes2, width):
    """One-time layout precompute: block-diag row packing, fc0 K padding and
    block-diag mode-grouped spectral weights."""
    mtot = 2 * modes1 * modes2
    group = _choose_spectral_group(mtot, 2 * width, 2 * width,
                                   _SPEC_GROUP_WEIGHT_CAP)
    p = {}
    fc0_w = jnp.pad(raw['fc0_w'],
                    ((0, _FC0_IN_PAD - raw['fc0_w'].shape[0]), (0, 0)))
    p['fc0_w'] = _block_diag(fc0_w, pack)
    p['fc0_b'] = _tile_bias(raw['fc0_b'], pack)
    for k in range(4):
        p[f'w{k}_w'] = _block_diag(raw[f'w{k}_w'], pack)
        p[f'w{k}_b'] = _tile_bias(raw[f'w{k}_b'], pack)
        p[f'spec{k}_w'] = _pack_spectral(raw[f'conv{k}_w1r'], raw[f'conv{k}_w1i'],
                                         raw[f'conv{k}_w2r'], raw[f'conv{k}_w2i'],
                                         group)
    p['fc1_w'] = _block_diag(raw['fc1_w'], pack)
    p['fc1_b'] = _tile_bias(raw['fc1_b'], pack)
    p['fc2_w'] = _block_diag(raw['fc2_w'], pack)
    p['fc2_b'] = _tile_bias(raw['fc2_b'], pack)
    return p


# ------------------------------ pure-JAX reference -----------------------------

def fno_reference(raw, x, modes1, modes2, width):
    B, H, W, _ = x.shape
    gridx = jnp.linspace(0.0, 1.0, W, dtype=jnp.float32).reshape(1, 1, W, 1)
    gridy = jnp.linspace(0.0, 1.0, H, dtype=jnp.float32).reshape(1, H, 1, 1)
    gx = jnp.broadcast_to(gridx, (B, H, W, 1))
    gy = jnp.broadcast_to(gridy, (B, H, W, 1))
    h = jnp.concatenate([x, gx, gy], axis=-1) @ raw['fc0_w'] + raw['fc0_b']
    Wf = W // 2 + 1
    for k in range(4):
        x_ft = jnp.fft.rfft2(h, axes=(1, 2))
        w1 = raw[f'conv{k}_w1r'] + 1j * raw[f'conv{k}_w1i']
        w2 = raw[f'conv{k}_w2r'] + 1j * raw[f'conv{k}_w2i']
        out_ft = jnp.zeros((B, H, Wf, width), jnp.complex64)
        out_ft = out_ft.at[:, :modes1, :modes2].set(
            jnp.einsum('bxyi,ioxy->bxyo', x_ft[:, :modes1, :modes2], w1))
        out_ft = out_ft.at[:, H - modes1:, :modes2].set(
            jnp.einsum('bxyi,ioxy->bxyo', x_ft[:, H - modes1:, :modes2], w2))
        spec = jnp.fft.irfft2(out_ft, s=(H, W), axes=(1, 2))
        h = spec + h @ raw[f'w{k}_w'] + raw[f'w{k}_b']
        if k < 3:
            h = jax.nn.gelu(h, approximate=False)
    h = jax.nn.gelu(h @ raw['fc1_w'] + raw['fc1_b'], approximate=False)
    return h @ raw['fc2_w'] + raw['fc2_b']


# ------------------------------------ main -------------------------------------

if __name__ == "__main__":
    B, H, W = 2, 16, 16          # spatial grid (size_y=H, size_x=W)
    in_channels = 16             # +2 grid channels -> 18 = fc0 input features
    width, m1, m2 = 32, 4, 4     # small, consistent with the module structure

    key = jax.random.PRNGKey(0)
    kp, kx = jax.random.split(key)
    raw = init_raw_params(kp, width=width, modes1=m1, modes2=m2)
    x = jax.random.normal(kx, (B, H, W, in_channels), dtype=jnp.float32)

    pack = _pack_factor(width, B * H * W)          # 4 at width=32
    params = pack_params(raw, pack, m1, m2, width)  # one-time layout precompute

    fwd = jax.jit(functools.partial(fno_forward, modes1=m1, modes2=m2,
                                    width=width, pack=pack))
    out = jax.block_until_ready(fwd(params, x))
    assert out.shape == (B, H, W, 1) and out.dtype == jnp.float32

    # numerical sanity check against a pure-JAX reference of the PyTorch model
    ref = fno_reference(raw, x, m1, m2, width)
    err = float(jnp.max(jnp.abs(out - ref)))
    scale = float(jnp.max(jnp.abs(ref))) + 1e-6
    assert err <= 2e-3 * scale + 1e-3, f"mismatch: err={err} scale={scale}"

    print("KERNEL_OK")
</pallas_src>

<mosaic_0001>
module attributes {stable_mosaic.version = 11 : i64} {
  func.func @_linear_kernel(%arg0: i32, %arg1: memref<64x128xf32, #tpu.memory_space<vmem>>, %arg2: memref<128x128xf32, #tpu.memory_space<vmem>>, %arg3: memref<1x128xf32, #tpu.memory_space<vmem>>, %arg4: memref<64x128xf32, #tpu.memory_space<vmem>>) attributes {dimension_semantics = [#tpu.dimension_semantics<parallel>], iteration_bounds = array<i64: 2>, scalar_prefetch = 0 : i64, scratch_operands = 0 : i64, tpu.core_type = #tpu.core_type<tc>, window_params = [{transform_indices = @transform_0, window_bounds = array<i64: 64, 128>}, {pipeline_mode = #tpu.pipeline_mode<synchronous>, transform_indices = @transform_1, window_bounds = array<i64: 128, 128>}, {pipeline_mode = #tpu.pipeline_mode<synchronous>, transform_indices = @transform_2, window_bounds = array<i64: 1, 128>}, {transform_indices = @transform_3, window_bounds = array<i64: 64, 128>}]} {
    %c0 = arith.constant 0 : index
    %c0_0 = arith.constant 0 : index
    %0 = vector.load %arg1[%c0, %c0_0] : memref<64x128xf32, #tpu.memory_space<vmem>>, vector<64x128xf32>
    %c0_1 = arith.constant 0 : index
    %c0_2 = arith.constant 0 : index
    %1 = vector.load %arg2[%c0_1, %c0_2] : memref<128x128xf32, #tpu.memory_space<vmem>>, vector<128x128xf32>
    %cst = arith.constant dense<0.000000e+00> : vector<64x128xf32>
    %2 = tpu.matmul %0, %1, %cst {dimension_numbers = #tpu.dot_dimension_numbers<[1], [0], [0], [1], [0, 0, 1, 1], [], []>} : vector<64x128xf32>, vector<128x128xf32>, vector<64x128xf32> -> vector<64x128xf32>
    %c0_3 = arith.constant 0 : index
    %c0_4 = arith.constant 0 : index
    %3 = vector.load %arg3[%c0_3, %c0_4] : memref<1x128xf32, #tpu.memory_space<vmem>>, vector<1x128xf32>
    %4 = vector.broadcast %3 : vector<1x128xf32> to vector<64x128xf32>
    %5 = arith.addf %2, %4 : vector<64x128xf32>
    %c0_5 = arith.constant 0 : index
    %c0_6 = arith.constant 0 : index
    %6 = vector.load %arg4[%c0_5, %c0_6] : memref<64x128xf32, #tpu.memory_space<vmem>>, vector<64x128xf32>
    tpu.vector_store %arg4[%c0_5, %c0_6], %5 {strides = array<i32>} : memref<64x128xf32, #tpu.memory_space<vmem>>, vector<64x128xf32>,
    return
  }
  func.func @transform_0(%arg0: i32) -> (i32, i32) {
    %c0_i32 = arith.constant 0 : i32
    %c0_i32_0 = arith.constant 0 : i32
    return %arg0, %c0_i32 : i32, i32
  }
  func.func @transform_1(%arg0: i32) -> (i32, i32) {
    %c0_i32 = arith.constant 0 : i32
    %c0_i32_0 = arith.constant 0 : i32
    %c0_i32_1 = arith.constant 0 : i32
    return %c0_i32, %c0_i32_0 : i32, i32
  }
  func.func @transform_2(%arg0: i32) -> (i32, i32) {
    %c0_i32 = arith.constant 0 : i32
    %c0_i32_0 = arith.constant 0 : i32
    %c0_i32_1 = arith.constant 0 : i32
    return %c0_i32, %c0_i32_0 : i32, i32
  }
  func.func @transform_3(%arg0: i32) -> (i32, i32) {
    %c0_i32 = arith.constant 0 : i32
    %c0_i32_0 = arith.constant 0 : i32
    return %arg0, %c0_i32 : i32, i32
  }
}

module attributes {stable_mosaic.version = 11 : i64} {
  func.func @_spectral_kernel(%arg0: i32, %arg1: memref<2x256xf32, #tpu.memory_space<vmem>>, %arg2: memref<1x256x256xf32, #tpu.memory_space<vmem>>, %arg3: memref<2x256xf32, #tpu.memory_space<vmem>>) attributes {dimension_semantics = [#tpu.dimension_semantics<parallel>], iteration_bounds = array<i64: 8>, scalar_prefetch = 0 : i64, scratch_operands = 0 : i64, tpu.core_type = #tpu.core_type<tc>, window_params = [{transform_indices = @transform_0, window_bounds = array<i64: 2, 256>}, {transform_indices = @transform_1, window_bounds = array<i64: 1, 256, 256>}, {transform_indices = @transform_2, window_bounds = array<i64: 2, 256>}]} {
    %c0 = arith.constant 0 : index
    %c0_0 = arith.constant 0 : index
    %0 = vector.load %arg1[%c0, %c0_0] : memref<2x256xf32, #tpu.memory_space<vmem>>, vector<2x256xf32>
    %c0_1 = arith.constant 0 : index
    %c0_2 = arith.constant 0 : index
    %c0_3 = arith.constant 0 : index
    %1 = vector.load %arg2[%c0_1, %c0_2, %c0_3] : memref<1x256x256xf32, #tpu.memory_space<vmem>>, vector<1x256x256xf32>
    %2 = vector.shape_cast %1 : vector<1x256x256xf32> to vector<256x256xf32>
    %cst = arith.constant dense<0.000000e+00> : vector<2x256xf32>
    %3 = tpu.matmul %0, %2, %cst {dimension_numbers = #tpu.dot_dimension_numbers<[1], [0], [0], [1], [0, 0, 1, 1], [], []>} : vector<2x256xf32>, vector<256x256xf32>, vector<2x256xf32> -> vector<2x256xf32>
    %c0_4 = arith.constant 0 : index
    %c0_5 = arith.constant 0 : index
    %4 = vector.load %arg3[%c0_4, %c0_5] : memref<2x256xf32, #tpu.memory_space<vmem>>, vector<2x256xf32>
    tpu.vector_store %arg3[%c0_4, %c0_5], %3 {strides = array<i32>} : memref<2x256xf32, #tpu.memory_space<vmem>>, vector<2x256xf32>,
    return
  }
  func.func @transform_0(%arg0: i32) -> (i32, i32) {
    %c0_i32 = arith.constant 0 : i32
    %c0_i32_0 = arith.constant 0 : i32
    return %c0_i32, %arg0 : i32, i32
  }
  func.func @transform_1(%arg0: i32) -> (i32, i32, i32) {
    %c0_i32 = arith.constant 0 : i32
    %c0_i32_0 = arith.constant 0 : i32
    %c0_i32_1 = arith.constant 0 : i32
    return %arg0, %c0_i32, %c0_i32_0 : i32, i32, i32
  }
  func.func @transform_2(%arg0: i32) -> (i32, i32) {
    %c0_i32 = arith.constant 0 : i32
    %c0_i32_0 = arith.constant 0 : i32
    return %c0_i32, %arg0 : i32, i32
  }
}

module attributes {stable_mosaic.version = 11 : i64} {
  func.func @_residual_kernel(%arg0: i32, %arg1: memref<64x128xf32, #tpu.memory_space<vmem>>, %arg2: memref<64x128xf32, #tpu.memory_space<vmem>>, %arg3: memref<128x128xf32, #tpu.memory_space<vmem>>, %arg4: memref<1x128xf32, #tpu.memory_space<vmem>>, %arg5: memref<64x128xf32, #tpu.memory_space<vmem>>) attributes {dimension_semantics = [#tpu.dimension_semantics<parallel>], iteration_bounds = array<i64: 2>, scalar_prefetch = 0 : i64, scratch_operands = 0 : i64, tpu.core_type = #tpu.core_type<tc>, window_params = [{transform_indices = @transform_0, window_bounds = array<i64: 64, 128>}, {transform_indices = @transform_1, window_bounds = array<i64: 64, 128>}, {pipeline_mode = #tpu.pipeline_mode<synchronous>, transform_indices = @transform_2, window_bounds = array<i64: 128, 128>}, {pipeline_mode = #tpu.pipeline_mode<synchronous>, transform_indices = @transform_3, window_bounds = array<i64: 1, 128>}, {transform_indices = @transform_4, window_bounds = array<i64: 64, 128>}]} {
    %c0 = arith.constant 0 : index
    %c0_0 = arith.constant 0 : index
    %0 = vector.load %arg2[%c0, %c0_0] : memref<64x128xf32, #tpu.memory_space<vmem>>, vector<64x128xf32>
    %c0_1 = arith.constant 0 : index
    %c0_2 = arith.constant 0 : index
    %1 = vector.load %arg1[%c0_1, %c0_2] : memref<64x128xf32, #tpu.memory_space<vmem>>, vector<64x128xf32>
    %c0_3 = arith.constant 0 : index
    %c0_4 = arith.constant 0 : index
    %2 = vector.load %arg3[%c0_3, %c0_4] : memref<128x128xf32, #tpu.memory_space<vmem>>, vector<128x128xf32>
    %cst = arith.constant dense<0.000000e+00> : vector<64x128xf32>
    %3 = tpu.matmul %1, %2, %cst {dimension_numbers = #tpu.dot_dimension_numbers<[1], [0], [0], [1], [0, 0, 1, 1], [], []>} : vector<64x128xf32>, vector<128x128xf32>, vector<64x128xf32> -> vector<64x128xf32>
    %4 = arith.addf %0, %3 : vector<64x128xf32>
    %c0_5 = arith.constant 0 : index
    %c0_6 = arith.constant 0 : index
    %5 = vector.load %arg4[%c0_5, %c0_6] : memref<1x128xf32, #tpu.memory_space<vmem>>, vector<1x128xf32>
    %6 = vector.broadcast %5 : vector<1x128xf32> to vector<64x128xf32>
    %7 = arith.addf %4, %6 : vector<64x128xf32>
    %cst_7 = arith.constant 5.000000e-01 : f32
    %8 = vector.broadcast %cst_7 : f32 to vector<64x128xf32>
    %9 = arith.mulf %8, %7 : vector<64x128xf32>
    %cst_8 = arith.constant 0.707106769 : f32
    %10 = vector.broadcast %cst_8 : f32 to vector<64x128xf32>
    %11 = arith.mulf %7, %10 : vector<64x128xf32>
    %cst_9 = arith.constant 0.000000e+00 : f32
    %12 = vector.broadcast %cst_9 : f32 to vector<64x128xf32>
    %13 = arith.cmpf olt, %11, %12 : vector<64x128xf32>
    %cst_10 = arith.constant -1.000000e+00 : f32
    %cst_11 = arith.constant 1.000000e+00 : f32
    %14 = vector.broadcast %cst_10 : f32 to vector<64x128xf32>
    %15 = vector.broadcast %cst_11 : f32 to vector<64x128xf32>
    %16 = arith.select %13, %14, %15 : vector<64x128xi1>, vector<64x128xf32>
    %17 = math.absf %11 : vector<64x128xf32>
    %cst_12 = arith.constant 0.327591091 : f32
    %18 = vector.broadcast %cst_12 : f32 to vector<64x128xf32>
    %19 = arith.mulf %18, %17 : vector<64x128xf32>
    %cst_13 = arith.constant 1.000000e+00 : f32
    %20 = vector.broadcast %cst_13 : f32 to vector<64x128xf32>
    %21 = arith.addf %20, %19 : vector<64x128xf32>
    %cst_14 = arith.constant 1.000000e+00 : f32
    %22 = vector.broadcast %cst_14 : f32 to vector<64x128xf32>
    %23 = arith.divf %22, %21 : vector<64x128xf32>
    %cst_15 = arith.constant 1.06140542 : f32
    %24 = vector.broadcast %cst_15 : f32 to vector<64x128xf32>
    %25 = arith.mulf %24, %23 : vector<64x128xf32>
    %cst_16 = arith.constant -1.45315206 : f32
    %26 = vector.broadcast %cst_16 : f32 to vector<64x128xf32>
    %27 = arith.addf %25, %26 : vector<64x128xf32>
    %28 = arith.mulf %27, %23 : vector<64x128xf32>
    %cst_17 = arith.constant 1.42141378 : f32
    %29 = vector.broadcast %cst_17 : f32 to vector<64x128xf32>
    %30 = arith.addf %28, %29 : vector<64x128xf32>
    %31 = arith.mulf %30, %23 : vector<64x128xf32>
    %cst_18 = arith.constant -0.284496725 : f32
    %32 = vector.broadcast %cst_18 : f32 to vector<64x128xf32>
    %33 = arith.addf %31, %32 : vector<64x128xf32>
    %34 = arith.mulf %33, %23 : vector<64x128xf32>
    %cst_19 = arith.constant 0.254829586 : f32
    %35 = vector.broadcast %cst_19 : f32 to vector<64x128xf32>
    %36 = arith.addf %34, %35 : vector<64x128xf32>
    %37 = arith.mulf %36, %23 : vector<64x128xf32>
    %cst_20 = arith.constant 0.000000e+00 : f32
    %38 = vector.broadcast %cst_20 : f32 to vector<64x128xf32>
    %39 = arith.subf %38, %17 : vector<64x128xf32>
    %40 = arith.mulf %39, %17 : vector<64x128xf32>
    %41 = math.exp %40 : vector<64x128xf32>
    %42 = arith.mulf %37, %41 : vector<64x128xf32>
    %cst_21 = arith.constant 1.000000e+00 : f32
    %43 = vector.broadcast %cst_21 : f32 to vector<64x128xf32>
    %44 = arith.subf %43, %42 : vector<64x128xf32>
    %45 = arith.mulf %16, %44 : vector<64x128xf32>
    %cst_22 = arith.constant 1.000000e+00 : f32
    %46 = vector.broadcast %cst_22 : f32 to vector<64x128xf32>
    %47 = arith.addf %46, %45 : vector<64x128xf32>
    %48 = arith.mulf %9, %47 : vector<64x128xf32>
    %c0_23 = arith.constant 0 : index
    %c0_24 = arith.constant 0 : index
    %49 = vector.load %arg5[%c0_23, %c0_24] : memref<64x128xf32, #tpu.memory_space<vmem>>, vector<64x128xf32>
    tpu.vector_store %arg5[%c0_23, %c0_24], %48 {strides = array<i32>} : memref<64x128xf32, #tpu.memory_space<vmem>>, vector<64x128xf32>,
    return
  }
  func.func @transform_0(%arg0: i32) -> (i32, i32) {
    %c0_i32 = arith.constant 0 : i32
    %c0_i32_0 = arith.constant 0 : i32
    return %arg0, %c0_i32 : i32, i32
  }
  func.func @transform_1(%arg0: i32) -> (i32, i32) {
    %c0_i32 = arith.constant 0 : i32
    %c0_i32_0 = arith.constant 0 : i32
    return %arg0, %c0_i32 : i32, i32
  }
  func.func @transform_2(%arg0: i32) -> (i32, i32) {
    %c0_i32 = arith.constant 0 : i32
    %c0_i32_0 = arith.constant 0 : i32
    %c0_i32_1 = arith.constant 0 : i32
    return %c0_i32, %c0_i32_0 : i32, i32
  }
  func.func @transform_3(%arg0: i32) -> (i32, i32) {
    %c0_i32 = arith.constant 0 : i32
    %c0_i32_0 = arith.constant 0 : i32
    %c0_i32_1 = arith.constant 0 : i32
    return %c0_i32, %c0_i32_0 : i32, i32
  }
  func.func @transform_4(%arg0: i32) -> (i32, i32) {
    %c0_i32 = arith.constant 0 : i32
    %c0_i32_0 = arith.constant 0 : i32
    return %arg0, %c0_i32 : i32, i32
  }
}

module attributes {stable_mosaic.version = 11 : i64} {
  func.func @_residual_kernel(%arg0: i32, %arg1: memref<64x128xf32, #tpu.memory_space<vmem>>, %arg2: memref<64x128xf32, #tpu.memory_space<vmem>>, %arg3: memref<128x128xf32, #tpu.memory_space<vmem>>, %arg4: memref<1x128xf32, #tpu.memory_space<vmem>>, %arg5: memref<64x128xf32, #tpu.memory_space<vmem>>) attributes {dimension_semantics = [#tpu.dimension_semantics<parallel>], iteration_bounds = array<i64: 2>, scalar_prefetch = 0 : i64, scratch_operands = 0 : i64, tpu.core_type = #tpu.core_type<tc>, window_params = [{transform_indices = @transform_0, window_bounds = array<i64: 64, 128>}, {transform_indices = @transform_1, window_bounds = array<i64: 64, 128>}, {pipeline_mode = #tpu.pipeline_mode<synchronous>, transform_indices = @transform_2, window_bounds = array<i64: 128, 128>}, {pipeline_mode = #tpu.pipeline_mode<synchronous>, transform_indices = @transform_3, window_bounds = array<i64: 1, 128>}, {transform_indices = @transform_4, window_bounds = array<i64: 64, 128>}]} {
    %c0 = arith.constant 0 : index
    %c0_0 = arith.constant 0 : index
    %0 = vector.load %arg2[%c0, %c0_0] : memref<64x128xf32, #tpu.memory_space<vmem>>, vector<64x128xf32>
    %c0_1 = arith.constant 0 : index
    %c0_2 = arith.constant 0 : index
    %1 = vector.load %arg1[%c0_1, %c0_2] : memref<64x128xf32, #tpu.memory_space<vmem>>, vector<64x128xf32>
    %c0_3 = arith.constant 0 : index
    %c0_4 = arith.constant 0 : index
    %2 = vector.load %arg3[%c0_3, %c0_4] : memref<128x128xf32, #tpu.memory_space<vmem>>, vector<128x128xf32>
    %cst = arith.constant dense<0.000000e+00> : vector<64x128xf32>
    %3 = tpu.matmul %1, %2, %cst {dimension_numbers = #tpu.dot_dimension_numbers<[1], [0], [0], [1], [0, 0, 1, 1], [], []>} : vector<64x128xf32>, vector<128x128xf32>, vector<64x128xf32> -> vector<64x128xf32>
    %4 = arith.addf %0, %3 : vector<64x128xf32>
    %c0_5 = arith.constant 0 : index
    %c0_6 = arith.constant 0 : index
    %5 = vector.load %arg4[%c0_5, %c0_6] : memref<1x128xf32, #tpu.memory_space<vmem>>, vector<1x128xf32>
    %6 = vector.broadcast %5 : vector<1x128xf32> to vector<64x128xf32>
    %7 = arith.addf %4, %6 : vector<64x128xf32>
    %c0_7 = arith.constant 0 : index
    %c0_8 = arith.constant 0 : index
    %8 = vector.load %arg5[%c0_7, %c0_8] : memref<64x128xf32, #tpu.memory_space<vmem>>, vector<64x128xf32>
    tpu.vector_store %arg5[%c0_7, %c0_8], %7 {strides = array<i32>} : memref<64x128xf32, #tpu.memory_space<vmem>>, vector<64x128xf32>,
    return
  }
  func.func @transform_0(%arg0: i32) -> (i32, i32) {
    %c0_i32 = arith.constant 0 : i32
    %c0_i32_0 = arith.constant 0 : i32
    return %arg0, %c0_i32 : i32, i32
  }
  func.func @transform_1(%arg0: i32) -> (i32, i32) {
    %c0_i32 = arith.constant 0 : i32
    %c0_i32_0 = arith.constant 0 : i32
    return %arg0, %c0_i32 : i32, i32
  }
  func.func @transform_2(%arg0: i32) -> (i32, i32) {
    %c0_i32 = arith.constant 0 : i32
    %c0_i32_0 = arith.constant 0 : i32
    %c0_i32_1 = arith.constant 0 : i32
    return %c0_i32, %c0_i32_0 : i32, i32
  }
  func.func @transform_3(%arg0: i32) -> (i32, i32) {
    %c0_i32 = arith.constant 0 : i32
    %c0_i32_0 = arith.constant 0 : i32
    %c0_i32_1 = arith.constant 0 : i32
    return %c0_i32, %c0_i32_0 : i32, i32
  }
  func.func @transform_4(%arg0: i32) -> (i32, i32) {
    %c0_i32 = arith.constant 0 : i32
    %c0_i32_0 = arith.constant 0 : i32
    return %arg0, %c0_i32 : i32, i32
  }
}

module attributes {stable_mosaic.version = 11 : i64} {
  func.func @_head_kernel(%arg0: i32, %arg1: memref<64x128xf32, #tpu.memory_space<vmem>>, %arg2: memref<128x512xf32, #tpu.memory_space<vmem>>, %arg3: memref<1x512xf32, #tpu.memory_space<vmem>>, %arg4: memref<512x4xf32, #tpu.memory_space<vmem>>, %arg5: memref<1x4xf32, #tpu.memory_space<vmem>>, %arg6: memref<64x4xf32, #tpu.memory_space<vmem>>) attributes {dimension_semantics = [#tpu.dimension_semantics<parallel>], iteration_bounds = array<i64: 2>, scalar_prefetch = 0 : i64, scratch_operands = 0 : i64, tpu.core_type = #tpu.core_type<tc>, window_params = [{transform_indices = @transform_0, window_bounds = array<i64: 64, 128>}, {pipeline_mode = #tpu.pipeline_mode<synchronous>, transform_indices = @transform_1, window_bounds = array<i64: 128, 512>}, {pipeline_mode = #tpu.pipeline_mode<synchronous>, transform_indices = @transform_2, window_bounds = array<i64: 1, 512>}, {pipeline_mode = #tpu.pipeline_mode<synchronous>, transform_indices = @transform_3, window_bounds = array<i64: 512, 4>}, {pipeline_mode = #tpu.pipeline_mode<synchronous>, transform_indices = @transform_4, window_bounds = array<i64: 1, 4>}, {transform_indices = @transform_5, window_bounds = array<i64: 64, 4>}]} {
    %c0 = arith.constant 0 : index
    %c0_0 = arith.constant 0 : index
    %0 = vector.load %arg1[%c0, %c0_0] : memref<64x128xf32, #tpu.memory_space<vmem>>, vector<64x128xf32>
    %cst = arith.constant 0.000000e+00 : f32
    %1 = vector.broadcast %cst : f32 to vector<64x4xf32>
    %c0_1 = arith.constant 0 : index
    %c0_2 = arith.constant 0 : index
    %2 = vector.load %arg2[%c0_1, %c0_2] : memref<128x512xf32, #tpu.memory_space<vmem>>, vector<128x128xf32>
    %cst_3 = arith.constant dense<0.000000e+00> : vector<64x128xf32>
    %3 = tpu.matmul %0, %2, %cst_3 {dimension_numbers = #tpu.dot_dimension_numbers<[1], [0], [0], [1], [0, 0, 1, 1], [], []>} : vector<64x128xf32>, vector<128x128xf32>, vector<64x128xf32> -> vector<64x128xf32>
    %c0_4 = arith.constant 0 : index
    %c0_5 = arith.constant 0 : index
    %4 = vector.load %arg3[%c0_4, %c0_5] : memref<1x512xf32, #tpu.memory_space<vmem>>, vector<1x128xf32>
    %5 = vector.broadcast %4 : vector<1x128xf32> to vector<64x128xf32>
    %6 = arith.addf %3, %5 : vector<64x128xf32>
    %cst_6 = arith.constant 5.000000e-01 : f32
    %7 = vector.broadcast %cst_6 : f32 to vector<64x128xf32>
    %8 = arith.mulf %7, %6 : vector<64x128xf32>
    %cst_7 = arith.constant 0.707106769 : f32
    %9 = vector.broadcast %cst_7 : f32 to vector<64x128xf32>
    %10 = arith.mulf %6, %9 : vector<64x128xf32>
    %cst_8 = arith.constant 0.000000e+00 : f32
    %11 = vector.broadcast %cst_8 : f32 to vector<64x128xf32>
    %12 = arith.cmpf olt, %10, %11 : vector<64x128xf32>
    %cst_9 = arith.constant -1.000000e+00 : f32
    %cst_10 = arith.constant 1.000000e+00 : f32
    %13 = vector.broadcast %cst_9 : f32 to vector<64x128xf32>
    %14 = vector.broadcast %cst_10 : f32 to vector<64x128xf32>
    %15 = arith.select %12, %13, %14 : vector<64x128xi1>, vector<64x128xf32>
    %16 = math.absf %10 : vector<64x128xf32>
    %cst_11 = arith.constant 0.327591091 : f32
    %17 = vector.broadcast %cst_11 : f32 to vector<64x128xf32>
    %18 = arith.mulf %17, %16 : vector<64x128xf32>
    %cst_12 = arith.constant 1.000000e+00 : f32
    %19 = vector.broadcast %cst_12 : f32 to vector<64x128xf32>
    %20 = arith.addf %19, %18 : vector<64x128xf32>
    %cst_13 = arith.constant 1.000000e+00 : f32
    %21 = vector.broadcast %cst_13 : f32 to vector<64x128xf32>
    %22 = arith.divf %21, %20 : vector<64x128xf32>
    %cst_14 = arith.constant 1.06140542 : f32
    %23 = vector.broadcast %cst_14 : f32 to vector<64x128xf32>
    %24 = arith.mulf %23, %22 : vector<64x128xf32>
    %cst_15 = arith.constant -1.45315206 : f32
    %25 = vector.broadcast %cst_15 : f32 to vector<64x128xf32>
    %26 = arith.addf %24, %25 : vector<64x128xf32>
    %27 = arith.mulf %26, %22 : vector<64x128xf32>
    %cst_16 = arith.constant 1.42141378 : f32
    %28 = vector.broadcast %cst_16 : f32 to vector<64x128xf32>
    %29 = arith.addf %27, %28 : vector<64x128xf32>
    %30 = arith.mulf %29, %22 : vector<64x128xf32>
    %cst_17 = arith.constant -0.284496725 : f32
    %31 = vector.broadcast %cst_17 : f32 to vector<64x128xf32>
    %32 = arith.addf %30, %31 : vector<64x128xf32>
    %33 = arith.mulf %32, %22 : vector<64x128xf32>
    %cst_18 = arith.constant 0.254829586 : f32
    %34 = vector.broadcast %cst_18 : f32 to vector<64x128xf32>
    %35 = arith.addf %33, %34 : vector<64x128xf32>
    %36 = arith.mulf %35, %22 : vector<64x128xf32>
    %cst_19 = arith.constant 0.000000e+00 : f32
    %37 = vector.broadcast %cst_19 : f32 to vector<64x128xf32>
    %38 = arith.subf %37, %16 : vector<64x128xf32>
    %39 = arith.mulf %38, %16 : vector<64x128xf32>
    %40 = math.exp %39 : vector<64x128xf32>
    %41 = arith.mulf %36, %40 : vector<64x128xf32>
    %cst_20 = arith.constant 1.000000e+00 : f32
    %42 = vector.broadcast %cst_20 : f32 to vector<64x128xf32>
    %43 = arith.subf %42, %41 : vector<64x128xf32>
    %44 = arith.mulf %15, %43 : vector<64x128xf32>
    %cst_21 = arith.constant 1.000000e+00 : f32
    %45 = vector.broadcast %cst_21 : f32 to vector<64x128xf32>
    %46 = arith.addf %45, %44 : vector<64x128xf32>
    %47 = arith.mulf %8, %46 : vector<64x128xf32>
    %c0_22 = arith.constant 0 : index
    %c0_23 = arith.constant 0 : index
    %48 = vector.load %arg4[%c0_22, %c0_23] : memref<512x4xf32, #tpu.memory_space<vmem>>, vector<128x4xf32>
    %cst_24 = arith.constant dense<0.000000e+00> : vector<64x4xf32>
    %49 = tpu.matmul %47, %48, %cst_24 {dimension_numbers = #tpu.dot_dimension_numbers<[1], [0], [0], [1], [0, 0, 1, 1], [], []>} : vector<64x128xf32>, vector<128x4xf32>, vector<64x4xf32> -> vector<64x4xf32>
    %50 = arith.addf %1, %49 : vector<64x4xf32>
    %c0_25 = arith.constant 0 : index
    %c128 = arith.constant 128 : index
    %51 = vector.load %arg2[%c0_25, %c128] : memref<128x512xf32, #tpu.memory_space<vmem>>, vector<128x128xf32>
    %cst_26 = arith.constant dense<0.000000e+00> : vector<64x128xf32>
    %52 = tpu.matmul %0, %51, %cst_26 {dimension_numbers = #tpu.dot_dimension_numbers<[1], [0], [0], [1], [0, 0, 1, 1], [], []>} : vector<64x128xf32>, vector<128x128xf32>, vector<64x128xf32> -> vector<64x128xf32>
    %c0_27 = arith.constant 0 : index
    %c128_28 = arith.constant 128 : index
    %53 = vector.load %arg3[%c0_27, %c128_28] : memref<1x512xf32, #tpu.memory_space<vmem>>, vector<1x128xf32>
    %54 = vector.broadcast %53 : vector<1x128xf32> to vector<64x128xf32>
    %55 = arith.addf %52, %54 : vector<64x128xf32>
    %cst_29 = arith.constant 5.000000e-01 : f32
    %56 = vector.broadcast %cst_29 : f32 to vector<64x128xf32>
    %57 = arith.mulf %56, %55 : vector<64x128xf32>
    %cst_30 = arith.constant 0.707106769 : f32
    %58 = vector.broadcast %cst_30 : f32 to vector<64x128xf32>
    %59 = arith.mulf %55, %58 : vector<64x128xf32>
    %cst_31 = arith.constant 0.000000e+00 : f32
    %60 = vector.broadcast %cst_31 : f32 to vector<64x128xf32>
    %61 = arith.cmpf olt, %59, %60 : vector<64x128xf32>
    %cst_32 = arith.constant -1.000000e+00 : f32
    %cst_33 = arith.constant 1.000000e+00 : f32
    %62 = vector.broadcast %cst_32 : f32 to vector<64x128xf32>
    %63 = vector.broadcast %cst_33 : f32 to vector<64x128xf32>
    %64 = arith.select %61, %62, %63 : vector<64x128xi1>, vector<64x128xf32>
    %65 = math.absf %59 : vector<64x128xf32>
    %cst_34 = arith.constant 0.327591091 : f32
    %66 = vector.broadcast %cst_34 : f32 to vector<64x128xf32>
    %67 = arith.mulf %66, %65 : vector<64x128xf32>
    %cst_35 = arith.constant 1.000000e+00 : f32
    %68 = vector.broadcast %cst_35 : f32 to vector<64x128xf32>
    %69 = arith.addf %68, %67 : vector<64x128xf32>
    %cst_36 = arith.constant 1.000000e+00 : f32
    %70 = vector.broadcast %cst_36 : f32 to vector<64x128xf32>
    %71 = arith.divf %70, %69 : vector<64x128xf32>
    %cst_37 = arith.constant 1.06140542 : f32
    %72 = vector.broadcast %cst_37 : f32 to vector<64x128xf32>
    %73 = arith.mulf %72, %71 : vector<64x128xf32>
    %cst_38 = arith.constant -1.45315206 : f32
    %74 = vector.broadcast %cst_38 : f32 to vector<64x128xf32>
    %75 = arith.addf %73, %74 : vector<64x128xf32>
    %76 = arith.mulf %75, %71 : vector<64x128xf32>
    %cst_39 = arith.constant 1.42141378 : f32
    %77 = vector.broadcast %cst_39 : f32 to vector<64x128xf32>
    %78 = arith.addf %76, %77 : vector<64x128xf32>
    %79 = arith.mulf %78, %71 : vector<64x128xf32>
    %cst_40 = arith.constant -0.284496725 : f32
    %80 = vector.broadcast %cst_40 : f32 to vector<64x128xf32>
    %81 = arith.addf %79, %80 : vector<64x128xf32>
    %82 = arith.mulf %81, %71 : vector<64x128xf32>
    %cst_41 = arith.constant 0.254829586 : f32
    %83 = vector.broadcast %cst_41 : f32 to vector<64x128xf32>
    %84 = arith.addf %82, %83 : vector<64x128xf32>
    %85 = arith.mulf %84, %71 : vector<64x128xf32>
    %cst_42 = arith.constant 0.000000e+00 : f32
    %86 = vector.broadcast %cst_42 : f32 to vector<64x128xf32>
    %87 = arith.subf %86, %65 : vector<64x128xf32>
    %88 = arith.mulf %87, %65 : vector<64x128xf32>
    %89 = math.exp %88 : vector<64x128xf32>
    %90 = arith.mulf %85, %89 : vector<64x128xf32>
    %cst_43 = arith.constant 1.000000e+00 : f32
    %91 = vector.broadcast %cst_43 : f32 to vector<64x128xf32>
    %92 = arith.subf %91, %90 : vector<64x128xf32>
    %93 = arith.mulf %64, %92 : vector<64x128xf32>
    %cst_44 = arith.constant 1.000000e+00 : f32
    %94 = vector.broadcast %cst_44 : f32 to vector<64x128xf32>
    %95 = arith.addf %94, %93 : vector<64x128xf32>
    %96 = arith.mulf %57, %95 : vector<64x128xf32>
    %c128_45 = arith.constant 128 : index
    %c0_46 = arith.constant 0 : index
    %97 = vector.load %arg4[%c128_45, %c0_46] : memref<512x4xf32, #tpu.memory_space<vmem>>, vector<128x4xf32>
    %cst_47 = arith.constant dense<0.000000e+00> : vector<64x4xf32>
    %98 = tpu.matmul %96, %97, %cst_47 {dimension_numbers = #tpu.dot_dimension_numbers<[1], [0], [0], [1], [0, 0, 1, 1], [], []>} : vector<64x128xf32>, vector<128x4xf32>, vector<64x4xf32> -> vector<64x4xf32>
    %99 = arith.addf %50, %98 : vector<64x4xf32>
    %c0_48 = arith.constant 0 : index
    %c256 = arith.constant 256 : index
    %100 = vector.load %arg2[%c0_48, %c256] : memref<128x512xf32, #tpu.memory_space<vmem>>, vector<128x128xf32>
    %cst_49 = arith.constant dense<0.000000e+00> : vector<64x128xf32>
    %101 = tpu.matmul %0, %100, %cst_49 {dimension_numbers = #tpu.dot_dimension_numbers<[1], [0], [0], [1], [0, 0, 1, 1], [], []>} : vector<64x128xf32>, vector<128x128xf32>, vector<64x128xf32> -> vector<64x128xf32>
    %c0_50 = arith.constant 0 : index
    %c256_51 = arith.constant 256 : index
    %102 = vector.load %arg3[%c0_50, %c256_51] : memref<1x512xf32, #tpu.memory_space<vmem>>, vector<1x128xf32>
    %103 = vector.broadcast %102 : vector<1x128xf32> to vector<64x128xf32>
    %104 = arith.addf %101, %103 : vector<64x128xf32>
    %cst_52 = arith.constant 5.000000e-01 : f32
    %105 = vector.broadcast %cst_52 : f32 to vector<64x128xf32>
    %106 = arith.mulf %105, %104 : vector<64x128xf32>
    %cst_53 = arith.constant 0.707106769 : f32
    %107 = vector.broadcast %cst_53 : f32 to vector<64x128xf32>
    %108 = arith.mulf %104, %107 : vector<64x128xf32>
    %cst_54 = arith.constant 0.000000e+00 : f32
    %109 = vector.broadcast %cst_54 : f32 to vector<64x128xf32>
    %110 = arith.cmpf olt, %108, %109 : vector<64x128xf32>
    %cst_55 = arith.constant -1.000000e+00 : f32
    %cst_56 = arith.constant 1.000000e+00 : f32
    %111 = vector.broadcast %cst_55 : f32 to vector<64x128xf32>
    %112 = vector.broadcast %cst_56 : f32 to vector<64x128xf32>
    %113 = arith.select %110, %111, %112 : vector<64x128xi1>, vector<64x128xf32>
    %114 = math.absf %108 : vector<64x128xf32>
    %cst_57 = arith.constant 0.327591091 : f32
    %115 = vector.broadcast %cst_57 : f32 to vector<64x128xf32>
    %116 = arith.mulf %115, %114 : vector<64x128xf32>
    %cst_58 = arith.constant 1.000000e+00 : f32
    %117 = vector.broadcast %cst_58 : f32 to vector<64x128xf32>
    %118 = arith.addf %117, %116 : vector<64x128xf32>
    %cst_59 = arith.constant 1.000000e+00 : f32
    %119 = vector.broadcast %cst_59 : f32 to vector<64x128xf32>
    %120 = arith.divf %119, %118 : vector<64x128xf32>
    %cst_60 = arith.constant 1.06140542 : f32
    %121 = vector.broadcast %cst_60 : f32 to vector<64x128xf32>
    %122 = arith.mulf %121, %120 : vector<64x128xf32>
    %cst_61 = arith.constant -1.45315206 : f32
    %123 = vector.broadcast %cst_61 : f32 to vector<64x128xf32>
    %124 = arith.addf %122, %123 : vector<64x128xf32>
    %125 = arith.mulf %124, %120 : vector<64x128xf32>
    %cst_62 = arith.constant 1.42141378 : f32
    %126 = vector.broadcast %cst_62 : f32 to vector<64x128xf32>
    %127 = arith.addf %125, %126 : vector<64x128xf32>
    %128 = arith.mulf %127, %120 : vector<64x128xf32>
    %cst_63 = arith.constant -0.284496725 : f32
    %129 = vector.broadcast %cst_63 : f32 to vector<64x128xf32>
    %130 = arith.addf %128, %129 : vector<64x128xf32>
    %131 = arith.mulf %130, %120 : vector<64x128xf32>
    %cst_64 = arith.constant 0.254829586 : f32
    %132 = vector.broadcast %cst_64 : f32 to vector<64x128xf32>
    %133 = arith.addf %131, %132 : vector<64x128xf32>
    %134 = arith.mulf %133, %120 : vector<64x128xf32>
    %cst_65 = arith.constant 0.000000e+00 : f32
    %135 = vector.broadcast %cst_65 : f32 to vector<64x128xf32>
    %136 = arith.subf %135, %114 : vector<64x128xf32>
    %137 = arith.mulf %136, %114 : vector<64x128xf32>
    %138 = math.exp %137 : vector<64x128xf32>
    %139 = arith.mulf %134, %138 : vector<64x128xf32>
    %cst_66 = arith.constant 1.000000e+00 : f32
    %140 = vector.broadcast %cst_66 : f32 to vector<64x128xf32>
    %141 = arith.subf %140, %139 : vector<64x128xf32>
    %142 = arith.mulf %113, %141 : vector<64x128xf32>
    %cst_67 = arith.constant 1.000000e+00 : f32
    %143 = vector.broadcast %cst_67 : f32 to vector<64x128xf32>
    %144 = arith.addf %143, %142 : vector<64x128xf32>
    %145 = arith.mulf %106, %144 : vector<64x128xf32>
    %c256_68 = arith.constant 256 : index
    %c0_69 = arith.constant 0 : index
    %146 = vector.load %arg4[%c256_68, %c0_69] : memref<512x4xf32, #tpu.memory_space<vmem>>, vector<128x4xf32>
    %cst_70 = arith.constant dense<0.000000e+00> : vector<64x4xf32>
    %147 = tpu.matmul %145, %146, %cst_70 {dimension_numbers = #tpu.dot_dimension_numbers<[1], [0], [0], [1], [0, 0, 1, 1], [], []>} : vector<64x128xf32>, vector<128x4xf32>, vector<64x4xf32> -> vector<64x4xf32>
    %148 = arith.addf %99, %147 : vector<64x4xf32>
    %c0_71 = arith.constant 0 : index
    %c384 = arith.constant 384 : index
    %149 = vector.load %arg2[%c0_71, %c384] : memref<128x512xf32, #tpu.memory_space<vmem>>, vector<128x128xf32>
    %cst_72 = arith.constant dense<0.000000e+00> : vector<64x128xf32>
    %150 = tpu.matmul %0, %149, %cst_72 {dimension_numbers = #tpu.dot_dimension_numbers<[1], [0], [0], [1], [0, 0, 1, 1], [], []>} : vector<64x128xf32>, vector<128x128xf32>, vector<64x128xf32> -> vector<64x128xf32>
    %c0_73 = arith.constant 0 : index
    %c384_74 = arith.constant 384 : index
    %151 = vector.load %arg3[%c0_73, %c384_74] : memref<1x512xf32, #tpu.memory_space<vmem>>, vector<1x128xf32>
    %152 = vector.broadcast %151 : vector<1x128xf32> to vector<64x128xf32>
    %153 = arith.addf %150, %152 : vector<64x128xf32>
    %cst_75 = arith.constant 5.000000e-01 : f32
    %154 = vector.broadcast %cst_75 : f32 to vector<64x128xf32>
    %155 = arith.mulf %154, %153 : vector<64x128xf32>
    %cst_76 = arith.constant 0.707106769 : f32
    %156 = vector.broadcast %cst_76 : f32 to vector<64x128xf32>
    %157 = arith.mulf %153, %156 : vector<64x128xf32>
    %cst_77 = arith.constant 0.000000e+00 : f32
    %158 = vector.broadcast %cst_77 : f32 to vector<64x128xf32>
    %159 = arith.cmpf olt, %157, %158 : vector<64x128xf32>
    %cst_78 = arith.constant -1.000000e+00 : f32
    %cst_79 = arith.constant 1.000000e+00 : f32
    %160 = vector.broadcast %cst_78 : f32 to vector<64x128xf32>
    %161 = vector.broadcast %cst_79 : f32 to vector<64x128xf32>
    %162 = arith.select %159, %160, %161 : vector<64x128xi1>, vector<64x128xf32>
    %163 = math.absf %157 : vector<64x128xf32>
    %cst_80 = arith.constant 0.327591091 : f32
    %164 = vector.broadcast %cst_80 : f32 to vector<64x128xf32>
    %165 = arith.mulf %164, %163 : vector<64x128xf32>
    %cst_81 = arith.constant 1.000000e+00 : f32
    %166 = vector.broadcast %cst_81 : f32 to vector<64x128xf32>
    %167 = arith.addf %166, %165 : vector<64x128xf32>
    %cst_82 = arith.constant 1.000000e+00 : f32
    %168 = vector.broadcast %cst_82 : f32 to vector<64x128xf32>
    %169 = arith.divf %168, %167 : vector<64x128xf32>
    %cst_83 = arith.constant 1.06140542 : f32
    %170 = vector.broadcast %cst_83 : f32 to vector<64x128xf32>
    %171 = arith.mulf %170, %169 : vector<64x128xf32>
    %cst_84 = arith.constant -1.45315206 : f32
    %172 = vector.broadcast %cst_84 : f32 to vector<64x128xf32>
    %173 = arith.addf %171, %172 : vector<64x128xf32>
    %174 = arith.mulf %173, %169 : vector<64x128xf32>
    %cst_85 = arith.constant 1.42141378 : f32
    %175 = vector.broadcast %cst_85 : f32 to vector<64x128xf32>
    %176 = arith.addf %174, %175 : vector<64x128xf32>
    %177 = arith.mulf %176, %169 : vector<64x128xf32>
    %cst_86 = arith.constant -0.284496725 : f32
    %178 = vector.broadcast %cst_86 : f32 to vector<64x128xf32>
    %179 = arith.addf %177, %178 : vector<64x128xf32>
    %180 = arith.mulf %179, %169 : vector<64x128xf32>
    %cst_87 = arith.constant 0.254829586 : f32
    %181 = vector.broadcast %cst_87 : f32 to vector<64x128xf32>
    %182 = arith.addf %180, %181 : vector<64x128xf32>
    %183 = arith.mulf %182, %169 : vector<64x128xf32>
    %cst_88 = arith.constant 0.000000e+00 : f32
    %184 = vector.broadcast %cst_88 : f32 to vector<64x128xf32>
    %185 = arith.subf %184, %163 : vector<64x128xf32>
    %186 = arith.mulf %185, %163 : vector<64x128xf32>
    %187 = math.exp %186 : vector<64x128xf32>
    %188 = arith.mulf %183, %187 : vector<64x128xf32>
    %cst_89 = arith.constant 1.000000e+00 : f32
    %189 = vector.broadcast %cst_89 : f32 to vector<64x128xf32>
    %190 = arith.subf %189, %188 : vector<64x128xf32>
    %191 = arith.mulf %162, %190 : vector<64x128xf32>
    %cst_90 = arith.constant 1.000000e+00 : f32
    %192 = vector.broadcast %cst_90 : f32 to vector<64x128xf32>
    %193 = arith.addf %192, %191 : vector<64x128xf32>
    %194 = arith.mulf %155, %193 : vector<64x128xf32>
    %c384_91 = arith.constant 384 : index
    %c0_92 = arith.constant 0 : index
    %195 = vector.load %arg4[%c384_91, %c0_92] : memref<512x4xf32, #tpu.memory_space<vmem>>, vector<128x4xf32>
    %cst_93 = arith.constant dense<0.000000e+00> : vector<64x4xf32>
    %196 = tpu.matmul %194, %195, %cst_93 {dimension_numbers = #tpu.dot_dimension_numbers<[1], [0], [0], [1], [0, 0, 1, 1], [], []>} : vector<64x128xf32>, vector<128x4xf32>, vector<64x4xf32> -> vector<64x4xf32>
    %197 = arith.addf %148, %196 : vector<64x4xf32>
    %c0_94 = arith.constant 0 : index
    %c0_95 = arith.constant 0 : index
    %198 = vector.load %arg5[%c0_94, %c0_95] : memref<1x4xf32, #tpu.memory_space<vmem>>, vector<1x4xf32>
    %199 = vector.broadcast %198 : vector<1x4xf32> to vector<64x4xf32>
    %200 = arith.addf %197, %199 : vector<64x4xf32>
    %c0_96 = arith.constant 0 : index
    %c0_97 = arith.constant 0 : index
    %201 = vector.load %arg6[%c0_96, %c0_97] : memref<64x4xf32, #tpu.memory_space<vmem>>, vector<64x4xf32>
    tpu.vector_store %arg6[%c0_96, %c0_97], %200 {strides = array<i32>} : memref<64x4xf32, #tpu.memory_space<vmem>>, vector<64x4xf32>,
    return
  }
  func.func @transform_0(%arg0: i32) -> (i32, i32) {
    %c0_i32 = arith.constant 0 : i32
    %c0_i32_0 = arith.constant 0 : i32
    return %arg0, %c0_i32 : i32, i32
  }
  func.func @transform_1(%arg0: i32) -> (i32, i32) {
    %c0_i32 = arith.constant 0 : i32
    %c0_i32_0 = arith.constant 0 : i32
    %c0_i32_1 = arith.constant 0 : i32
    return %c0_i32, %c0_i32_0 : i32, i32
  }
  func.func @transform_2(%arg0: i32) -> (i32, i32) {
    %c0_i32 = arith.constant 0 : i32
    %c0_i32_0 = arith.constant 0 : i32
    %c0_i32_1 = arith.constant 0 : i32
    return %c0_i32, %c0_i32_0 : i32, i32
  }
  func.func @transform_3(%arg0: i32) -> (i32, i32) {
    %c0_i32 = arith.constant 0 : i32
    %c0_i32_0 = arith.constant 0 : i32
    %c0_i32_1 = arith.constant 0 : i32
    return %c0_i32, %c0_i32_0 : i32, i32
  }
  func.func @transform_4(%arg0: i32) -> (i32, i32) {
    %c0_i32 = arith.constant 0 : i32
    %c0_i32_0 = arith.constant 0 : i32
    %c0_i32_1 = arith.constant 0 : i32
    return %c0_i32, %c0_i32_0 : i32, i32
  }
  func.func @transform_5(%arg0: i32) -> (i32, i32) {
    %c0_i32 = arith.constant 0 : i32
    %c0_i32_0 = arith.constant 0 : i32
    return %arg0, %c0_i32 : i32, i32
  }
}

</mosaic_0001>

<bundles_post_ra>
// kernel: fno_forward.10
= control target key start
LH: loop header
LB: loop body
LE: loop exit
PB: predicated region body
PF: predicated region fallthrough
CT: control target
= control target key end

     0   :  { %8 = vsyncpa [#allocation3], 0  ;;  %s1117_s0 = inlined_call_operand.hbm [shape: f32[128,128], index: 0, kind: input, shape index: {}]   ;;  %s1118_s1 = inlined_call_operand.hbm [shape: f32[128,128], index: 1, kind: input, shape index: {}]   ;;  %s1119_s2 = inlined_call_operand.hbm [shape: f32[1,128], index: 2, kind: input, shape index: {}]   ;;  %s1120_s3 = inlined_call_operand.hbm [shape: f32[128,128], index: 3, kind: output, shape index: {}]  }
   0x1   :  { %10 = vsyncpa [#allocation3 + $0x1], 0 }
   0x2   :  { %11 = vsyncpa [#allocation6], 0 }
   0x3   :  { %12 = vsyncpa [#allocation4], 0 }
   0x4   :  { %14 = vsyncpa [#allocation4 + $0x1], 0  ;;  %s862_s12 = smov 0   ;;  %s864_s13 = smov 0  }
   0x5   :  { %s866_s14 = smov 0   ;;  %s868_s15 = smov 0  }
   0x6 LB: > { %s883_s16 = sadd.s32 4294967295, %s832_s15   ;;  %s468_s17 = sadd.s32 4294967294, %s832_s15   ;;  %s832_s15 = sphi %s868_s15, %s1140_s15   ;;  %s828_s14 = sphi %s866_s14, %s1139_s14   ;;  %s824_s13 = sphi %s864_s13, %s1138_s13   ;;  %s820_s12 = sphi %s862_s12, %s1137_s12  }
   0x7   : > { %p40_p0 = scmp.ne.s32.totalorder %s824_s13, %s820_s12  ;;  %p1121_p1 = scmp.eq.s32.totalorder %s883_s16, 0 }
   0x8   : > { %p112_p3 = scmp.eq.s32.totalorder %s468_s17, 1  ;;  %p469_p5 = scmp.ge.s32.totalorder %s832_s15, 1 }
   0x9   : > { %p892_p4 = por %p1121_p1, %p40_p0  ;;  %p119_p7 = scmp.lt.s32.totalorder %s832_s15, 3 }
   0xa   : > { %p897_p6 = por %p112_p3, %p40_p0  ;;  %s834_s21 = smov [#allocation5]  }
   0xb   : > { %s1124_s18 = scalar_select %p892_p4, 1, 0 }
   0xc   : > { %s1125_s19 = scalar_select %p897_p6, 1, 0 }
   0xd   : > { %p902_p8 = pnand %p469_p5, %p119_p7  ;;  %s131_s22 = sshll.u32 %s834_s21, 4  ;;  %s906_s22 = int_to_ptr.vmem [resolvable:$true] %s131_s22 }
   0xe   : > { %s835_s24 = smov [#allocation7]   ;;  %s676_s28 = scalar_lea.hbm %s1118_s1, 2048 }
   0xf   : > { %p617_p9 = pneg %p902_p8  ;;  %s145_s25 = sshll.u32 %s835_s24, 4  ;;  %s917_s25 = int_to_ptr.vmem [resolvable:$true] %s145_s25 }
  0x10   : > { %p677_p12 = scmp.ne.s32.totalorder %s1118_s1, %s676_s28  ;;  %p683_p5 = scmp.lt.u32.totalorder %s676_s28, %s1118_s1 }
  0x11   : > { %p913_p11 = pnand %p617_p9, %p1121_p1 }
  0x13   : > { %p678_p13 = pneg %p913_p11 }
  0x15   : > { %p679_p0 = pnand %p678_p13, %p677_p12 }
  0x17   : > { %p680_p3 = pneg %p679_p0 }
  0x19   : > { %p685_p7 = pnand %p683_p5, %p680_p3 }
  0x1b   : > { %688 = shalt.err (!%p685_p7)
}
  0x1c   : > { %s689_s6 = scalar_lea.vmem %s906_s22, 2048  ;;  %p697_p2 = scmp.lt.s32.totalorder %s906_s22, %s906_s22 }
  0x1d   : > { %p690_p9 = scmp.ne.s32.totalorder %s906_s22, %s689_s6  ;;  %p698_p12 = scmp.lt.s32.totalorder %s689_s6, %s689_s6 }
  0x1f   : > { %p692_p10 = pnand %p690_p9, %p678_p13  ;;  %p699_p0 = por %p698_p12, %p697_p2 }
  0x21   : > { %p693_p1 = pneg %p692_p10 }
  0x23   : > { %p700_p6 = pnand %p699_p0, %p693_p1 }
  0x25   : > { %703 = shalt.err (!%p700_p6)
}
  0x26   : > { %s836_s7 = smov 128   ;;  %s837_s8 = smov 8  }
  0x27   : > { %620 = dma.hbm_to_vmem [thread:$0]  (!%p913_p11), %s1118_s1, 2048, %s906_s22, [#allocation6], %s836_s7, %s836_s7, %s837_s8  }
  0x28   : > { %s704_s21 = scalar_lea.hbm %s1119_s2, 16 }
  0x29   : > { %p705_p1 = scmp.ne.s32.totalorder %s1119_s2, %s704_s21  ;;  %p711_p10 = scmp.lt.u32.totalorder %s704_s21, %s1119_s2 }
  0x2b   : > { %p707_p2 = pnand %p705_p1, %p678_p13 }
  0x2d   : > { %p708_p6 = pneg %p707_p2 }
  0x2f   : > { %p713_p3 = pnand %p711_p10, %p708_p6 }
  0x31   : > { %716 = shalt.err (!%p713_p3)
}
  0x32   : > { %s717_s22 = scalar_lea.vmem %s917_s25, 16  ;;  %s724_s29 = scalar_lea.vmem %s917_s25, 32 }
  0x33   : > { %p718_p5 = scmp.ne.s32.totalorder %s917_s25, %s717_s22  ;;  %p725_p12 = scmp.lt.s32.totalorder %s917_s25, %s917_s25 }
  0x34   : > { %p726_p0 = scmp.lt.s32.totalorder %s724_s29, %s717_s22 }
  0x35   : > { %p720_p7 = pnand %p718_p5, %p678_p13 }
  0x36   : > { %p727_p1 = por %p726_p0, %p725_p12 }
  0x37   : > { %p721_p9 = pneg %p720_p7 }
  0x39   : > { %p728_p2 = pnand %p727_p1, %p721_p9 }
  0x3b   : > { %731 = shalt.err (!%p728_p2)
}
  0x3c   : > { %623 = dma.hbm_to_vmem [thread:$0]  (!%p913_p11), %s1119_s2, 16, %s917_s25, [#allocation6]  }
  0x3d   : > { %s976_s5 = sadd.s32 1, %s832_s15   ;;  %s27_s23 = sadd.s32 1, %s828_s14 }
  0x3e   : > { %s24_s6 = ssub.s32 %s832_s15, %s976_s5  ;;  %p34_p13 = scmp.ne.s32.totalorder %s828_s14, %s824_s13 }
  0x3f   : > { %p25_p6 = scmp.eq.s32.totalorder %s24_s6, 0  ;;  %p35_p10 = scmp.eq.s32.totalorder %s832_s15, 0 }
  0x40   : > { %p1128_p3 = scmp.eq.s32.totalorder %s883_s16, 1  ;;  %p634_p7 = scmp.lt.s32.totalorder %s832_s15, 2 }
  0x41   : > { %s992_s10 = scalar_select %p25_p6, %s828_s14, %s27_s23  }
  0x42   : > { %p986_p5 = por %p1128_p3, %p34_p13  ;;  %p36_p9 = por %p35_p10, %p34_p13 }
  0x43   : > { %s156_s11 = sand.u32 1, %s828_s14   ;;  %s487_s25 = sshll.u32 %s832_s15, 10 }
  0x44   : > { %s1129_s9 = scalar_select %p986_p5, 1, 0 }
  0x45   : > { %s473_s17 = sshll.u32 %s156_s11, 6  ;;  %s999_s26 = scalar_lea.hbm %s1117_s0, %s487_s25 }
  0x46   : > { %s160_s27 = scalar_lea.vmem [#allocation2], %s473_s17  ;;  %p1003_p11 = pnand %p634_p7, %p36_p9 }
  0x47   : > { %s167_s28 = sshll.u32 %s160_s27, 4  ;;  %s1007_s29 = scalar_lea.sflag [#allocation3], %s156_s11  ;;  %s1001_s28 = int_to_ptr.vmem [resolvable:$true] %s167_s28 }
  0x48   : > { %s732_s30 = scalar_lea.hbm %s999_s26, 1024  ;;  %p734_p0 = pneg %p1003_p11 }
  0x49   : > { %p733_p12 = scmp.ne.s32.totalorder %s999_s26, %s732_s30  ;;  %s737_s6 = scalar_lea.hbm %s1117_s0, 2048 }
  0x4a   : > { %p738_p13 = scmp.lt.u32.totalorder %s999_s26, %s1117_s0  ;;  %p739_p6 = scmp.lt.u32.totalorder %s737_s6, %s732_s30 }
  0x4b   : > { %p735_p1 = pnand %p734_p0, %p733_p12  ;;  %p741_p3 = scmp.lt.u32.totalorder %s732_s30, %s999_s26 }
  0x4c   : > { %p740_p10 = por %p739_p6, %p738_p13 }
  0x4d   : > { %p736_p2 = pneg %p735_p1 }
  0x4e   : > { %p742_p7 = por %p741_p3, %p740_p10 }
  0x50   : > { %p743_p9 = pnand %p742_p7, %p736_p2 }
  0x52   : > { %746 = shalt.err (!%p743_p9)
}
  0x53   : > { %s747_s11 = scalar_lea.vmem %s1001_s28, 1024  ;;  %s838_s21 = smov [#allocation2]  }
  0x54   : > { %p748_p12 = scmp.ne.s32.totalorder %s1001_s28, %s747_s11  ;;  %s752_s24 = sshll.u32 %s838_s21, 4  ;;  %s753_s24 = int_to_ptr.vmem [resolvable:$false] %s752_s24 }
  0x55   : > { %s754_s27 = scalar_lea.vmem %s753_s24, 2048  ;;  %p755_p4 = scmp.lt.s32.totalorder %s1001_s28, %s753_s24 }
  0x56   : > { %p750_p1 = pnand %p748_p12, %p734_p0  ;;  %p756_p13 = scmp.lt.s32.totalorder %s754_s27, %s747_s11 }
  0x58   : > { %p751_p5 = pneg %p750_p1  ;;  %p757_p6 = por %p756_p13, %p755_p4 }
  0x5a   : > { %p758_p10 = pnand %p757_p6, %p751_p5 }
  0x5c   : > { %761 = shalt.err (!%p758_p10)
}
  0x5d   : > { %627 = dma.hbm_to_vmem [thread:$0]  (!%p1003_p11), %s999_s26, 1024, %s1001_s28, %s1007_s29, %s836_s7, %s836_s7, %s837_s8  }
  0x5e   : > { %179 = sbr.rel (%p902_p8) target bundleno = 374 (0x176), region = 32  ;;  %s1041_s30 = sand.u32 (!%p902_p8), 1, %s824_s13  }
  0x5f   : > { %s477_s4 = sshll.u32 (!%p902_p8), %s1041_s30, 6  ;;  %s182_s23 = scalar_lea.sflag (!%p902_p8), [#allocation3], %s1041_s30 }
  0x60   : > { %s1047_s22 = scalar_lea.vmem (!%p902_p8), [#allocation2], %s477_s4  ;;  %p1131_p4 = scmp.ne.s32.totalorder (!%p902_p8), %s1124_s18, 0 }
  0x65   : > { %807 = dma.done.wait (%p1131_p4), %s182_s23, 1024  }
  0x66   : > { %809 = vsyncadd (%p1131_p4), %s182_s23, 4294966272  ;;  %p1132_p5 = scmp.eq.s32.totalorder %s883_s16, 0 }
  0x68   : > { %811 = dma.done.wait (%p1132_p5), [#allocation6], 2064   ;;  %p1133_p8 = pmov %p1132_p5 }
  0x69   : > { %v226_v0 = vld [vmem:[#allocation5] sm:$0xff]  ;;  %v227_v1 = vld [vmem:[#allocation5 + $0x8] sm:$0xff]  ;;  %v228_v2 = vld [vmem:[#allocation5 + $0x10] sm:$0xff]  ;;  %s215_s18 = scalar_lea.vmem [#allocation8], %s477_s4  ;;  %s488_s7 = sshll.u32 %s883_s16, 10 }
  0x6a   : > { %813 = vsyncadd (%p1133_p8), [#allocation6], 4294965232  ;;  %v557_v3 = vpack.c.bf16 %v227_v1, %v226_v0  ;;  %v229_v4 = vld [vmem:[#allocation5 + $0x18] sm:$0xff]  ;;  %v230_v6 = vld [vmem:[#allocation5 + $0x20] sm:$0xff]  ;;  %s376_s20 = sshll.u32 %s215_s18, 4  ;;  %s1073_s16 = scalar_lea.hbm %s1120_s3, %s488_s7  ;;  %s1068_s20 = int_to_ptr.vmem [resolvable:$true] %s376_s20 }
  0x6b   : > { %v561_v5 = vpack.c.bf16 %v229_v4, %v228_v2  ;;  %v231_v7 = vld [vmem:[#allocation5 + $0x28] sm:$0xff]  ;;  %v218_v9 = vld [vmem:[%s1047_s22] sm:$0xff]  ;;  %v232_v11 = vld [vmem:[#allocation5 + $0x30] sm:$0xff]  ;;  %s363_s28 = scalar_lea.sflag [#allocation4], %s1041_s30  ;;  %s762_s29 = scalar_lea.vmem %s1068_s20, 1024 }
  0x6c   : > { %558 = vmatprep.subr.bf16.mxu0 %v557_v3  ;;  %589 = vmatprep.subr.bf16.mxu1 %v557_v3  ;;  %v565_v8 = vpack.c.bf16 %v231_v7, %v230_v6  ;;  %v222_v10 = vld [vmem:[%s1047_s22 + $0x20] sm:$0xff]  ;;  %v233_v12 = vld [vmem:[#allocation5 + $0x38] sm:$0xff]  ;;  %v235_v15 = vld [vmem:[#allocation5 + $0x48] sm:$0xff]  ;;  %p763_p11 = scmp.ne.s32.totalorder %s1068_s20, %s762_s29  ;;  %p1134_p0 = scmp.ne.s32.totalorder %s1129_s9, 0 }
  0x6d   : > { %560 = vmatpush3.bf16.msra.mxu0 %v557_v3  ;;  %597 = vmatpush3.bf16.msra.mxu1 %v557_v3  ;;  %v569_v13 = vpack.c.bf16 %v233_v12, %v232_v11  ;;  %v234_v14 = vld [vmem:[#allocation5 + $0x40] sm:$0xff]  ;;  %v236_v17 = vld [vmem:[#allocation5 + $0x50] sm:$0xff]  ;;  %v237_v18 = vld [vmem:[#allocation5 + $0x58] sm:$0xff]  ;;  %s839_s6 = smov [#allocation8]  }
  0x6e   : > { %562 = vmatprep.subr.bf16.mxu0 %v561_v5  ;;  %590 = vmatprep.subr.bf16.mxu1 %v561_v5  ;;  %v573_v16 = vpack.c.bf16 %v235_v15, %v234_v14  ;;  %v577_v19 = vpack.c.bf16 %v237_v18, %v236_v17  ;;  %v238_v20 = vld [vmem:[#allocation5 + $0x60] sm:$0xff]  ;;  %v239_v21 = vld [vmem:[#allocation5 + $0x68] sm:$0xff]  ;;  %v240_v23 = vld [vmem:[#allocation5 + $0x70] sm:$0xff]  ;;  %p764_p2 = pnand %p763_p11, %p1134_p0  ;;  %s766_s17 = sshll.u32 %s839_s6, 4  ;;  %s767_s17 = int_to_ptr.vmem [resolvable:$false] %s766_s17 }
  0x6f   : > { %545 = vmatprep.mubr.f32.mxu0 %v218_v9  ;;  %551 = vmatprep.mubr.f32.mxu1 %v222_v10  ;;  %v581_v22 = vpack.c.bf16 %v239_v21, %v238_v20  ;;  %v241_v24 = vld [vmem:[#allocation5 + $0x78] sm:$0xff]  ;;  %v219_v26 = vld [vmem:[%s1047_s22 + $0x8] sm:$0xff]  ;;  %v220_v28 = vld [vmem:[%s1047_s22 + $0x10] sm:$0xff]  ;;  %s768_s25 = scalar_lea.vmem %s767_s17, 2048  ;;  %p769_p7 = scmp.lt.s32.totalorder %s1068_s20, %s767_s17 }
  0x70   : > { %v585_v25 = vpack.c.bf16 %v241_v24, %v240_v23  ;;  %v223_v27 = vld [vmem:[%s1047_s22 + $0x28] sm:$0xff]  ;;  %v224_v29 = vld [vmem:[%s1047_s22 + $0x30] sm:$0xff]  ;;  %v221_v30 = vld [vmem:[%s1047_s22 + $0x18] sm:$0xff]  ;;  %p765_p3 = pneg %p764_p2  ;;  %p770_p9 = scmp.lt.s32.totalorder %s768_s25, %s762_s29 }
  0x71   : > { %564 = vmatpush3.bf16.msra.mxu0 %v561_v5  ;;  %598 = vmatpush3.bf16.msra.mxu1 %v561_v5  ;;  %v225_v31 = vld [vmem:[%s1047_s22 + $0x38] sm:$0xff]  ;;  %v481_v32 = vld [vmem:[#allocation7] ss:$0 sm:$0xff] }
  0x72   : > { %566 = vmatprep.subr.bf16.mxu0 %v565_v8  ;;  %591 = vmatprep.subr.bf16.mxu1 %v565_v8  ;;  %p771_p12 = por %p770_p9, %p769_p7 }
  0x74   : > { %p772_p1 = pnand %p771_p12, %p765_p3 }
  0x75   : > { %568 = vmatpush3.bf16.msra.mxu0 %v565_v8  ;;  %599 = vmatpush3.bf16.msra.mxu1 %v565_v8 }
  0x76   : > { %570 = vmatprep.subr.bf16.mxu0 %v569_v13  ;;  %592 = vmatprep.subr.bf16.mxu1 %v569_v13 }
  0x79   : > { %572 = vmatpush3.bf16.msra.mxu0 %v569_v13  ;;  %600 = vmatpush3.bf16.msra.mxu1 %v569_v13 }
  0x7a   : > { %574 = vmatprep.subr.bf16.mxu0 %v573_v16  ;;  %593 = vmatprep.subr.bf16.mxu1 %v573_v16 }
  0x7d   : > { %576 = vmatpush3.bf16.msra.mxu0 %v573_v16  ;;  %601 = vmatpush3.bf16.msra.mxu1 %v573_v16 }
  0x7e   : > { %578 = vmatprep.subr.bf16.mxu0 %v577_v19  ;;  %594 = vmatprep.subr.bf16.mxu1 %v577_v19 }
  0x81   : > { %580 = vmatpush3.bf16.msra.mxu0 %v577_v19  ;;  %602 = vmatpush3.bf16.msra.mxu1 %v577_v19 }
  0x82   : > { %582 = vmatprep.subr.bf16.mxu0 %v581_v22  ;;  %595 = vmatprep.subr.bf16.mxu1 %v581_v22 }
  0x85   : > { %584 = vmatpush3.bf16.msra.mxu0 %v581_v22  ;;  %603 = vmatpush3.bf16.msra.mxu1 %v581_v22 }
  0x86   : > { %586 = vmatprep.subr.bf16.mxu0 %v585_v25  ;;  %596 = vmatprep.subr.bf16.mxu1 %v585_v25 }
  0x89   : > { %588 = vmatpush3.bf16.msra.mxu0 %v585_v25  ;;  %604 = vmatpush3.bf16.msra.mxu1 %v585_v25 }
  0x8c   : > { %546 = vmatmul.mubr.f32.vlgmr.msra.gmra.mrb[0].mxu0 %v219_v26  ;;  %552 = vmatmul.mubr.f32.vlgmr.msra.gmra.mrb[0].mxu1 %v223_v27 }
  0x8d   : > { %548 = vmatprep.mubr.f32.mxu0 %v220_v28  ;;  %554 = vmatprep.mubr.f32.mxu1 %v224_v29 }
  0x90   : > { %549 = vmatmul.mubr.f32.gmra.mrb[2].mxu0 %v221_v30  ;;  %555 = vmatmul.mubr.f32.gmra.mrb[2].mxu1 %v225_v31 }
 0x15f   : > { %v547_v33 = vpop.f32.mrb[0].mxu0  ;;  %v553_v34 = vpop.f32.mrb[0].mxu1 }
 0x160   : > { %v321_v35 = vadd.f32 %v547_v33, %v481_v32  ;;  %v341_v36 = vadd.f32 %v553_v34, %v481_v32  ;;  %v315_v37 = vpop.f32.mrb[1].mxu0  ;;  %v335_v38 = vpop.f32.mrb[1].mxu1 }
 0x161   : > { %v316_v39 = vadd.f32 %v481_v32, %v315_v37  ;;  %v336_v40 = vadd.f32 %v481_v32, %v335_v38 }
 0x162   : > { %355 = vst [vmem:[%s215_s18 + $0x8] sm:$0xff] %v321_v35  ;;  %359 = vst [vmem:[%s215_s18 + $0x28] sm:$0xff] %v341_v36 }
 0x163   : > { %354 = vst [vmem:[%s215_s18] sm:$0xff] %v316_v39  ;;  %358 = vst [vmem:[%s215_s18 + $0x20] sm:$0xff] %v336_v40  ;;  %v550_v41 = vpop.f32.mrb[2].mxu0  ;;  %v556_v42 = vpop.f32.mrb[2].mxu1 }
 0x164   : > { %v331_v43 = vadd.f32 %v550_v41, %v481_v32  ;;  %v351_v44 = vadd.f32 %v556_v42, %v481_v32  ;;  %v325_v45 = vpop.f32.mrb[3].mxu0  ;;  %v345_v46 = vpop.f32.mrb[3].mxu1 }
 0x165   : > { %v326_v47 = vadd.f32 %v481_v32, %v325_v45  ;;  %v346_v48 = vadd.f32 %v481_v32, %v345_v46 }
 0x166   : > { %357 = vst [vmem:[%s215_s18 + $0x18] sm:$0xff] %v331_v43  ;;  %361 = vst [vmem:[%s215_s18 + $0x38] sm:$0xff] %v351_v44 }
 0x167   : > { %356 = vst [vmem:[%s215_s18 + $0x10] sm:$0xff] %v326_v47  ;;  %360 = vst [vmem:[%s215_s18 + $0x30] sm:$0xff] %v346_v48 }
 0x168   : > { %775 = shalt.err (!%p772_p1)
}
 0x169   : > { %s776_s11 = scalar_lea.hbm %s1073_s16, 1024  ;;  %s780_s27 = scalar_lea.hbm %s1120_s3, 2048 }
 0x16a   : > { %p777_p13 = scmp.ne.s32.totalorder %s1073_s16, %s776_s11  ;;  %p781_p4 = scmp.lt.u32.totalorder %s1073_s16, %s1120_s3 }
 0x16b   : > { %p782_p5 = scmp.lt.u32.totalorder %s780_s27, %s776_s11  ;;  %p784_p11 = scmp.lt.u32.totalorder %s776_s11, %s1073_s16 }
 0x16c   : > { %p778_p6 = pnand %p777_p13, %p1134_p0 }
 0x16d   : > { %p783_p8 = por %p782_p5, %p781_p4 }
 0x16e   : > { %p779_p10 = pneg %p778_p6 }
 0x16f   : > { %p785_p2 = por %p784_p11, %p783_p8 }
 0x171   : > { %p786_p3 = pnand %p785_p2, %p779_p10 }
 0x173   : > { %789 = shalt.err (!%p786_p3)
}
 0x174   : > { %s840_s22 = smov 128   ;;  %s841_s18 = smov 8  }
 0x175   : > { %615 = dma.vmem_to_hbm [thread:$0]  (%p1134_p0), %s1068_s20, 1024, %s1073_s16, %s363_s28, %s840_s22, %s840_s22, %s841_s18  }
 0x176 PF: > { %s391_s7 = sand.u32 1, %s820_s12   ;;  %p1135_p7 = scmp.ne.s32.totalorder %s1125_s19, 0 }
 0x177   : > { %p1136_p9 = scmp.ge.s32.totalorder %s832_s15, 2  ;;  %s392_s8 = scalar_lea.sflag [#allocation4], %s391_s7 }
 0x179   : > { %p629_p12 = pnand %p1136_p9, %p1135_p7 }
 0x17b   : > { %815 = dma.done.wait (!%p629_p12), %s392_s8, 1024  }
 0x17c   : > { %817 = vsyncadd (!%p629_p12), %s392_s8, 4294966272  ;;  %p17_p1 = scmp.ge.s32.totalorder %s976_s5, 4   ;;  %s1137_s12 = smov %s824_s13 }
 0x17d   : > { %s1138_s13 = smov %s828_s14  ;;  %s1139_s14 = smov %s992_s10 }
 0x17e   : > { %s1140_s15 = smov %s976_s5  ;;  %19 = sbr.rel (!%p17_p1) target bundleno = 6 (0x6), region = 85 }
 0x185   :  { %397 = vsyncpa [#allocation3], 1 }
 0x186   :  { %399 = vsyncpa [#allocation3 + $0x1], 1 }
 0x187   :  { %400 = vsyncpa [#allocation6], 1 }
 0x188   :  { %401 = vsyncpa [#allocation4], 1 }
 0x189   :  { %403 = vsyncpa [#allocation4 + $0x1], 1 }

// kernel: fno_forward.11
= control target key start
LH: loop header
LB: loop body
LE: loop exit
PB: predicated region body
PF: predicated region fallthrough
CT: control target
= control target key end

     0   :  { %7 = vsyncpa [#allocation3], 0  ;;  %s1049_s0 = inlined_call_operand.hbm [shape: f32[2,2048], index: 0, kind: input, shape index: {}]   ;;  %s1050_s1 = inlined_call_operand.hbm [shape: f32[8,256,256], index: 1, kind: input, shape index: {}]   ;;  %s1051_s2 = inlined_call_operand.hbm [shape: f32[2,2048], index: 2, kind: output, shape index: {}]  }
   0x1   :  { %9 = vsyncpa [#allocation3 + $0x1], 0 }
   0x2   :  { %10 = vsyncpa [#allocation6], 0 }
   0x3   :  { %12 = vsyncpa [#allocation6 + $0x1], 0 }
   0x4   :  { %13 = vsyncpa [#allocation4], 0 }
   0x5   :  { %15 = vsyncpa [#allocation4 + $0x1], 0  ;;  %s761_s9 = smov 0   ;;  %s763_s10 = smov 0  }
   0x6   :  { %s765_s11 = smov 0   ;;  %s767_s12 = smov 0  }
   0x7 LB: > { %s782_s13 = sadd.s32 4294967295, %s739_s12   ;;  %s469_s14 = sadd.s32 4294967294, %s739_s12   ;;  %s739_s12 = sphi %s767_s12, %s1068_s12   ;;  %s735_s11 = sphi %s765_s11, %s1067_s11   ;;  %s731_s10 = sphi %s763_s10, %s1066_s10   ;;  %s727_s9 = sphi %s761_s9, %s1065_s9  }
   0x8   : > { %s786_s15 = sadd.s32 1, %s739_s12   ;;  %s28_s16 = sadd.s32 1, %s735_s11 }
   0x9   : > { %s25_s17 = ssub.s32 %s739_s12, %s786_s15  ;;  %p35_p0 = scmp.ne.s32.totalorder %s735_s11, %s731_s10 }
   0xa   : > { %p26_p1 = scmp.eq.s32.totalorder %s25_s17, 0  ;;  %p36_p2 = scmp.eq.s32.totalorder %s739_s12, 0 }
   0xb   : > { %p41_p3 = scmp.ne.s32.totalorder %s731_s10, %s727_s9  ;;  %p42_p4 = scmp.eq.s32.totalorder %s782_s13, 0 }
   0xc   : > { %s798_s18 = scalar_select %p26_p1, %s735_s11, %s28_s16  }
   0xd   : > { %p800_p5 = por %p36_p2, %p35_p0  ;;  %p804_p6 = por %p42_p4, %p41_p3 }
   0xe   : > { %p91_p7 = scmp.eq.s32.totalorder %s782_s13, 7  ;;  %p97_p8 = scmp.eq.s32.totalorder %s469_s14, 7 }
   0xf   : > { %s1055_s20 = scalar_select %p804_p6, 1, 0 }
  0x10   : > { %p573_p9 = scmp.lt.s32.totalorder %s739_s12, 8  ;;  %p810_p10 = por %p91_p7, %p35_p0 }
  0x11   : > { %p814_p11 = por %p97_p8, %p41_p3  ;;  %s819_s23 = sand.u32 1, %s735_s11  }
  0x12   : > { %s1056_s21 = scalar_select %p810_p10, 1, 0 }
  0x13   : > { %s1057_s22 = scalar_select %p814_p11, 1, 0 }
  0x14   : > { %s489_s24 = sshll.u32 %s739_s12, 6  ;;  %s472_s25 = sshll.u32 %s819_s23, 2 }
  0x15   : > { %s826_s28 = scalar_lea.hbm %s1049_s0, %s489_s24  ;;  %s121_s29 = scalar_lea.vmem [#allocation2], %s472_s25 }
  0x16   : > { %s129_s30 = sshll.u32 %s121_s29, 4  ;;  %p830_p12 = pnand %p573_p9, %p800_p5  ;;  %s834_s30 = int_to_ptr.vmem [resolvable:$true] %s129_s30 }
  0x17   : > { %s118_s4 = scalar_lea.sflag [#allocation3], %s819_s23  ;;  %s609_s5 = scalar_lea.hbm %s826_s28, 64 }
  0x18   : > { %p610_p1 = scmp.ne.s32.totalorder %s826_s28, %s609_s5  ;;  %p611_p2 = pneg %p830_p12 }
  0x19   : > { %s614_s8 = scalar_lea.hbm %s1049_s0, 512  ;;  %p615_p5 = scmp.lt.u32.totalorder %s826_s28, %s1049_s0 }
  0x1a   : > { %p612_p3 = pnand %p611_p2, %p610_p1  ;;  %p616_p7 = scmp.lt.u32.totalorder %s614_s8, %s609_s5 }
  0x1b   : > { %p618_p9 = scmp.lt.u32.totalorder %s609_s5, %s826_s28 }
  0x1c   : > { %p613_p4 = pneg %p612_p3  ;;  %p617_p8 = por %p616_p7, %p615_p5 }
  0x1e   : > { %p619_p13 = por %p618_p9, %p617_p8 }
  0x20   : > { %p620_p0 = pnand %p619_p13, %p613_p4 }
  0x22   : > { %623 = shalt.err (!%p620_p0)
}
  0x23   : > { %s624_s17 = scalar_lea.vmem %s834_s30, 64  ;;  %s741_s19 = smov [#allocation2]  }
  0x24   : > { %p625_p1 = scmp.ne.s32.totalorder %s834_s30, %s624_s17  ;;  %s629_s24 = sshll.u32 %s741_s19, 4  ;;  %s630_s24 = int_to_ptr.vmem [resolvable:$false] %s629_s24 }
  0x25   : > { %s631_s25 = scalar_lea.vmem %s630_s24, 128  ;;  %p632_p10 = scmp.lt.s32.totalorder %s834_s30, %s630_s24 }
  0x26   : > { %p627_p3 = pnand %p625_p1, %p611_p2  ;;  %p633_p5 = scmp.lt.s32.totalorder %s631_s25, %s624_s17 }
  0x28   : > { %p628_p11 = pneg %p627_p3  ;;  %p634_p7 = por %p633_p5, %p632_p10 }
  0x2a   : > { %p635_p8 = pnand %p634_p7, %p628_p11 }
  0x2c   : > { %638 = shalt.err (!%p635_p8)
}
  0x2d   : > { %565 = dma.hbm_to_vmem [thread:$0]  (!%p830_p12), %s826_s28, 64, %s834_s30, %s118_s4  }
  0x2e   : > { %p1059_p13 = scmp.lt.s32.totalorder %s739_s12, 9  ;;  %p1060_p0 = scmp.ge.s32.totalorder %s739_s12, 1 }
  0x2f   : > { %s475_s27 = sshll.u32 %s819_s23, 9  ;;  %s490_s29 = sshll.u32 %s739_s12, 13 }
  0x30   : > { %p868_p4 = pnand %p1060_p0, %p1059_p13  ;;  %s877_s7 = scalar_lea.hbm %s1050_s1, %s490_s29 }
  0x31   : > { %s140_s8 = scalar_lea.vmem [#allocation5], %s475_s27  ;;  %s137_s28 = scalar_lea.sflag [#allocation6], %s819_s23 }
  0x32   : > { %s147_s14 = sshll.u32 %s140_s8, 4  ;;  %s639_s30 = scalar_lea.hbm %s877_s7, 8192  ;;  %s879_s14 = int_to_ptr.vmem [resolvable:$true] %s147_s14 }
  0x33   : > { %p640_p10 = scmp.ne.s32.totalorder %s877_s7, %s639_s30  ;;  %s644_s17 = scalar_lea.hbm %s1050_s1, 65536 }
  0x34   : > { %p645_p1 = scmp.lt.u32.totalorder %s877_s7, %s1050_s1  ;;  %p646_p3 = scmp.lt.u32.totalorder %s644_s17, %s639_s30 }
  0x35   : > { %p642_p11 = pnand %p640_p10, %p611_p2  ;;  %p648_p7 = scmp.lt.u32.totalorder %s639_s30, %s877_s7 }
  0x36   : > { %p647_p5 = por %p646_p3, %p645_p1 }
  0x37   : > { %p643_p9 = pneg %p642_p11 }
  0x38   : > { %p649_p8 = por %p648_p7, %p647_p5 }
  0x3a   : > { %p650_p13 = pnand %p649_p8, %p643_p9 }
  0x3c   : > { %653 = shalt.err (!%p650_p13)
}
  0x3d   : > { %s654_s25 = scalar_lea.vmem %s879_s14, 8192  ;;  %s742_s27 = smov [#allocation5]  }
  0x3e   : > { %p655_p0 = scmp.ne.s32.totalorder %s879_s14, %s654_s25  ;;  %s659_s29 = sshll.u32 %s742_s27, 4  ;;  %s660_s29 = int_to_ptr.vmem [resolvable:$false] %s659_s29 }
  0x3f   : > { %s661_s5 = scalar_lea.vmem %s660_s29, 16384  ;;  %p662_p6 = scmp.lt.s32.totalorder %s879_s14, %s660_s29 }
  0x40   : > { %p657_p10 = pnand %p655_p0, %p611_p2  ;;  %p663_p1 = scmp.lt.s32.totalorder %s661_s5, %s654_s25 }
  0x42   : > { %p658_p11 = pneg %p657_p10  ;;  %p664_p3 = por %p663_p1, %p662_p6 }
  0x44   : > { %p665_p5 = pnand %p664_p3, %p658_p11 }
  0x46   : > { %668 = shalt.err (!%p665_p5)
}
  0x47   : > { %s743_s6 = smov 256   ;;  %s744_s8 = smov 16  }
  0x48   : > { %568 = dma.hbm_to_vmem [thread:$0]  (!%p830_p12), %s877_s7, 8192, %s879_s14, %s137_s28, %s743_s6, %s743_s6, %s744_s8  }
  0x49   : > { %159 = sbr.rel (%p868_p4) target bundleno = 380 (0x17c), region = 28  ;;  %s910_s30 = sand.u32 (!%p868_p4), 1, %s731_s10  }
  0x4a   : > { %s479_s4 = sshll.u32 (!%p868_p4), %s910_s30, 2  ;;  %s162_s16 = scalar_lea.sflag (!%p868_p4), [#allocation3], %s910_s30 }
  0x4b   : > { %s916_s17 = scalar_lea.vmem (!%p868_p4), [#allocation2], %s479_s4  ;;  %p1062_p6 = scmp.ne.s32.totalorder (!%p868_p4), %s1055_s20, 0 }
  0x50   : > { %714 = dma.done.wait (%p1062_p6), %s162_s16, 64  }
  0x51   : > { %716 = vsyncadd (%p1062_p6), %s162_s16, 4294967232  ;;  %s480_s23 = sshll.u32 %s910_s30, 9  ;;  %s171_s3 = scalar_lea.sflag [#allocation6], %s910_s30 }
  0x52   : > { %s924_s26 = scalar_lea.vmem [#allocation5], %s480_s23 }
  0x53   : > { %718 = dma.done.wait (%p1062_p6), %s171_s3, 8192  }
  0x54   : > { %720 = vsyncadd (%p1062_p6), %s171_s3, 4294959104  ;;  %v204_v0 = vld [vmem:[%s924_s26 + $0x8] sm:$0xff]  ;;  %v206_v1 = vld [vmem:[%s924_s26 + $0x18] sm:$0xff]  ;;  %s491_s20 = sshll.u32 %s782_s13, 6  ;;  %s199_s7 = scalar_lea.vmem [#allocation7], %s479_s4 }
  0x55   : > { %v203_v2 = vld [vmem:[%s924_s26] sm:$0xff]  ;;  %v492_v3 = vpack.c.bf16 %v206_v1, %v204_v0  ;;  %v205_v4 = vld [vmem:[%s924_s26 + $0x10] sm:$0xff]  ;;  %v208_v5 = vld [vmem:[%s924_s26 + $0x28] sm:$0xff]  ;;  %s376_s14 = sshll.u32 %s199_s7, 4  ;;  %s1006_s24 = scalar_lea.hbm %s1051_s2, %s491_s20  ;;  %s1008_s14 = int_to_ptr.vmem [resolvable:$true] %s376_s14 }
  0x56   : > { %v210_v6 = vld [vmem:[%s924_s26 + $0x38] sm:$0xff]  ;;  %v494_v7 = vpack.c.bf16 %v205_v4, %v203_v2  ;;  %v207_v9 = vld [vmem:[%s924_s26 + $0x20] sm:$0xff]  ;;  %v209_v10 = vld [vmem:[%s924_s26 + $0x30] sm:$0xff]  ;;  %s362_s25 = scalar_lea.sflag [#allocation4], %s910_s30  ;;  %s669_s27 = scalar_lea.vmem %s1008_s14, 64 }
  0x57   : > { %v496_v8 = vpack.c.bf16 %v210_v6, %v208_v5  ;;  %v212_v11 = vld [vmem:[%s924_s26 + $0x48] sm:$0xff]  ;;  %493 = vmatprep.subr.bf16.mxu0 %v492_v3  ;;  %v214_v12 = vld [vmem:[%s924_s26 + $0x58] sm:$0xff]  ;;  %v498_v13 = vpack.c.bf16 %v209_v10, %v207_v9  ;;  %v211_v15 = vld [vmem:[%s924_s26 + $0x40] sm:$0xff]  ;;  %p670_p12 = scmp.ne.s32.totalorder %s1008_s14, %s669_s27  ;;  %p1063_p2 = scmp.ne.s32.totalorder %s1056_s21, 0 }
  0x58   : > { %495 = vmatpush1.bf16.msra.mxu0 %v494_v7  ;;  %v500_v14 = vpack.c.bf16 %v214_v12, %v212_v11  ;;  %v213_v16 = vld [vmem:[%s924_s26 + $0x50] sm:$0xff]  ;;  %v216_v17 = vld [vmem:[%s924_s26 + $0x68] sm:$0xff]  ;;  %v218_v18 = vld [vmem:[%s924_s26 + $0x78] sm:$0xff]  ;;  %s745_s13 = smov [#allocation7]  }
  0x59   : > { %497 = vmatprep.subr.bf16.mxu0 %v496_v8  ;;  %v502_v19 = vpack.c.bf16 %v213_v16, %v211_v15  ;;  %v504_v20 = vpack.c.bf16 %v218_v18, %v216_v17  ;;  %v215_v21 = vld [vmem:[%s924_s26 + $0x60] sm:$0xff]  ;;  %v217_v22 = vld [vmem:[%s924_s26 + $0x70] sm:$0xff]  ;;  %v220_v23 = vld [vmem:[%s924_s26 + $0x88] sm:$0xff]  ;;  %p671_p4 = pnand %p670_p12, %p1063_p2  ;;  %s673_s29 = sshll.u32 %s745_s13, 4  ;;  %s674_s29 = int_to_ptr.vmem [resolvable:$false] %s673_s29 }
  0x5a   : > { %v222_v24 = vld [vmem:[%s924_s26 + $0x98] sm:$0xff]  ;;  %v506_v25 = vpack.c.bf16 %v217_v22, %v215_v21  ;;  %v219_v27 = vld [vmem:[%s924_s26 + $0x80] sm:$0xff]  ;;  %v221_v28 = vld [vmem:[%s924_s26 + $0x90] sm:$0xff]  ;;  %s675_s5 = scalar_lea.vmem %s674_s29, 128  ;;  %p676_p7 = scmp.lt.s32.totalorder %s1008_s14, %s674_s29 }
  0x5b   : > { %v508_v26 = vpack.c.bf16 %v222_v24, %v220_v23  ;;  %v224_v29 = vld [vmem:[%s924_s26 + $0xa8] sm:$0xff]  ;;  %v226_v30 = vld [vmem:[%s924_s26 + $0xb8] sm:$0xff]  ;;  %v510_v31 = vpack.c.bf16 %v221_v28, %v219_v27  ;;  %v223_v33 = vld [vmem:[%s924_s26 + $0xa0] sm:$0xff]  ;;  %p672_p9 = pneg %p671_p4  ;;  %p677_p8 = scmp.lt.s32.totalorder %s675_s5, %s669_s27 }
  0x5c   : > { %499 = vmatpush1.bf16.msra.mxu0 %v498_v13  ;;  %v512_v32 = vpack.c.bf16 %v226_v30, %v224_v29  ;;  %v225_v34 = vld [vmem:[%s924_s26 + $0xb0] sm:$0xff]  ;;  %v228_v35 = vld [vmem:[%s924_s26 + $0xc8] sm:$0xff]  ;;  %v230_v36 = vld [vmem:[%s924_s26 + $0xd8] sm:$0xff] }
  0x5d   : > { %501 = vmatprep.subr.bf16.mxu0 %v500_v14  ;;  %v514_v37 = vpack.c.bf16 %v225_v34, %v223_v33  ;;  %v516_v38 = vpack.c.bf16 %v230_v36, %v228_v35  ;;  %v227_v39 = vld [vmem:[%s924_s26 + $0xc0] sm:$0xff]  ;;  %v229_v40 = vld [vmem:[%s924_s26 + $0xd0] sm:$0xff]  ;;  %v959_v41 = vld.sshfl [vmem:[%s916_s17] sm:$0x33 pattern:$0x76325410]  ;;  %p678_p13 = por %p677_p8, %p676_p7 }
  0x5e   : > { %v232_v42 = vld [vmem:[%s924_s26 + $0xe8] sm:$0xff]  ;;  %v234_v43 = vld [vmem:[%s924_s26 + $0xf8] sm:$0xff]  ;;  %v275_v44 = vcombine.high %v959_v41, %v959_v41  ;;  %v518_v45 = vpack.c.bf16 %v229_v40, %v227_v39  ;;  %v231_v47 = vld [vmem:[%s924_s26 + $0xe0] sm:$0xff] }
  0x5f   : > { %v520_v46 = vpack.c.bf16 %v234_v43, %v232_v42  ;;  %v233_v48 = vld [vmem:[%s924_s26 + $0xf0] sm:$0xff]  ;;  %v236_v49 = vld [vmem:[%s924_s26 + $0x108] sm:$0xff]  ;;  %v238_v50 = vld [vmem:[%s924_s26 + $0x118] sm:$0xff]  ;;  %p679_p0 = pnand %p678_p13, %p672_p9 }
  0x60   : > { %503 = vmatpush1.bf16.msra.mxu0 %v502_v19  ;;  %342 = vmatprep.mubr.f32.mxu0 %v275_v44  ;;  %v522_v51 = vpack.c.bf16 %v233_v48, %v231_v47  ;;  %v524_v52 = vpack.c.bf16 %v238_v50, %v236_v49  ;;  %v235_v53 = vld [vmem:[%s924_s26 + $0x100] sm:$0xff]  ;;  %v237_v54 = vld [vmem:[%s924_s26 + $0x110] sm:$0xff]  ;;  %v240_v55 = vld [vmem:[%s924_s26 + $0x128] sm:$0xff] }
  0x61   : > { %505 = vmatprep.subr.bf16.mxu0 %v504_v20  ;;  %v242_v56 = vld [vmem:[%s924_s26 + $0x138] sm:$0xff]  ;;  %v526_v57 = vpack.c.bf16 %v237_v54, %v235_v53  ;;  %v239_v59 = vld [vmem:[%s924_s26 + $0x120] sm:$0xff]  ;;  %v241_v60 = vld [vmem:[%s924_s26 + $0x130] sm:$0xff] }
  0x62   : > { %v528_v58 = vpack.c.bf16 %v242_v56, %v240_v55  ;;  %v244_v61 = vld [vmem:[%s924_s26 + $0x148] sm:$0xff]  ;;  %v246_v62 = vld [vmem:[%s924_s26 + $0x158] sm:$0xff]  ;;  %v530_v63 = vpack.c.bf16 %v241_v60, %v239_v59  ;;  %v243_v1 = vld [vmem:[%s924_s26 + $0x140] sm:$0xff] }
  0x63   : > { %v532_v0 = vpack.c.bf16 %v246_v62, %v244_v61  ;;  %v245_v2 = vld [vmem:[%s924_s26 + $0x150] sm:$0xff]  ;;  %v248_v3 = vld [vmem:[%s924_s26 + $0x168] sm:$0xff]  ;;  %v250_v4 = vld [vmem:[%s924_s26 + $0x178] sm:$0xff] }
  0x64   : > { %507 = vmatpush1.bf16.msra.mxu0 %v506_v25  ;;  %v534_v5 = vpack.c.bf16 %v245_v2, %v243_v1  ;;  %v536_v6 = vpack.c.bf16 %v250_v4, %v248_v3  ;;  %v247_v7 = vld [vmem:[%s924_s26 + $0x160] sm:$0xff]  ;;  %v249_v8 = vld [vmem:[%s924_s26 + $0x170] sm:$0xff]  ;;  %v252_v9 = vld [vmem:[%s924_s26 + $0x188] sm:$0xff] }
  0x65   : > { %509 = vmatprep.subr.bf16.mxu0 %v508_v26  ;;  %v254_v10 = vld [vmem:[%s924_s26 + $0x198] sm:$0xff]  ;;  %v538_v11 = vpack.c.bf16 %v249_v8, %v247_v7  ;;  %v251_v13 = vld [vmem:[%s924_s26 + $0x180] sm:$0xff]  ;;  %v253_v14 = vld [vmem:[%s924_s26 + $0x190] sm:$0xff] }
  0x66   : > { %v540_v12 = vpack.c.bf16 %v254_v10, %v252_v9  ;;  %v256_v15 = vld [vmem:[%s924_s26 + $0x1a8] sm:$0xff]  ;;  %v258_v16 = vld [vmem:[%s924_s26 + $0x1b8] sm:$0xff]  ;;  %v542_v17 = vpack.c.bf16 %v253_v14, %v251_v13  ;;  %v255_v19 = vld [vmem:[%s924_s26 + $0x1a0] sm:$0xff] }
  0x67   : > { %v544_v18 = vpack.c.bf16 %v258_v16, %v256_v15  ;;  %v257_v20 = vld [vmem:[%s924_s26 + $0x1b0] sm:$0xff]  ;;  %v260_v21 = vld [vmem:[%s924_s26 + $0x1c8] sm:$0xff]  ;;  %v262_v22 = vld [vmem:[%s924_s26 + $0x1d8] sm:$0xff] }
  0x68   : > { %511 = vmatpush1.bf16.msra.mxu0 %v510_v31  ;;  %v546_v23 = vpack.c.bf16 %v257_v20, %v255_v19  ;;  %v548_v24 = vpack.c.bf16 %v262_v22, %v260_v21  ;;  %v259_v25 = vld [vmem:[%s924_s26 + $0x1c0] sm:$0xff]  ;;  %v261_v26 = vld [vmem:[%s924_s26 + $0x1d0] sm:$0xff]  ;;  %v264_v27 = vld [vmem:[%s924_s26 + $0x1e8] sm:$0xff] }
  0x69   : > { %513 = vmatprep.subr.bf16.mxu0 %v512_v32  ;;  %v266_v28 = vld [vmem:[%s924_s26 + $0x1f8] sm:$0xff]  ;;  %v550_v29 = vpack.c.bf16 %v261_v26, %v259_v25  ;;  %v263_v31 = vld [vmem:[%s924_s26 + $0x1e0] sm:$0xff]  ;;  %v265_v32 = vld [vmem:[%s924_s26 + $0x1f0] sm:$0xff] }
  0x6a   : > { %v552_v30 = vpack.c.bf16 %v266_v28, %v264_v27  ;;  %v554_v33 = vpack.c.bf16 %v265_v32, %v263_v31 }
  0x6c   : > { %515 = vmatpush1.bf16.msra.mxu0 %v514_v37 }
  0x6d   : > { %517 = vmatprep.subr.bf16.mxu0 %v516_v38 }
  0x70   : > { %519 = vmatpush1.bf16.msra.mxu0 %v518_v45 }
  0x71   : > { %521 = vmatprep.subr.bf16.mxu0 %v520_v46 }
  0x74   : > { %523 = vmatpush1.bf16.msra.mxu0 %v522_v51 }
  0x75   : > { %525 = vmatprep.subr.bf16.mxu0 %v524_v52 }
  0x78   : > { %527 = vmatpush1.bf16.msra.mxu0 %v526_v57 }
  0x79   : > { %529 = vmatprep.subr.bf16.mxu0 %v528_v58 }
  0x7c   : > { %531 = vmatpush1.bf16.msra.mxu0 %v530_v63 }
  0x7d   : > { %533 = vmatprep.subr.bf16.mxu0 %v532_v0 }
  0x80   : > { %535 = vmatpush1.bf16.msra.mxu0 %v534_v5 }
  0x81   : > { %537 = vmatprep.subr.bf16.mxu0 %v536_v6 }
  0x84   : > { %539 = vmatpush1.bf16.msra.mxu0 %v538_v11 }
  0x85   : > { %541 = vmatprep.subr.bf16.mxu0 %v540_v12 }
  0x88   : > { %543 = vmatpush1.bf16.msra.mxu0 %v542_v17 }
  0x89   : > { %545 = vmatprep.subr.bf16.mxu0 %v544_v18 }
  0x8c   : > { %547 = vmatpush1.bf16.msra.mxu0 %v546_v23 }
  0x8d   : > { %549 = vmatprep.subr.bf16.mxu0 %v548_v24 }
  0x90   : > { %551 = vmatpush1.bf16.msra.mxu0 %v550_v29 }
  0x91   : > { %553 = vmatprep.subr.bf16.mxu0 %v552_v30 }
  0x94   : > { %555 = vmatpush1.bf16.msra.mxu0 %v554_v33 }
  0x97   : > { %343 = vmatmul.mubr.f32.vlgmr.msra.gmra.mrb[0].mxu0 %v959_v41 }
 0x16a   : > { %v344_v34 = vpop.f32.mrb[0].mxu0 }
 0x16b   : > { %v346_v35 = vpop.f32.mrb[1].mxu0 }
 0x16c   : > { %v351_v36 = vcombine.low %v344_v34, %v346_v35 }
 0x16e   : > { %483 = vst.sshfl [vmem:[%s199_s7] sm:$0x33 pattern:$0x76325410] %v351_v36 }
 0x16f   : > { %682 = shalt.err (!%p679_p0)
}
 0x170   : > { %s683_s6 = scalar_lea.hbm %s1006_s24, 64  ;;  %s687_s4 = scalar_lea.hbm %s1051_s2, 512 }
 0x171   : > { %p684_p10 = scmp.ne.s32.totalorder %s1006_s24, %s683_s6  ;;  %p688_p3 = scmp.lt.u32.totalorder %s1006_s24, %s1051_s2 }
 0x172   : > { %p689_p5 = scmp.lt.u32.totalorder %s687_s4, %s683_s6  ;;  %p691_p12 = scmp.lt.u32.totalorder %s683_s6, %s1006_s24 }
 0x173   : > { %p685_p11 = pnand %p684_p10, %p1063_p2 }
 0x174   : > { %p690_p6 = por %p689_p5, %p688_p3 }
 0x175   : > { %p686_p1 = pneg %p685_p11 }
 0x176   : > { %p692_p4 = por %p691_p12, %p690_p6 }
 0x178   : > { %p693_p9 = pnand %p692_p4, %p686_p1 }
 0x17a   : > { %696 = shalt.err (!%p693_p9)
}
 0x17b   : > { %560 = dma.vmem_to_hbm [thread:$0]  (%p1063_p2), %s1008_s14, 64, %s1006_s24, %s362_s25  }
 0x17c PF: > { %p574_p7 = scmp.ge.s32.totalorder %s739_s12, 2  ;;  %s388_s23 = sand.u32 1, %s727_s9  }
 0x17d   : > { %p1064_p8 = scmp.ne.s32.totalorder %s1057_s22, 0  ;;  %s389_s3 = scalar_lea.sflag [#allocation4], %s388_s23 }
 0x17f   : > { %p570_p13 = pnand %p574_p7, %p1064_p8 }
 0x181   : > { %722 = dma.done.wait (!%p570_p13), %s389_s3, 64  }
 0x182   : > { %724 = vsyncadd (!%p570_p13), %s389_s3, 4294967232  ;;  %p18_p0 = scmp.ge.s32.totalorder %s786_s15, 10   ;;  %s1065_s9 = smov %s731_s10 }
 0x183   : > { %s1066_s10 = smov %s735_s11  ;;  %s1067_s11 = smov %s798_s18 }
 0x184   : > { %s1068_s12 = smov %s786_s15  ;;  %20 = sbr.rel (!%p18_p0) target bundleno = 7 (0x7), region = 86 }
 0x18b   :  { %394 = vsyncpa [#allocation3], 1 }
 0x18c   :  { %396 = vsyncpa [#allocation3 + $0x1], 1 }
 0x18d   :  { %397 = vsyncpa [#allocation6], 1 }
 0x18e   :  { %399 = vsyncpa [#allocation6 + $0x1], 1 }
 0x18f   :  { %400 = vsyncpa [#allocation4], 1 }
 0x190   :  { %402 = vsyncpa [#allocation4 + $0x1], 1 }

// kernel: reverse.8
= control target key start
LH: loop header
LB: loop body
LE: loop exit
PB: predicated region body
PF: predicated region fallthrough
CT: control target
= control target key end

     0   :  { %s344_s0 = inlined_call_operand.vmem [shape: f32[2,32,16,7], index: 0, kind: input, shape index: {}]   ;;  %s345_s1 = inlined_call_operand.vmem [shape: f32[2,32,16,7], index: 1, kind: output, shape index: {}]  }
   0x1   :  { %v112_v0 = vld [vmem:[%s344_s0 + $0x60] sm:$0xff]  ;;  %v113_v1 = vld [vmem:[%s344_s0 + $0xd0] sm:$0xff]  ;;  %v138_v14 = vld [vmem:[%s344_s0 + $0x68] sm:$0xff] }
   0x2   :  { %v115_v2 = vld [vmem:[%s344_s0 + $0x50] sm:$0xff]  ;;  %4 = vst [vmem:[%s345_s1] sm:$0xff] %v112_v0  ;;  %114 = vst [vmem:[%s345_s1 + $0x70] sm:$0xff] %v113_v1  ;;  %v117_v3 = vld [vmem:[%s344_s0 + $0xc0] sm:$0xff] }
   0x3   :  { %116 = vst [vmem:[%s345_s1 + $0x10] sm:$0xff] %v115_v2  ;;  %v119_v4 = vld [vmem:[%s344_s0 + $0x40] sm:$0xff]  ;;  %v121_v5 = vld [vmem:[%s344_s0 + $0xb0] sm:$0xff]  ;;  %118 = vst [vmem:[%s345_s1 + $0x80] sm:$0xff] %v117_v3 }
   0x4   :  { %120 = vst [vmem:[%s345_s1 + $0x20] sm:$0xff] %v119_v4  ;;  %122 = vst [vmem:[%s345_s1 + $0x90] sm:$0xff] %v121_v5  ;;  %v123_v6 = vld [vmem:[%s344_s0 + $0x30] sm:$0xff]  ;;  %v125_v7 = vld [vmem:[%s344_s0 + $0xa0] sm:$0xff] }
   0x5   :  { %v127_v8 = vld [vmem:[%s344_s0 + $0x20] sm:$0xff]  ;;  %124 = vst [vmem:[%s345_s1 + $0x30] sm:$0xff] %v123_v6  ;;  %126 = vst [vmem:[%s345_s1 + $0xa0] sm:$0xff] %v125_v7  ;;  %v129_v9 = vld [vmem:[%s344_s0 + $0x90] sm:$0xff] }
   0x6   :  { %128 = vst [vmem:[%s345_s1 + $0x40] sm:$0xff] %v127_v8  ;;  %v131_v10 = vld [vmem:[%s344_s0 + $0x10] sm:$0xff]  ;;  %v133_v11 = vld [vmem:[%s344_s0 + $0x80] sm:$0xff]  ;;  %130 = vst [vmem:[%s345_s1 + $0xb0] sm:$0xff] %v129_v9 }
   0x7   :  { %132 = vst [vmem:[%s345_s1 + $0x50] sm:$0xff] %v131_v10  ;;  %134 = vst [vmem:[%s345_s1 + $0xc0] sm:$0xff] %v133_v11  ;;  %v49_v12 = vld [vmem:[%s344_s0] sm:$0xff]  ;;  %v136_v13 = vld [vmem:[%s344_s0 + $0x70] sm:$0xff] }
   0x8   :  { %135 = vst [vmem:[%s345_s1 + $0x60] sm:$0xff] %v49_v12  ;;  %137 = vst [vmem:[%s345_s1 + $0xd0] sm:$0xff] %v136_v13  ;;  %v140_v15 = vld [vmem:[%s344_s0 + $0xd8] sm:$0xff]  ;;  %v144_v17 = vld [vmem:[%s344_s0 + $0xc8] sm:$0xff] }
   0x9   :  { %139 = vst [vmem:[%s345_s1 + $0x8] sm:$0xff] %v138_v14  ;;  %v142_v16 = vld [vmem:[%s344_s0 + $0x58] sm:$0xff]  ;;  %141 = vst [vmem:[%s345_s1 + $0x78] sm:$0xff] %v140_v15  ;;  %v146_v18 = vld [vmem:[%s344_s0 + $0x48] sm:$0xff] }
   0xa   :  { %143 = vst [vmem:[%s345_s1 + $0x18] sm:$0xff] %v142_v16  ;;  %145 = vst [vmem:[%s345_s1 + $0x88] sm:$0xff] %v144_v17  ;;  %v148_v19 = vld [vmem:[%s344_s0 + $0xb8] sm:$0xff]  ;;  %v152_v21 = vld [vmem:[%s344_s0 + $0xa8] sm:$0xff] }
   0xb   :  { %v150_v20 = vld [vmem:[%s344_s0 + $0x38] sm:$0xff]  ;;  %147 = vst [vmem:[%s345_s1 + $0x28] sm:$0xff] %v146_v18  ;;  %149 = vst [vmem:[%s345_s1 + $0x98] sm:$0xff] %v148_v19  ;;  %v154_v22 = vld [vmem:[%s344_s0 + $0x28] sm:$0xff] }
   0xc   :  { %151 = vst [vmem:[%s345_s1 + $0x38] sm:$0xff] %v150_v20  ;;  %v156_v23 = vld [vmem:[%s344_s0 + $0x98] sm:$0xff]  ;;  %153 = vst [vmem:[%s345_s1 + $0xa8] sm:$0xff] %v152_v21  ;;  %v160_v25 = vld [vmem:[%s344_s0 + $0x88] sm:$0xff] }
   0xd   :  { %155 = vst [vmem:[%s345_s1 + $0x48] sm:$0xff] %v154_v22  ;;  %157 = vst [vmem:[%s345_s1 + $0xb8] sm:$0xff] %v156_v23  ;;  %v158_v24 = vld [vmem:[%s344_s0 + $0x18] sm:$0xff]  ;;  %v162_v26 = vld [vmem:[%s344_s0 + $0x8] sm:$0xff] }
   0xe   :  { %159 = vst [vmem:[%s345_s1 + $0x58] sm:$0xff] %v158_v24  ;;  %161 = vst [vmem:[%s345_s1 + $0xc8] sm:$0xff] %v160_v25  ;;  %v164_v27 = vld [vmem:[%s344_s0 + $0x78] sm:$0xff] }
   0xf   :  { %163 = vst [vmem:[%s345_s1 + $0x68] sm:$0xff] %v162_v26  ;;  %165 = vst [vmem:[%s345_s1 + $0xd8] sm:$0xff] %v164_v27 }

// kernel: fno_forward.12
= control target key start
LH: loop header
LB: loop body
LE: loop exit
PB: predicated region body
PF: predicated region fallthrough
CT: control target
= control target key end

     0   :  { %s1747_s0 = inlined_call_operand.hbm [shape: f32[128,128], index: 0, kind: input, shape index: {}]   ;;  %s1748_s1 = inlined_call_operand.hbm [shape: f32[128,128], index: 1, kind: input, shape index: {}]   ;;  %s1749_s2 = inlined_call_operand.hbm [shape: f32[128,128], index: 2, kind: input, shape index: {}]   ;;  %s1750_s3 = inlined_call_operand.hbm [shape: f32[1,128], index: 3, kind: input, shape index: {}]   ;;  %s1751_s4 = inlined_call_operand.hbm [shape: f32[128,128], index: 4, kind: output, shape index: {}]  }
   0x1   :  { %1759 = sst [smem:[#allocation16_spill]] %s1747_s0 }
   0x2   :  { %9 = vsyncpa [#allocation3], 0 }
   0x3   :  { %11 = vsyncpa [#allocation3 + $0x1], 0 }
   0x4   :  { %12 = vsyncpa [#allocation6], 0 }
   0x5   :  { %14 = vsyncpa [#allocation6 + $0x1], 0 }
   0x6   :  { %15 = vsyncpa [#allocation9], 0 }
   0x7   :  { %16 = vsyncpa [#allocation4], 0 }
   0x8   :  { %18 = vsyncpa [#allocation4 + $0x1], 0  ;;  %s1281_s15 = smov 0   ;;  %s1283_s16 = smov 0  }
   0x9   :  { %s1285_s17 = smov 0   ;;  %s1287_s18 = smov 0  }
   0xa LB: > { %s1302_s19 = sadd.s32 4294967295, %s1244_s18   ;;  %s799_s20 = sadd.s32 4294967294, %s1244_s18   ;;  %s1244_s18 = sphi %s1287_s18, %s1781_s18   ;;  %s1240_s17 = sphi %s1285_s17, %s1780_s17   ;;  %s1236_s16 = sphi %s1283_s16, %s1779_s16   ;;  %s1232_s15 = sphi %s1281_s15, %s1778_s15  }
   0xb   : > { %p44_p0 = scmp.ne.s32.totalorder %s1236_s16, %s1232_s15  ;;  %p1752_p1 = scmp.eq.s32.totalorder %s1302_s19, 0 }
   0xc   : > { %p142_p3 = scmp.eq.s32.totalorder %s799_s20, 1  ;;  %p800_p5 = scmp.ge.s32.totalorder %s1244_s18, 1 }
   0xd   : > { %p1311_p4 = por %p1752_p1, %p44_p0  ;;  %p149_p7 = scmp.lt.s32.totalorder %s1244_s18, 3 }
   0xe   : > { %p1316_p6 = por %p142_p3, %p44_p0  ;;  %s1246_s24 = smov [#allocation7]  }
   0xf   : > { %s1760_s21 = scalar_select %p1311_p4, 1, 0 }
  0x10   : > { %s1761_s22 = scalar_select %p1316_p6, 1, 0 }
  0x11   : > { %p1321_p8 = pnand %p800_p5, %p149_p7  ;;  %s161_s25 = sshll.u32 %s1246_s24, 4  ;;  %s1325_s25 = int_to_ptr.vmem [resolvable:$true] %s161_s25 }
  0x12   : > { %s1247_s27 = smov [#allocation8]   ;;  %s1050_s5 = scalar_lea.hbm %s1749_s2, 2048 }
  0x13   : > { %p955_p9 = pneg %p1321_p8  ;;  %s175_s28 = sshll.u32 %s1247_s27, 4  ;;  %s1336_s28 = int_to_ptr.vmem [resolvable:$true] %s175_s28 }
  0x14   : > { %p1051_p12 = scmp.ne.s32.totalorder %s1749_s2, %s1050_s5  ;;  %p1057_p5 = scmp.lt.u32.totalorder %s1050_s5, %s1749_s2 }
  0x15   : > { %p1332_p11 = pnand %p955_p9, %p1752_p1 }
  0x17   : > { %p1052_p13 = pneg %p1332_p11 }
  0x19   : > { %p1053_p0 = pnand %p1052_p13, %p1051_p12 }
  0x1b   : > { %p1054_p3 = pneg %p1053_p0 }
  0x1d   : > { %p1059_p7 = pnand %p1057_p5, %p1054_p3 }
  0x1f   : > { %1062 = shalt.err (!%p1059_p7)
}
  0x20   : > { %s1063_s10 = scalar_lea.vmem %s1325_s25, 2048  ;;  %p1071_p2 = scmp.lt.s32.totalorder %s1325_s25, %s1325_s25 }
  0x21   : > { %p1064_p9 = scmp.ne.s32.totalorder %s1325_s25, %s1063_s10  ;;  %p1072_p12 = scmp.lt.s32.totalorder %s1063_s10, %s1063_s10 }
  0x23   : > { %p1066_p10 = pnand %p1064_p9, %p1052_p13  ;;  %p1073_p0 = por %p1072_p12, %p1071_p2 }
  0x25   : > { %p1067_p1 = pneg %p1066_p10 }
  0x27   : > { %p1074_p6 = pnand %p1073_p0, %p1067_p1 }
  0x29   : > { %1077 = shalt.err (!%p1074_p6)
}
  0x2a   : > { %s1753_s11 = smov 128   ;;  %s1755_s12 = smov 8  }
  0x2b   : > { %958 = dma.hbm_to_vmem [thread:$0]  (!%p1332_p11), %s1749_s2, 2048, %s1325_s25, [#allocation6], %s1753_s11, %s1753_s11, %s1755_s12  }
  0x2c   : > { %s1078_s27 = scalar_lea.hbm %s1750_s3, 16 }
  0x2d   : > { %p1079_p1 = scmp.ne.s32.totalorder %s1750_s3, %s1078_s27  ;;  %p1085_p10 = scmp.lt.u32.totalorder %s1078_s27, %s1750_s3 }
  0x2f   : > { %p1081_p2 = pnand %p1079_p1, %p1052_p13 }
  0x31   : > { %p1082_p6 = pneg %p1081_p2 }
  0x33   : > { %p1087_p3 = pnand %p1085_p10, %p1082_p6 }
  0x35   : > { %1090 = shalt.err (!%p1087_p3)
}
  0x36   : > { %s1091_s25 = scalar_lea.vmem %s1336_s28, 16  ;;  %s1098_s7 = scalar_lea.vmem %s1336_s28, 32 }
  0x37   : > { %p1092_p5 = scmp.ne.s32.totalorder %s1336_s28, %s1091_s25  ;;  %p1099_p12 = scmp.lt.s32.totalorder %s1336_s28, %s1336_s28 }
  0x38   : > { %p1100_p0 = scmp.lt.s32.totalorder %s1098_s7, %s1091_s25 }
  0x39   : > { %p1094_p7 = pnand %p1092_p5, %p1052_p13 }
  0x3a   : > { %p1101_p1 = por %p1100_p0, %p1099_p12 }
  0x3b   : > { %p1095_p9 = pneg %p1094_p7 }
  0x3d   : > { %p1102_p2 = pnand %p1101_p1, %p1095_p9 }
  0x3f   : > { %1105 = shalt.err (!%p1102_p2)
}
  0x40   : > { %961 = dma.hbm_to_vmem [thread:$0]  (!%p1332_p11), %s1750_s3, 16, %s1336_s28, [#allocation9]  }
  0x41   : > { %s1395_s10 = sadd.s32 1, %s1244_s18   ;;  %s31_s26 = sadd.s32 1, %s1240_s17 }
  0x42   : > { %s28_s13 = ssub.s32 %s1244_s18, %s1395_s10  ;;  %p38_p13 = scmp.ne.s32.totalorder %s1240_s17, %s1236_s16 }
  0x43   : > { %p29_p6 = scmp.eq.s32.totalorder %s28_s13, 0  ;;  %p39_p10 = scmp.eq.s32.totalorder %s1244_s18, 0 }
  0x44   : > { %p1764_p3 = scmp.eq.s32.totalorder %s1302_s19, 1  ;;  %p975_p7 = scmp.lt.s32.totalorder %s1244_s18, 2 }
  0x45   : > { %s1411_s20 = scalar_select %p29_p6, %s1240_s17, %s31_s26  }
  0x46   : > { %p1405_p5 = por %p1764_p3, %p38_p13  ;;  %p40_p9 = por %p39_p10, %p38_p13 }
  0x47   : > { %s186_s24 = sand.u32 1, %s1240_s17   ;;  %s822_s28 = sshll.u32 %s1244_s18, 10 }
  0x48   : > { %s1765_s14 = scalar_select %p1405_p5, 1, 0 }
  0x49   : > { %s804_s27 = sshll.u32 %s186_s24, 6  ;;  %s1766_s0 = sld [smem:[#allocation16_spill]] }
  0x4a   : > { %s190_s6 = scalar_lea.vmem [#allocation2], %s804_s27  ;;  %p1422_p11 = pnand %p975_p7, %p40_p9 }
  0x4b   : > { %s197_s25 = sshll.u32 %s190_s6, 4  ;;  %s1429_s26 = scalar_lea.hbm %s1748_s1, %s822_s28  ;;  %s1420_s25 = int_to_ptr.vmem [resolvable:$true] %s197_s25 }
  0x4c   : > { %s211_s13 = scalar_lea.vmem [#allocation5], %s804_s27  ;;  %s1433_s30 = scalar_lea.sflag [#allocation3], %s186_s24 }
  0x4d   : > { %s1431_s29 = sshll.u32 %s211_s13, 4  ;;  %p1108_p0 = pneg %p1422_p11  ;;  %s1465_s29 = int_to_ptr.vmem [resolvable:$true] %s1431_s29 }
  0x4f   : > { %s1418_s5 = scalar_lea.hbm %s1766_s0, %s822_s28  ;;  %s1111_s8 = scalar_lea.hbm %s1766_s0, 2048 }
  0x50   : > { %s1106_s6 = scalar_lea.hbm %s1418_s5, 1024  ;;  %p1112_p13 = scmp.lt.u32.totalorder %s1418_s5, %s1766_s0 }
  0x51   : > { %p1107_p12 = scmp.ne.s32.totalorder %s1418_s5, %s1106_s6  ;;  %p1113_p6 = scmp.lt.u32.totalorder %s1111_s8, %s1106_s6 }
  0x52   : > { %p1115_p3 = scmp.lt.u32.totalorder %s1106_s6, %s1418_s5 }
  0x53   : > { %p1109_p1 = pnand %p1108_p0, %p1107_p12  ;;  %p1114_p10 = por %p1113_p6, %p1112_p13 }
  0x55   : > { %p1110_p2 = pneg %p1109_p1  ;;  %p1116_p7 = por %p1115_p3, %p1114_p10 }
  0x57   : > { %p1117_p9 = pnand %p1116_p7, %p1110_p2 }
  0x59   : > { %1120 = shalt.err (!%p1117_p9)
}
  0x5a   : > { %s1121_s24 = scalar_lea.vmem %s1420_s25, 1024  ;;  %s1250_s11 = smov [#allocation2]  }
  0x5b   : > { %p1122_p12 = scmp.ne.s32.totalorder %s1420_s25, %s1121_s24  ;;  %s1126_s12 = sshll.u32 %s1250_s11, 4  ;;  %s1127_s12 = int_to_ptr.vmem [resolvable:$false] %s1126_s12 }
  0x5c   : > { %s1128_s27 = scalar_lea.vmem %s1127_s12, 2048  ;;  %p1129_p4 = scmp.lt.s32.totalorder %s1420_s25, %s1127_s12 }
  0x5d   : > { %p1124_p1 = pnand %p1122_p12, %p1108_p0  ;;  %p1130_p13 = scmp.lt.s32.totalorder %s1128_s27, %s1121_s24 }
  0x5f   : > { %p1125_p5 = pneg %p1124_p1  ;;  %p1131_p6 = por %p1130_p13, %p1129_p4 }
  0x61   : > { %p1132_p10 = pnand %p1131_p6, %p1125_p5 }
  0x63   : > { %1135 = shalt.err (!%p1132_p10)
}
  0x64   : > { %s1768_s13 = smov 8   ;;  %s1769_s6 = smov 128  }
  0x65   : > { %965 = dma.hbm_to_vmem [thread:$0]  (!%p1422_p11), %s1418_s5, 1024, %s1420_s25, %s1433_s30, %s1769_s6, %s1769_s6, %s1768_s13  }
  0x66   : > { %s207_s8 = sand.u32 1, %s1244_s18   ;;  %s1136_s28 = scalar_lea.hbm %s1429_s26, 1024 }
  0x67   : > { %s1468_s9 = scalar_lea.sflag [#allocation6], %s207_s8  ;;  %p1137_p4 = scmp.ne.s32.totalorder %s1429_s26, %s1136_s28 }
  0x68   : > { %s1141_s12 = scalar_lea.hbm %s1748_s1, 2048  ;;  %p1142_p3 = scmp.lt.u32.totalorder %s1429_s26, %s1748_s1 }
  0x69   : > { %p1139_p5 = pnand %p1137_p4, %p1108_p0  ;;  %p1143_p7 = scmp.lt.u32.totalorder %s1141_s12, %s1136_s28 }
  0x6a   : > { %p1145_p12 = scmp.lt.u32.totalorder %s1136_s28, %s1429_s26 }
  0x6b   : > { %p1140_p2 = pneg %p1139_p5  ;;  %p1144_p9 = por %p1143_p7, %p1142_p3 }
  0x6d   : > { %p1146_p1 = por %p1145_p12, %p1144_p9 }
  0x6f   : > { %p1147_p13 = pnand %p1146_p1, %p1140_p2 }
  0x71   : > { %1150 = shalt.err (!%p1147_p13)
}
  0x72   : > { %s1151_s5 = scalar_lea.vmem %s1465_s29, 1024  ;;  %s1251_s25 = smov [#allocation5]  }
  0x73   : > { %p1152_p6 = scmp.ne.s32.totalorder %s1465_s29, %s1151_s5  ;;  %s1156_s30 = sshll.u32 %s1251_s25, 4  ;;  %s1157_s30 = int_to_ptr.vmem [resolvable:$false] %s1156_s30 }
  0x74   : > { %s1158_s0 = scalar_lea.vmem %s1157_s30, 2048  ;;  %p1159_p5 = scmp.lt.s32.totalorder %s1465_s29, %s1157_s30 }
  0x75   : > { %p1154_p10 = pnand %p1152_p6, %p1108_p0  ;;  %p1160_p3 = scmp.lt.s32.totalorder %s1158_s0, %s1151_s5 }
  0x77   : > { %p1155_p4 = pneg %p1154_p10  ;;  %p1161_p7 = por %p1160_p3, %p1159_p5 }
  0x79   : > { %p1162_p9 = pnand %p1161_p7, %p1155_p4 }
  0x7b   : > { %1165 = shalt.err (!%p1162_p9)
}
  0x7c   : > { %968 = dma.hbm_to_vmem [thread:$0]  (!%p1422_p11), %s1429_s26, 1024, %s1465_s29, %s1468_s9, %s1769_s6, %s1769_s6, %s1768_s13  }
  0x7d   : > { %230 = sbr.rel (%p1321_p8) target bundleno = 478 (0x1de), region = 36  ;;  %s1500_s8 = sand.u32 (!%p1321_p8), 1, %s1236_s16  }
  0x7e   : > { %s1503_s28 = sshll.u32 (!%p1321_p8), %s1500_s8, 6  ;;  %s233_s7 = scalar_lea.sflag (!%p1321_p8), [#allocation3], %s1500_s8 }
  0x7f   : > { %s1507_s24 = scalar_lea.vmem (!%p1321_p8), [#allocation2], %s1503_s28  ;;  %p1770_p0 = scmp.ne.s32.totalorder (!%p1321_p8), %s1760_s21, 0 }
  0x84   : > { %1211 = dma.done.wait (%p1770_p0), %s233_s7, 1024  }
  0x85   : > { %1213 = vsyncadd (%p1770_p0), %s233_s7, 4294966272  ;;  %s241_s23 = sand.u32 1, %s1302_s19   ;;  %s1515_s29 = scalar_lea.vmem [#allocation5], %s1503_s28 }
  0x86   : > { %s242_s26 = scalar_lea.sflag [#allocation6], %s241_s23 }
  0x87   : > { %1215 = dma.done.wait (%p1770_p0), %s242_s26, 1024  }
  0x88   : > { %1217 = vsyncadd (%p1770_p0), %s242_s26, 4294966272  ;;  %p1771_p8 = scmp.eq.s32.totalorder %s1302_s19, 0 }
  0x8a   : > { %1219 = dma.done.wait (%p1771_p8), [#allocation6], 2048   ;;  %p1772_p11 = pmov %p1771_p8 }
  0x8b   : > { %p1773_p2 = pmov %p1771_p8 }
  0x8c   : > { %1221 = vsyncadd (%p1772_p11), [#allocation6], 4294965248 }
  0x8d   : > { %1223 = dma.done.wait (%p1773_p2), [#allocation9], 16   ;;  %p1774_p12 = pmov %p1773_p2 }
  0x8e   : > { %v302_v0 = vld [vmem:[#allocation7] sm:$0xff]  ;;  %v303_v1 = vld [vmem:[#allocation7 + $0x8] sm:$0xff]  ;;  %v304_v2 = vld [vmem:[#allocation7 + $0x10] sm:$0xff]  ;;  %s1664_s21 = scalar_lea.vmem [#allocation10], %s1503_s28  ;;  %s824_s13 = sshll.u32 %s1302_s19, 10 }
  0x8f   : > { %1225 = vsyncadd (%p1774_p12), [#allocation9], 4294967280  ;;  %v893_v3 = vpack.c.bf16 %v303_v1, %v302_v0  ;;  %v305_v4 = vld [vmem:[#allocation7 + $0x18] sm:$0xff]  ;;  %v306_v6 = vld [vmem:[#allocation7 + $0x20] sm:$0xff]  ;;  %s684_s6 = sshll.u32 %s1664_s21, 4  ;;  %s1700_s12 = scalar_lea.hbm %s1751_s4, %s824_s13  ;;  %s1702_s6 = int_to_ptr.vmem [resolvable:$true] %s684_s6 }
  0x90   : > { %v897_v5 = vpack.c.bf16 %v305_v4, %v304_v2  ;;  %v307_v7 = vld [vmem:[#allocation7 + $0x28] sm:$0xff]  ;;  %v294_v9 = vld [vmem:[%s1507_s24] sm:$0xff]  ;;  %v308_v11 = vld [vmem:[#allocation7 + $0x30] sm:$0xff]  ;;  %s671_s27 = scalar_lea.sflag [#allocation4], %s1500_s8  ;;  %s1166_s5 = scalar_lea.vmem %s1702_s6, 1024 }
  0x91   : > { %894 = vmatprep.subr.bf16.mxu0 %v893_v3  ;;  %925 = vmatprep.subr.bf16.mxu1 %v893_v3  ;;  %v901_v8 = vpack.c.bf16 %v307_v7, %v306_v6  ;;  %v298_v10 = vld [vmem:[%s1507_s24 + $0x20] sm:$0xff]  ;;  %v309_v12 = vld [vmem:[#allocation7 + $0x38] sm:$0xff]  ;;  %v311_v15 = vld [vmem:[#allocation7 + $0x48] sm:$0xff]  ;;  %p1167_p1 = scmp.ne.s32.totalorder %s1702_s6, %s1166_s5  ;;  %p1775_p13 = scmp.ne.s32.totalorder %s1765_s14, 0 }
  0x92   : > { %896 = vmatpush3.bf16.msra.mxu0 %v893_v3  ;;  %933 = vmatpush3.bf16.msra.mxu1 %v893_v3  ;;  %v905_v13 = vpack.c.bf16 %v309_v12, %v308_v11  ;;  %v310_v14 = vld [vmem:[#allocation7 + $0x40] sm:$0xff]  ;;  %v312_v17 = vld [vmem:[#allocation7 + $0x50] sm:$0xff]  ;;  %v313_v18 = vld [vmem:[#allocation7 + $0x58] sm:$0xff]  ;;  %s1253_s19 = smov [#allocation10]  }
  0x93   : > { %898 = vmatprep.subr.bf16.mxu0 %v897_v5  ;;  %926 = vmatprep.subr.bf16.mxu1 %v897_v5  ;;  %v909_v16 = vpack.c.bf16 %v311_v15, %v310_v14  ;;  %v913_v19 = vpack.c.bf16 %v313_v18, %v312_v17  ;;  %v314_v20 = vld [vmem:[#allocation7 + $0x60] sm:$0xff]  ;;  %v315_v21 = vld [vmem:[#allocation7 + $0x68] sm:$0xff]  ;;  %v316_v23 = vld [vmem:[#allocation7 + $0x70] sm:$0xff]  ;;  %p1168_p6 = pnand %p1167_p1, %p1775_p13  ;;  %s1170_s25 = sshll.u32 %s1253_s19, 4  ;;  %s1171_s25 = int_to_ptr.vmem [resolvable:$false] %s1170_s25 }
  0x94   : > { %881 = vmatprep.mubr.f32.mxu0 %v294_v9  ;;  %887 = vmatprep.mubr.f32.mxu1 %v298_v10  ;;  %v917_v22 = vpack.c.bf16 %v315_v21, %v314_v20  ;;  %v317_v24 = vld [vmem:[#allocation7 + $0x78] sm:$0xff]  ;;  %v295_v26 = vld [vmem:[%s1507_s24 + $0x8] sm:$0xff]  ;;  %v296_v28 = vld [vmem:[%s1507_s24 + $0x10] sm:$0xff]  ;;  %s1172_s30 = scalar_lea.vmem %s1171_s25, 2048  ;;  %p1173_p4 = scmp.lt.s32.totalorder %s1702_s6, %s1171_s25 }
  0x95   : > { %v921_v25 = vpack.c.bf16 %v317_v24, %v316_v23  ;;  %v299_v27 = vld [vmem:[%s1507_s24 + $0x28] sm:$0xff]  ;;  %v300_v29 = vld [vmem:[%s1507_s24 + $0x30] sm:$0xff]  ;;  %v297_v30 = vld [vmem:[%s1507_s24 + $0x18] sm:$0xff]  ;;  %p1169_p10 = pneg %p1168_p6  ;;  %p1174_p5 = scmp.lt.s32.totalorder %s1172_s30, %s1166_s5 }
  0x96   : > { %900 = vmatpush3.bf16.msra.mxu0 %v897_v5  ;;  %934 = vmatpush3.bf16.msra.mxu1 %v897_v5  ;;  %v301_v31 = vld [vmem:[%s1507_s24 + $0x38] sm:$0xff]  ;;  %v287_v32 = vld [vmem:[%s1515_s29 + $0x8] sm:$0xff]  ;;  %v286_v34 = vld [vmem:[%s1515_s29] sm:$0xff] }
  0x97   : > { %902 = vmatprep.subr.bf16.mxu0 %v901_v8  ;;  %927 = vmatprep.subr.bf16.mxu1 %v901_v8  ;;  %v291_v33 = vld [vmem:[%s1515_s29 + $0x28] sm:$0xff]  ;;  %v290_v35 = vld [vmem:[%s1515_s29 + $0x20] sm:$0xff]  ;;  %v289_v62 = vld [vmem:[%s1515_s29 + $0x18] sm:$0xff]  ;;  %p1175_p3 = por %p1174_p5, %p1173_p4 }
  0x98   : > { %v1541_v37 = vld [vmem:[#allocation8] ss:$0 sm:$0xff]  ;;  %v293_v3 = vld [vmem:[%s1515_s29 + $0x38] sm:$0xff]  ;;  %v288_v4 = vld [vmem:[%s1515_s29 + $0x10] sm:$0xff] }
  0x99   : > { %p1176_p7 = pnand %p1175_p3, %p1169_p10 }
  0x9a   : > { %904 = vmatpush3.bf16.msra.mxu0 %v901_v8  ;;  %935 = vmatpush3.bf16.msra.mxu1 %v901_v8 }
  0x9b   : > { %906 = vmatprep.subr.bf16.mxu0 %v905_v13  ;;  %928 = vmatprep.subr.bf16.mxu1 %v905_v13 }
  0x9e   : > { %908 = vmatpush3.bf16.msra.mxu0 %v905_v13  ;;  %936 = vmatpush3.bf16.msra.mxu1 %v905_v13  ;;  %v292_v13 = vld [vmem:[%s1515_s29 + $0x30] sm:$0xff] }
  0x9f   : > { %910 = vmatprep.subr.bf16.mxu0 %v909_v16  ;;  %929 = vmatprep.subr.bf16.mxu1 %v909_v16 }
  0xa2   : > { %912 = vmatpush3.bf16.msra.mxu0 %v909_v16  ;;  %937 = vmatpush3.bf16.msra.mxu1 %v909_v16 }
  0xa3   : > { %914 = vmatprep.subr.bf16.mxu0 %v913_v19  ;;  %930 = vmatprep.subr.bf16.mxu1 %v913_v19 }
  0xa6   : > { %916 = vmatpush3.bf16.msra.mxu0 %v913_v19  ;;  %938 = vmatpush3.bf16.msra.mxu1 %v913_v19 }
  0xa7   : > { %918 = vmatprep.subr.bf16.mxu0 %v917_v22  ;;  %931 = vmatprep.subr.bf16.mxu1 %v917_v22 }
  0xaa   : > { %920 = vmatpush3.bf16.msra.mxu0 %v917_v22  ;;  %939 = vmatpush3.bf16.msra.mxu1 %v917_v22 }
  0xab   : > { %922 = vmatprep.subr.bf16.mxu0 %v921_v25  ;;  %932 = vmatprep.subr.bf16.mxu1 %v921_v25 }
  0xae   : > { %924 = vmatpush3.bf16.msra.mxu0 %v921_v25  ;;  %940 = vmatpush3.bf16.msra.mxu1 %v921_v25 }
  0xb1   : > { %882 = vmatmul.mubr.f32.vlgmr.msra.gmra.mrb[0].mxu0 %v295_v26  ;;  %888 = vmatmul.mubr.f32.vlgmr.msra.gmra.mrb[0].mxu1 %v299_v27 }
  0xb2   : > { %884 = vmatprep.mubr.f32.mxu0 %v296_v28  ;;  %890 = vmatprep.mubr.f32.mxu1 %v300_v29  ;;  %v1252_v29 = vmov 1.0  }
  0xb5   : > { %885 = vmatmul.mubr.f32.gmra.mrb[2].mxu0 %v297_v30  ;;  %891 = vmatmul.mubr.f32.gmra.mrb[2].mxu1 %v301_v31 }
 0x184   : > { %v883_v36 = vpop.f32.mrb[0].mxu0  ;;  %v889_v38 = vpop.f32.mrb[0].mxu1 }
 0x185   : > { %v424_v39 = vadd.f32 %v883_v36, %v287_v32  ;;  %v428_v40 = vadd.f32 %v889_v38, %v291_v33  ;;  %v384_v41 = vpop.f32.mrb[1].mxu0  ;;  %v404_v42 = vpop.f32.mrb[1].mxu1 }
 0x186   : > { %v423_v43 = vadd.f32 %v384_v41, %v286_v34  ;;  %v427_v44 = vadd.f32 %v404_v42, %v290_v35 }
 0x187   : > { %v439_v45 = vadd.f32 %v1541_v37, %v424_v39  ;;  %v443_v46 = vadd.f32 %v1541_v37, %v428_v40 }
 0x188   : > { %v438_v47 = vadd.f32 %v1541_v37, %v423_v43  ;;  %v442_v48 = vadd.f32 %v1541_v37, %v427_v44  ;;  %v886_v49 = vpop.f32.mrb[2].mxu0  ;;  %v892_v50 = vpop.f32.mrb[2].mxu1 }
 0x189   : > { %v455_v51 = vmul.f32 0.70710677, %v439_v45  ;;  %v459_v52 = vmul.f32 0.70710677, %v443_v46  ;;  %v394_v58 = vpop.f32.mrb[3].mxu0  ;;  %v414_v63 = vpop.f32.mrb[3].mxu1  ;;  %v426_v6 = vadd.f32 %v886_v49, %v289_v62  ;;  %v430_v9 = vadd.f32 %v892_v50, %v293_v3 }
 0x18a   : > { %v454_v53 = vmul.f32 0.70710677, %v438_v47  ;;  %v1547_v57 = vmul.f32 0.70710677, %v442_v48  ;;  %v425_v10 = vadd.f32 %v394_v58, %v288_v4  ;;  %v1557_v14 = vmul.f32 0.5, %v439_v45 }
 0x18b   : > { %v479_v54 = vand.u32 2147483647, %v455_v51  ;;  %v483_v55 = vand.u32 2147483647, %v459_v52  ;;  %v1554_v8 = vadd.f32 %v1541_v37, %v426_v6  ;;  %v1563_v16 = vadd.f32 %v1541_v37, %v430_v9 }
 0x18c   : > { %v478_v56 = vand.u32 2147483647, %v454_v53  ;;  %v482_v2 = vand.u32 2147483647, %v1547_v57  ;;  %vm463_vm0 = vcmp.lt.f32.partialorder %v455_v51, 0.0  ;;  %v1565_v17 = vmul.f32 0.5, %v443_v46 }
 0x18d   : > { %v487_v59 = vmul.f32 0.3275911, %v479_v54  ;;  %v491_v60 = vmul.f32 0.3275911, %v483_v55  ;;  %v591_v11 = vsub.f32 0.0, %v479_v54  ;;  %v595_v18 = vsub.f32 0.0, %v483_v55 }
 0x18e   : > { %v486_v61 = vmul.f32 0.3275911, %v478_v56  ;;  %v490_v7 = vmul.f32 0.3275911, %v482_v2  ;;  %v1560_v15 = vmul.f32 0.70710677, %v1554_v8  ;;  %v1568_v19 = vadd.f32 %v1541_v37, %v425_v10 }
 0x18f   : > { %v495_v0 = vadd.f32 1.0, %v487_v59  ;;  %v499_v1 = vadd.f32 1.0, %v491_v60  ;;  %vm467_vm1 = vcmp.lt.f32.partialorder %v459_v52, 0.0  ;;  %v429_v21 = vadd.f32 %v414_v63, %v292_v13 }
 0x190   : > { %v494_v5 = vadd.f32 1.0, %v486_v61  ;;  %v498_v12 = vadd.f32 1.0, %v490_v7  ;;  %v481_v20 = vand.u32 2147483647, %v1560_v15  ;;  %v599_v22 = vmul.f32 %v591_v11, %v479_v54 }
 0x191   : > { %1018 = vrcp.f32 %v495_v0  ;;  %vm462_vm2 = vcmp.lt.f32.partialorder %v454_v53, 0.0  ;;  %v590_v23 = vsub.f32 0.0, %v478_v56  ;;  %v1572_v24 = vmul.f32 0.70710677, %v1563_v16 }
 0x192   : > { %1020 = vrcp.f32 %v499_v1  ;;  %v1574_v25 = vmul.f32 0.5, %v438_v47  ;;  %v594_v26 = vsub.f32 0.0, %v482_v2  ;;  %v489_v27 = vmul.f32 0.3275911, %v481_v20 }
 0x193   : > { %1022 = vrcp.f32 %v494_v5  ;;  %v1577_v28 = vmul.f32 0.70710677, %v1568_v19  ;;  %v1581_v30 = vsel %vm463_vm0, -1.0, %v1252_v29  ;;  %v603_v31 = vmul.f32 %v595_v18, %v483_v55 }
 0x194   : > { %1024 = vrcp.f32 %v498_v12  ;;  %v1583_v32 = vmul.f32 0.5, %v442_v48  ;;  %v485_v33 = vand.u32 2147483647, %v1572_v24  ;;  %v1590_v35 = vsel %vm467_vm1, -1.0, %v1252_v29 }
 0x195   : > { %v1593_v36 = vsel %vm462_vm2, -1.0, %v1252_v29  ;;  %v497_v38 = vadd.f32 1.0, %v489_v27  ;;  %v1596_v39 = vadd.f32 %v1541_v37, %v429_v21  ;;  %v608_v42 = vmul.f32 1.442695, %v599_v22 }
 0x196   : > { %v598_v43 = vmul.f32 %v590_v23, %v478_v56  ;;  %v493_v44 = vmul.f32 0.3275911, %v485_v33  ;;  %v602_v46 = vmul.f32 %v594_v26, %v482_v2  ;;  %v480_v47 = vand.u32 2147483647, %v1577_v28 }
 0x197   : > { %1026 = vrcp.f32 %v497_v38  ;;  %v616_v49 = vmul.f32 1.442695, %v603_v31  ;;  %v593_v50 = vsub.f32 0.0, %v481_v20  ;;  %v1606_v54 = vmul.f32 0.70710677, %v1596_v39 }
 0x198   : > { %v501_v51 = vadd.f32 1.0, %v493_v44  ;;  %v488_v53 = vmul.f32 0.3275911, %v480_v47  ;;  %v606_v58 = vmul.f32 1.442695, %v598_v43  ;;  %v597_v62 = vsub.f32 0.0, %v485_v33 }
 0x199   : > { %v614_v61 = vmul.f32 1.442695, %v602_v46  ;;  %v601_v4 = vmul.f32 %v593_v50, %v481_v20  ;;  %v1615_v5 = vand.u32 2147483647, %v1606_v54  ;;  %v592_v26 = vsub.f32 0.0, %v480_v47 }
 0x19a   : > { %1028 = vrcp.f32 %v501_v51  ;;  %v496_v63 = vadd.f32 1.0, %v488_v53  ;;  %v605_v11 = vmul.f32 %v597_v62, %v485_v33  ;;  %vm466_vm3 = vcmp.lt.f32.partialorder %v1547_v57, 0.0 }
 0x19b   : > { %v1586_v34 = vpop.eup %1018  ;;  %1030 = vpow2.f32 %v608_v42  ;;  %v492_v12 = vmul.f32 0.3275911, %v1615_v5  ;;  %v612_v23 = vmul.f32 1.442695, %v601_v4  ;;  %vm465_vm4 = vcmp.lt.f32.partialorder %v1560_v15, 0.0 }
 0x19c   : > { %v1598_v40 = vpop.eup %1020  ;;  %v519_v41 = vmul.f32 1.0614054, %v1586_v34  ;;  %1032 = vrcp.f32 %v496_v63  ;;  %v620_v43 = vmul.f32 1.442695, %v605_v11  ;;  %v474_v63 = vsel %vm466_vm3, -1.0, %v1252_v29 }
 0x19d   : > { %v523_v45 = vmul.f32 1.0614054, %v1598_v40  ;;  %v1603_v52 = vpop.eup %1022  ;;  %1034 = vpow2.f32 %v616_v49  ;;  %v500_v27 = vadd.f32 1.0, %v492_v12  ;;  %vm469_vm5 = vcmp.lt.f32.partialorder %v1572_v24, 0.0 }
 0x19e   : > { %v527_v48 = vadd.f32 -1.4531521, %v519_v41  ;;  %v518_v56 = vmul.f32 1.0614054, %v1603_v52  ;;  %v1610_v59 = vpop.eup %1024  ;;  %1036 = vpow2.f32 %v606_v58  ;;  %vm464_vm6 = vcmp.lt.f32.partialorder %v1577_v28, 0.0 }
 0x19f   : > { %v531_v37 = vadd.f32 -1.4531521, %v523_v45  ;;  %v522_v2 = vmul.f32 1.0614054, %v1610_v59  ;;  %1038 = vpow2.f32 %v614_v61  ;;  %v448_v28 = vmul.f32 0.5, %v1568_v19 }
 0x1a0   : > { %v535_v55 = vmul.f32 %v1586_v34, %v527_v48  ;;  %v526_v1 = vadd.f32 -1.4531521, %v518_v56  ;;  %1040 = vrcp.f32 %v500_v27  ;;  %vm468_vm7 = vcmp.lt.f32.partialorder %v1606_v54, 0.0 }
 0x1a1   : > { %v539_v60 = vmul.f32 %v1598_v40, %v531_v37  ;;  %v530_v9 = vadd.f32 -1.4531521, %v522_v2  ;;  %v1622_v21 = vpop.eup %1026  ;;  %1042 = vpow2.f32 %v612_v23  ;;  %v600_v37 = vmul.f32 %v592_v26, %v480_v47 }
 0x1a2   : > { %v543_v0 = vadd.f32 1.4214138, %v535_v55  ;;  %v534_v7 = vmul.f32 %v1603_v52, %v526_v1  ;;  %v521_v33 = vmul.f32 1.0614054, %v1622_v21  ;;  %1044 = vpow2.f32 %v620_v43 }
 0x1a3   : > { %v547_v3 = vadd.f32 1.4214138, %v539_v60  ;;  %v538_v20 = vmul.f32 %v1610_v59, %v530_v9  ;;  %v596_v23 = vsub.f32 0.0, %v1615_v5  ;;  %v452_v19 = vmul.f32 0.5, %v1596_v39 }
 0x1a4   : > { %v551_v6 = vmul.f32 %v1586_v34, %v543_v0  ;;  %v542_v18 = vadd.f32 1.4214138, %v534_v7  ;;  %v1629_v44 = vpop.eup %1028  ;;  %v529_v49 = vadd.f32 -1.4531521, %v521_v33 }
 0x1a5   : > { %v555_v10 = vmul.f32 %v1598_v40, %v547_v3  ;;  %v546_v41 = vadd.f32 1.4214138, %v538_v20  ;;  %v525_v51 = vmul.f32 1.0614054, %v1629_v44  ;;  %v1031_v53 = vpop.eup %1030 }
 0x1a6   : > { %v559_v13 = vadd.f32 -0.28449672, %v551_v6  ;;  %v550_v38 = vmul.f32 %v1603_v52, %v542_v18  ;;  %v537_v60 = vmul.f32 %v1622_v21, %v529_v49  ;;  %v1636_v61 = vpop.eup %1032 }
 0x1a7   : > { %v563_v22 = vadd.f32 -0.28449672, %v555_v10  ;;  %v554_v48 = vmul.f32 %v1610_v59, %v546_v41  ;;  %v533_v0 = vadd.f32 -1.4531521, %v525_v51  ;;  %v1035_v1 = vpop.eup %1034  ;;  %v520_v9 = vmul.f32 1.0614054, %v1636_v61 }
 0x1a8   : > { %v567_v31 = vmul.f32 %v1586_v34, %v559_v13  ;;  %v558_v46 = vadd.f32 -0.28449672, %v550_v38  ;;  %v545_v3 = vadd.f32 1.4214138, %v537_v60  ;;  %v1037_v4 = vpop.eup %1036  ;;  %v610_v10 = vmul.f32 1.442695, %v600_v37 }
 0x1a9   : > { %v571_v42 = vmul.f32 %v1598_v40, %v563_v22  ;;  %v562_v58 = vadd.f32 -0.28449672, %v554_v48  ;;  %v541_v7 = vmul.f32 %v1629_v44, %v533_v0  ;;  %v528_v22 = vadd.f32 -1.4531521, %v520_v9 }
 0x1aa   : > { %v575_v45 = vadd.f32 0.2548296, %v567_v31  ;;  %v566_v56 = vmul.f32 %v1603_v52, %v558_v46  ;;  %v553_v13 = vmul.f32 %v1622_v21, %v545_v3  ;;  %1046 = vpow2.f32 %v610_v10 }
 0x1ab   : > { %v579_v50 = vadd.f32 0.2548296, %v571_v42  ;;  %v549_v20 = vadd.f32 1.4214138, %v541_v7  ;;  %v536_v42 = vmul.f32 %v1636_v61, %v528_v22  ;;  %v604_v51 = vmul.f32 %v596_v23, %v1615_v5 }
 0x1ac   : > { %v583_v55 = vmul.f32 %v1586_v34, %v575_v45  ;;  %v574_v2 = vadd.f32 0.2548296, %v566_v56  ;;  %v570_v34 = vmul.f32 %v1610_v59, %v562_v58  ;;  %v561_v38 = vadd.f32 -0.28449672, %v553_v13 }
 0x1ad   : > { %v587_v62 = vmul.f32 %v1598_v40, %v579_v50  ;;  %v1039_v40 = vpop.eup %1038 }
 0x1ae   : > { %v623_v47 = vmul.f32 %v1031_v53, %v583_v55  ;;  %v582_v57 = vmul.f32 %v1603_v52, %v574_v2  ;;  %v578_v12 = vadd.f32 0.2548296, %v570_v34  ;;  %v1650_v41 = vpop.eup %1040  ;;  %v557_v52 = vmul.f32 %v1629_v44, %v549_v20 }
 0x1af   : > { %v627_v6 = vmul.f32 %v1035_v1, %v587_v62  ;;  %v569_v48 = vmul.f32 %v1622_v21, %v561_v38  ;;  %v524_v0 = vmul.f32 1.0614054, %v1650_v41  ;;  %v477_v20 = vsel %vm469_vm5, -1.0, %v1252_v29 }
 0x1b0   : > { %v631_v11 = vsub.f32 1.0, %v623_v47  ;;  %v622_v27 = vmul.f32 %v1037_v4, %v582_v57  ;;  %v586_v31 = vmul.f32 %v1610_v59, %v578_v12  ;;  %v565_v50 = vadd.f32 -0.28449672, %v557_v52 }
 0x1b1   : > { %v635_v18 = vsub.f32 1.0, %v627_v6  ;;  %v544_v59 = vadd.f32 1.4214138, %v536_v42  ;;  %v577_v55 = vadd.f32 0.2548296, %v569_v48 }
 0x1b2   : > { %v639_v26 = vmul.f32 %v631_v11, %v1581_v30  ;;  %v630_v45 = vsub.f32 1.0, %v622_v27  ;;  %v626_v46 = vmul.f32 %v1039_v40, %v586_v31  ;;  %v1043_v30 = vpop.eup %1042  ;;  %v573_v60 = vmul.f32 %v1629_v44, %v565_v50 }
 0x1b3   : > { %v643_v33 = vmul.f32 %v635_v18, %v1590_v35  ;;  %v1045_v56 = vpop.eup %1044  ;;  %v552_v62 = vmul.f32 %v1636_v61, %v544_v59  ;;  %v532_v47 = vadd.f32 -1.4531521, %v524_v0  ;;  %v618_v4 = vmul.f32 1.442695, %v604_v51 }
 0x1b4   : > { %v647_v43 = vadd.f32 1.0, %v639_v26  ;;  %v638_v35 = vmul.f32 %v630_v45, %v1593_v36  ;;  %v634_v53 = vsub.f32 1.0, %v626_v46  ;;  %v585_v36 = vmul.f32 %v1622_v21, %v577_v55  ;;  %v1047_v10 = vpop.eup %1046 }
 0x1b5   : > { %v651_v49 = vadd.f32 1.0, %v643_v33  ;;  %v560_v1 = vadd.f32 -0.28449672, %v552_v62  ;;  %v473_v21 = vsel %vm465_vm4, -1.0, %v1252_v29  ;;  %1048 = vpow2.f32 %v618_v4 }
 0x1b6   : > { %v655_v37 = vmul.f32 %v647_v43, %v1557_v14  ;;  %v646_v14 = vadd.f32 1.0, %v638_v35  ;;  %v642_v5 = vmul.f32 %v634_v53, %v474_v63  ;;  %v625_v3 = vmul.f32 %v1043_v30, %v585_v36 }
 0x1b7   : > { %v659_v58 = vmul.f32 %v651_v49, %v1565_v17  ;;  %v581_v17 = vadd.f32 0.2548296, %v573_v60  ;;  %v568_v7 = vmul.f32 %v1636_v61, %v560_v1  ;;  %v540_v63 = vmul.f32 %v1650_v41, %v532_v47 }
 0x1b8   : > { %663 = vst [vmem:[%s1664_s21 + $0x8] sm:$0xff] %v655_v37  ;;  %v654_v2 = vmul.f32 %v646_v14, %v1574_v25  ;;  %v650_v34 = vadd.f32 1.0, %v642_v5  ;;  %v633_v9 = vsub.f32 1.0, %v625_v3  ;;  %v453_v27 = vmul.f32 0.5, %v1563_v16 }
 0x1b9   : > { %667 = vst [vmem:[%s1664_s21 + $0x28] sm:$0xff] %v659_v58  ;;  %v589_v6 = vmul.f32 %v1629_v44, %v581_v17  ;;  %v576_v40 = vadd.f32 0.2548296, %v568_v7  ;;  %v548_v11 = vadd.f32 1.4214138, %v540_v63  ;;  %v476_v49 = vsel %vm468_vm7, -1.0, %v1252_v29 }
 0x1ba   : > { %662 = vst [vmem:[%s1664_s21] sm:$0xff] %v654_v2  ;;  %v658_v15 = vmul.f32 %v650_v34, %v1583_v32  ;;  %v641_v57 = vmul.f32 %v633_v9, %v473_v21  ;;  %v449_v32 = vmul.f32 0.5, %v1554_v8  ;;  %v472_v8 = vsel %vm464_vm6, -1.0, %v1252_v29 }
 0x1bb   : > { %v629_v25 = vmul.f32 %v1045_v56, %v589_v6  ;;  %v584_v12 = vmul.f32 %v1636_v61, %v576_v40  ;;  %v556_v13 = vmul.f32 %v1650_v41, %v548_v11 }
 0x1bc   : > { %666 = vst [vmem:[%s1664_s21 + $0x20] sm:$0xff] %v658_v15  ;;  %v649_v18 = vadd.f32 1.0, %v641_v57 }
 0x1bd   : > { %v637_v44 = vsub.f32 1.0, %v629_v25  ;;  %v624_v24 = vmul.f32 %v1047_v10, %v584_v12  ;;  %v564_v23 = vadd.f32 -0.28449672, %v556_v13 }
 0x1be   : > { %v657_v26 = vmul.f32 %v649_v18, %v449_v32 }
 0x1bf   : > { %v645_v22 = vmul.f32 %v637_v44, %v477_v20  ;;  %v632_v38 = vsub.f32 1.0, %v624_v24  ;;  %v572_v61 = vmul.f32 %v1650_v41, %v564_v23  ;;  %v1049_v16 = vpop.eup %1048 }
 0x1c0   : > { %665 = vst [vmem:[%s1664_s21 + $0x18] sm:$0xff] %v657_v26 }
 0x1c1   : > { %v653_v31 = vadd.f32 1.0, %v645_v22  ;;  %v640_v52 = vmul.f32 %v632_v38, %v472_v8  ;;  %v580_v42 = vadd.f32 0.2548296, %v572_v61 }
 0x1c3   : > { %v661_v33 = vmul.f32 %v653_v31, %v453_v27  ;;  %v648_v43 = vadd.f32 1.0, %v640_v52  ;;  %v588_v45 = vmul.f32 %v1650_v41, %v580_v42 }
 0x1c5   : > { %669 = vst [vmem:[%s1664_s21 + $0x38] sm:$0xff] %v661_v33  ;;  %v656_v46 = vmul.f32 %v648_v43, %v448_v28  ;;  %v628_v48 = vmul.f32 %v1049_v16, %v588_v45 }
 0x1c7   : > { %664 = vst [vmem:[%s1664_s21 + $0x10] sm:$0xff] %v656_v46  ;;  %v636_v30 = vsub.f32 1.0, %v628_v48 }
 0x1c9   : > { %v644_v50 = vmul.f32 %v636_v30, %v476_v49 }
 0x1cb   : > { %v652_v59 = vadd.f32 1.0, %v644_v50 }
 0x1cd   : > { %v660_v54 = vmul.f32 %v652_v59, %v452_v19 }
 0x1cf   : > { %668 = vst [vmem:[%s1664_s21 + $0x30] sm:$0xff] %v660_v54 }
 0x1d0   : > { %1179 = shalt.err (!%p1176_p7)
}
 0x1d1   : > { %s1180_s0 = scalar_lea.hbm %s1700_s12, 1024  ;;  %s1184_s24 = scalar_lea.hbm %s1751_s4, 2048 }
 0x1d2   : > { %p1181_p9 = scmp.ne.s32.totalorder %s1700_s12, %s1180_s0  ;;  %p1185_p11 = scmp.lt.u32.totalorder %s1700_s12, %s1751_s4 }
 0x1d3   : > { %p1186_p2 = scmp.lt.u32.totalorder %s1184_s24, %s1180_s0  ;;  %p1188_p1 = scmp.lt.u32.totalorder %s1180_s0, %s1700_s12 }
 0x1d4   : > { %p1182_p0 = pnand %p1181_p9, %p1775_p13 }
 0x1d5   : > { %p1187_p12 = por %p1186_p2, %p1185_p11 }
 0x1d6   : > { %p1183_p8 = pneg %p1182_p0 }
 0x1d7   : > { %p1189_p6 = por %p1188_p1, %p1187_p12 }
 0x1d9   : > { %p1190_p10 = pnand %p1189_p6, %p1183_p8 }
 0x1db   : > { %1193 = shalt.err (!%p1190_p10)
}
 0x1dc   : > { %s1254_s29 = smov 128   ;;  %s1255_s21 = smov 8  }
 0x1dd   : > { %953 = dma.vmem_to_hbm [thread:$0]  (%p1775_p13), %s1702_s6, 1024, %s1700_s12, %s671_s27, %s1254_s29, %s1254_s29, %s1255_s21  }
 0x1de PF: > { %s699_s13 = sand.u32 1, %s1232_s15   ;;  %p1776_p4 = scmp.ne.s32.totalorder %s1761_s22, 0 }
 0x1df   : > { %p1777_p5 = scmp.ge.s32.totalorder %s1244_s18, 2  ;;  %s700_s9 = scalar_lea.sflag [#allocation4], %s699_s13 }
 0x1e1   : > { %p970_p3 = pnand %p1777_p5, %p1776_p4 }
 0x1e3   : > { %1227 = dma.done.wait (!%p970_p3), %s700_s9, 1024  }
 0x1e4   : > { %1229 = vsyncadd (!%p970_p3), %s700_s9, 4294966272  ;;  %p21_p7 = scmp.ge.s32.totalorder %s1395_s10, 4   ;;  %s1778_s15 = smov %s1236_s16 }
 0x1e5   : > { %s1779_s16 = smov %s1240_s17  ;;  %s1780_s17 = smov %s1411_s20 }
 0x1e6   : > { %s1781_s18 = smov %s1395_s10  ;;  %23 = sbr.rel (!%p21_p7) target bundleno = 10 (0xa), region = 102 }
 0x1ed   :  { %705 = vsyncpa [#allocation3], 1 }
 0x1ee   :  { %707 = vsyncpa [#allocation3 + $0x1], 1 }
 0x1ef   :  { %708 = vsyncpa [#allocation6], 1 }
 0x1f0   :  { %710 = vsyncpa [#allocation6 + $0x1], 1 }
 0x1f1   :  { %711 = vsyncpa [#allocation9], 1 }
 0x1f2   :  { %712 = vsyncpa [#allocation4], 1 }
 0x1f3   :  { %714 = vsyncpa [#allocation4 + $0x1], 1 }

// kernel: fno_forward.18
= control target key start
LH: loop header
LB: loop body
LE: loop exit
PB: predicated region body
PF: predicated region fallthrough
CT: control target
= control target key end

     0   :  { %s1346_s0 = inlined_call_operand.hbm [shape: f32[128,128], index: 0, kind: input, shape index: {}]   ;;  %s1347_s1 = inlined_call_operand.hbm [shape: f32[128,128], index: 1, kind: input, shape index: {}]   ;;  %s1348_s2 = inlined_call_operand.hbm [shape: f32[128,128], index: 2, kind: input, shape index: {}]   ;;  %s1349_s3 = inlined_call_operand.hbm [shape: f32[1,128], index: 3, kind: input, shape index: {}]   ;;  %s1350_s4 = inlined_call_operand.hbm [shape: f32[128,128], index: 4, kind: output, shape index: {}]  }
   0x1   :  { %1358 = sst [smem:[#allocation16_spill]] %s1346_s0 }
   0x2   :  { %9 = vsyncpa [#allocation3], 0 }
   0x3   :  { %11 = vsyncpa [#allocation3 + $0x1], 0 }
   0x4   :  { %12 = vsyncpa [#allocation6], 0 }
   0x5   :  { %14 = vsyncpa [#allocation6 + $0x1], 0 }
   0x6   :  { %15 = vsyncpa [#allocation9], 0 }
   0x7   :  { %16 = vsyncpa [#allocation4], 0 }
   0x8   :  { %18 = vsyncpa [#allocation4 + $0x1], 0  ;;  %s1031_s15 = smov 0   ;;  %s1033_s16 = smov 0  }
   0x9   :  { %s1035_s17 = smov 0   ;;  %s1037_s18 = smov 0  }
   0xa LB: > { %s1052_s19 = sadd.s32 4294967295, %s995_s18   ;;  %s583_s20 = sadd.s32 4294967294, %s995_s18   ;;  %s995_s18 = sphi %s1037_s18, %s1380_s18   ;;  %s991_s17 = sphi %s1035_s17, %s1379_s17   ;;  %s987_s16 = sphi %s1033_s16, %s1378_s16   ;;  %s983_s15 = sphi %s1031_s15, %s1377_s15  }
   0xb   : > { %p44_p0 = scmp.ne.s32.totalorder %s987_s16, %s983_s15  ;;  %p1351_p1 = scmp.eq.s32.totalorder %s1052_s19, 0 }
   0xc   : > { %p142_p3 = scmp.eq.s32.totalorder %s583_s20, 1  ;;  %p584_p5 = scmp.ge.s32.totalorder %s995_s18, 1 }
   0xd   : > { %p1061_p4 = por %p1351_p1, %p44_p0  ;;  %p149_p7 = scmp.lt.s32.totalorder %s995_s18, 3 }
   0xe   : > { %p1066_p6 = por %p142_p3, %p44_p0  ;;  %s997_s24 = smov [#allocation7]  }
   0xf   : > { %s1359_s21 = scalar_select %p1061_p4, 1, 0 }
  0x10   : > { %s1360_s22 = scalar_select %p1066_p6, 1, 0 }
  0x11   : > { %p1071_p8 = pnand %p584_p5, %p149_p7  ;;  %s161_s25 = sshll.u32 %s997_s24, 4  ;;  %s1075_s25 = int_to_ptr.vmem [resolvable:$true] %s161_s25 }
  0x12   : > { %s998_s27 = smov [#allocation8]   ;;  %s801_s5 = scalar_lea.hbm %s1348_s2, 2048 }
  0x13   : > { %p739_p9 = pneg %p1071_p8  ;;  %s175_s28 = sshll.u32 %s998_s27, 4  ;;  %s1086_s28 = int_to_ptr.vmem [resolvable:$true] %s175_s28 }
  0x14   : > { %p802_p12 = scmp.ne.s32.totalorder %s1348_s2, %s801_s5  ;;  %p808_p5 = scmp.lt.u32.totalorder %s801_s5, %s1348_s2 }
  0x15   : > { %p1082_p11 = pnand %p739_p9, %p1351_p1 }
  0x17   : > { %p803_p13 = pneg %p1082_p11 }
  0x19   : > { %p804_p0 = pnand %p803_p13, %p802_p12 }
  0x1b   : > { %p805_p3 = pneg %p804_p0 }
  0x1d   : > { %p810_p7 = pnand %p808_p5, %p805_p3 }
  0x1f   : > { %813 = shalt.err (!%p810_p7)
}
  0x20   : > { %s814_s10 = scalar_lea.vmem %s1075_s25, 2048  ;;  %p822_p2 = scmp.lt.s32.totalorder %s1075_s25, %s1075_s25 }
  0x21   : > { %p815_p9 = scmp.ne.s32.totalorder %s1075_s25, %s814_s10  ;;  %p823_p12 = scmp.lt.s32.totalorder %s814_s10, %s814_s10 }
  0x23   : > { %p817_p10 = pnand %p815_p9, %p803_p13  ;;  %p824_p0 = por %p823_p12, %p822_p2 }
  0x25   : > { %p818_p1 = pneg %p817_p10 }
  0x27   : > { %p825_p6 = pnand %p824_p0, %p818_p1 }
  0x29   : > { %828 = shalt.err (!%p825_p6)
}
  0x2a   : > { %s1352_s11 = smov 128   ;;  %s1354_s12 = smov 8  }
  0x2b   : > { %742 = dma.hbm_to_vmem [thread:$0]  (!%p1082_p11), %s1348_s2, 2048, %s1075_s25, [#allocation6], %s1352_s11, %s1352_s11, %s1354_s12  }
  0x2c   : > { %s829_s27 = scalar_lea.hbm %s1349_s3, 16 }
  0x2d   : > { %p830_p1 = scmp.ne.s32.totalorder %s1349_s3, %s829_s27  ;;  %p836_p10 = scmp.lt.u32.totalorder %s829_s27, %s1349_s3 }
  0x2f   : > { %p832_p2 = pnand %p830_p1, %p803_p13 }
  0x31   : > { %p833_p6 = pneg %p832_p2 }
  0x33   : > { %p838_p3 = pnand %p836_p10, %p833_p6 }
  0x35   : > { %841 = shalt.err (!%p838_p3)
}
  0x36   : > { %s842_s25 = scalar_lea.vmem %s1086_s28, 16  ;;  %s849_s7 = scalar_lea.vmem %s1086_s28, 32 }
  0x37   : > { %p843_p5 = scmp.ne.s32.totalorder %s1086_s28, %s842_s25  ;;  %p850_p12 = scmp.lt.s32.totalorder %s1086_s28, %s1086_s28 }
  0x38   : > { %p851_p0 = scmp.lt.s32.totalorder %s849_s7, %s842_s25 }
  0x39   : > { %p845_p7 = pnand %p843_p5, %p803_p13 }
  0x3a   : > { %p852_p1 = por %p851_p0, %p850_p12 }
  0x3b   : > { %p846_p9 = pneg %p845_p7 }
  0x3d   : > { %p853_p2 = pnand %p852_p1, %p846_p9 }
  0x3f   : > { %856 = shalt.err (!%p853_p2)
}
  0x40   : > { %745 = dma.hbm_to_vmem [thread:$0]  (!%p1082_p11), %s1349_s3, 16, %s1086_s28, [#allocation9]  }
  0x41   : > { %s1145_s10 = sadd.s32 1, %s995_s18   ;;  %s31_s26 = sadd.s32 1, %s991_s17 }
  0x42   : > { %s28_s13 = ssub.s32 %s995_s18, %s1145_s10  ;;  %p38_p13 = scmp.ne.s32.totalorder %s991_s17, %s987_s16 }
  0x43   : > { %p29_p6 = scmp.eq.s32.totalorder %s28_s13, 0  ;;  %p39_p10 = scmp.eq.s32.totalorder %s995_s18, 0 }
  0x44   : > { %p1363_p3 = scmp.eq.s32.totalorder %s1052_s19, 1  ;;  %p759_p7 = scmp.lt.s32.totalorder %s995_s18, 2 }
  0x45   : > { %s1161_s20 = scalar_select %p29_p6, %s991_s17, %s31_s26  }
  0x46   : > { %p1155_p5 = por %p1363_p3, %p38_p13  ;;  %p40_p9 = por %p39_p10, %p38_p13 }
  0x47   : > { %s186_s24 = sand.u32 1, %s991_s17   ;;  %s606_s28 = sshll.u32 %s995_s18, 10 }
  0x48   : > { %s1364_s14 = scalar_select %p1155_p5, 1, 0 }
  0x49   : > { %s588_s27 = sshll.u32 %s186_s24, 6  ;;  %s1365_s0 = sld [smem:[#allocation16_spill]] }
  0x4a   : > { %s190_s6 = scalar_lea.vmem [#allocation2], %s588_s27  ;;  %p1172_p11 = pnand %p759_p7, %p40_p9 }
  0x4b   : > { %s197_s25 = sshll.u32 %s190_s6, 4  ;;  %s1179_s26 = scalar_lea.hbm %s1347_s1, %s606_s28  ;;  %s1170_s25 = int_to_ptr.vmem [resolvable:$true] %s197_s25 }
  0x4c   : > { %s211_s13 = scalar_lea.vmem [#allocation5], %s588_s27  ;;  %s1183_s30 = scalar_lea.sflag [#allocation3], %s186_s24 }
  0x4d   : > { %s1181_s29 = sshll.u32 %s211_s13, 4  ;;  %p859_p0 = pneg %p1172_p11  ;;  %s1215_s29 = int_to_ptr.vmem [resolvable:$true] %s1181_s29 }
  0x4f   : > { %s1168_s5 = scalar_lea.hbm %s1365_s0, %s606_s28  ;;  %s862_s8 = scalar_lea.hbm %s1365_s0, 2048 }
  0x50   : > { %s857_s6 = scalar_lea.hbm %s1168_s5, 1024  ;;  %p863_p13 = scmp.lt.u32.totalorder %s1168_s5, %s1365_s0 }
  0x51   : > { %p858_p12 = scmp.ne.s32.totalorder %s1168_s5, %s857_s6  ;;  %p864_p6 = scmp.lt.u32.totalorder %s862_s8, %s857_s6 }
  0x52   : > { %p866_p3 = scmp.lt.u32.totalorder %s857_s6, %s1168_s5 }
  0x53   : > { %p860_p1 = pnand %p859_p0, %p858_p12  ;;  %p865_p10 = por %p864_p6, %p863_p13 }
  0x55   : > { %p861_p2 = pneg %p860_p1  ;;  %p867_p7 = por %p866_p3, %p865_p10 }
  0x57   : > { %p868_p9 = pnand %p867_p7, %p861_p2 }
  0x59   : > { %871 = shalt.err (!%p868_p9)
}
  0x5a   : > { %s872_s24 = scalar_lea.vmem %s1170_s25, 1024  ;;  %s1001_s11 = smov [#allocation2]  }
  0x5b   : > { %p873_p12 = scmp.ne.s32.totalorder %s1170_s25, %s872_s24  ;;  %s877_s12 = sshll.u32 %s1001_s11, 4  ;;  %s878_s12 = int_to_ptr.vmem [resolvable:$false] %s877_s12 }
  0x5c   : > { %s879_s27 = scalar_lea.vmem %s878_s12, 2048  ;;  %p880_p4 = scmp.lt.s32.totalorder %s1170_s25, %s878_s12 }
  0x5d   : > { %p875_p1 = pnand %p873_p12, %p859_p0  ;;  %p881_p13 = scmp.lt.s32.totalorder %s879_s27, %s872_s24 }
  0x5f   : > { %p876_p5 = pneg %p875_p1  ;;  %p882_p6 = por %p881_p13, %p880_p4 }
  0x61   : > { %p883_p10 = pnand %p882_p6, %p876_p5 }
  0x63   : > { %886 = shalt.err (!%p883_p10)
}
  0x64   : > { %s1367_s13 = smov 8   ;;  %s1368_s6 = smov 128  }
  0x65   : > { %749 = dma.hbm_to_vmem [thread:$0]  (!%p1172_p11), %s1168_s5, 1024, %s1170_s25, %s1183_s30, %s1368_s6, %s1368_s6, %s1367_s13  }
  0x66   : > { %s207_s8 = sand.u32 1, %s995_s18   ;;  %s887_s28 = scalar_lea.hbm %s1179_s26, 1024 }
  0x67   : > { %s1218_s9 = scalar_lea.sflag [#allocation6], %s207_s8  ;;  %p888_p4 = scmp.ne.s32.totalorder %s1179_s26, %s887_s28 }
  0x68   : > { %s892_s12 = scalar_lea.hbm %s1347_s1, 2048  ;;  %p893_p3 = scmp.lt.u32.totalorder %s1179_s26, %s1347_s1 }
  0x69   : > { %p890_p5 = pnand %p888_p4, %p859_p0  ;;  %p894_p7 = scmp.lt.u32.totalorder %s892_s12, %s887_s28 }
  0x6a   : > { %p896_p12 = scmp.lt.u32.totalorder %s887_s28, %s1179_s26 }
  0x6b   : > { %p891_p2 = pneg %p890_p5  ;;  %p895_p9 = por %p894_p7, %p893_p3 }
  0x6d   : > { %p897_p1 = por %p896_p12, %p895_p9 }
  0x6f   : > { %p898_p13 = pnand %p897_p1, %p891_p2 }
  0x71   : > { %901 = shalt.err (!%p898_p13)
}
  0x72   : > { %s902_s5 = scalar_lea.vmem %s1215_s29, 1024  ;;  %s1002_s25 = smov [#allocation5]  }
  0x73   : > { %p903_p6 = scmp.ne.s32.totalorder %s1215_s29, %s902_s5  ;;  %s907_s30 = sshll.u32 %s1002_s25, 4  ;;  %s908_s30 = int_to_ptr.vmem [resolvable:$false] %s907_s30 }
  0x74   : > { %s909_s0 = scalar_lea.vmem %s908_s30, 2048  ;;  %p910_p5 = scmp.lt.s32.totalorder %s1215_s29, %s908_s30 }
  0x75   : > { %p905_p10 = pnand %p903_p6, %p859_p0  ;;  %p911_p3 = scmp.lt.s32.totalorder %s909_s0, %s902_s5 }
  0x77   : > { %p906_p4 = pneg %p905_p10  ;;  %p912_p7 = por %p911_p3, %p910_p5 }
  0x79   : > { %p913_p9 = pnand %p912_p7, %p906_p4 }
  0x7b   : > { %916 = shalt.err (!%p913_p9)
}
  0x7c   : > { %752 = dma.hbm_to_vmem [thread:$0]  (!%p1172_p11), %s1179_s26, 1024, %s1215_s29, %s1218_s9, %s1368_s6, %s1368_s6, %s1367_s13  }
  0x7d   : > { %230 = sbr.rel (%p1071_p8) target bundleno = 413 (0x19d), region = 36  ;;  %s1250_s8 = sand.u32 (!%p1071_p8), 1, %s987_s16  }
  0x7e   : > { %s1253_s28 = sshll.u32 (!%p1071_p8), %s1250_s8, 6  ;;  %s233_s7 = scalar_lea.sflag (!%p1071_p8), [#allocation3], %s1250_s8 }
  0x7f   : > { %s1257_s24 = scalar_lea.vmem (!%p1071_p8), [#allocation2], %s1253_s28  ;;  %p1369_p0 = scmp.ne.s32.totalorder (!%p1071_p8), %s1359_s21, 0 }
  0x84   : > { %962 = dma.done.wait (%p1369_p0), %s233_s7, 1024  }
  0x85   : > { %964 = vsyncadd (%p1369_p0), %s233_s7, 4294966272  ;;  %s241_s23 = sand.u32 1, %s1052_s19   ;;  %s1265_s29 = scalar_lea.vmem [#allocation5], %s1253_s28 }
  0x86   : > { %s242_s26 = scalar_lea.sflag [#allocation6], %s241_s23 }
  0x87   : > { %966 = dma.done.wait (%p1369_p0), %s242_s26, 1024  }
  0x88   : > { %968 = vsyncadd (%p1369_p0), %s242_s26, 4294966272  ;;  %p1370_p8 = scmp.eq.s32.totalorder %s1052_s19, 0 }
  0x8a   : > { %970 = dma.done.wait (%p1370_p8), [#allocation6], 2048   ;;  %p1371_p11 = pmov %p1370_p8 }
  0x8b   : > { %p1372_p2 = pmov %p1370_p8 }
  0x8c   : > { %972 = vsyncadd (%p1371_p11), [#allocation6], 4294965248 }
  0x8d   : > { %974 = dma.done.wait (%p1372_p2), [#allocation9], 16   ;;  %p1373_p12 = pmov %p1372_p2 }
  0x8e   : > { %v302_v0 = vld [vmem:[#allocation7] sm:$0xff]  ;;  %v303_v1 = vld [vmem:[#allocation7 + $0x8] sm:$0xff]  ;;  %v304_v2 = vld [vmem:[#allocation7 + $0x10] sm:$0xff]  ;;  %s282_s21 = scalar_lea.vmem [#allocation10], %s1253_s28  ;;  %s608_s6 = sshll.u32 %s1052_s19, 10 }
  0x8f   : > { %976 = vsyncadd (%p1373_p12), [#allocation9], 4294967280  ;;  %v677_v3 = vpack.c.bf16 %v303_v1, %v302_v0  ;;  %v305_v4 = vld [vmem:[#allocation7 + $0x18] sm:$0xff]  ;;  %v306_v6 = vld [vmem:[#allocation7 + $0x20] sm:$0xff]  ;;  %s468_s13 = sshll.u32 %s282_s21, 4  ;;  %s1302_s11 = scalar_lea.hbm %s1350_s4, %s608_s6  ;;  %s1297_s13 = int_to_ptr.vmem [resolvable:$true] %s468_s13 }
  0x90   : > { %v681_v5 = vpack.c.bf16 %v305_v4, %v304_v2  ;;  %v307_v7 = vld [vmem:[#allocation7 + $0x28] sm:$0xff]  ;;  %v294_v9 = vld [vmem:[%s1257_s24] sm:$0xff]  ;;  %v308_v11 = vld [vmem:[#allocation7 + $0x30] sm:$0xff]  ;;  %s455_s12 = scalar_lea.sflag [#allocation4], %s1250_s8  ;;  %s917_s27 = scalar_lea.vmem %s1297_s13, 1024 }
  0x91   : > { %678 = vmatprep.subr.bf16.mxu0 %v677_v3  ;;  %709 = vmatprep.subr.bf16.mxu1 %v677_v3  ;;  %v685_v8 = vpack.c.bf16 %v307_v7, %v306_v6  ;;  %v298_v10 = vld [vmem:[%s1257_s24 + $0x20] sm:$0xff]  ;;  %v309_v12 = vld [vmem:[#allocation7 + $0x38] sm:$0xff]  ;;  %v311_v15 = vld [vmem:[#allocation7 + $0x48] sm:$0xff]  ;;  %p918_p1 = scmp.ne.s32.totalorder %s1297_s13, %s917_s27  ;;  %p1374_p13 = scmp.ne.s32.totalorder %s1364_s14, 0 }
  0x92   : > { %680 = vmatpush3.bf16.msra.mxu0 %v677_v3  ;;  %717 = vmatpush3.bf16.msra.mxu1 %v677_v3  ;;  %v689_v13 = vpack.c.bf16 %v309_v12, %v308_v11  ;;  %v310_v14 = vld [vmem:[#allocation7 + $0x40] sm:$0xff]  ;;  %v312_v17 = vld [vmem:[#allocation7 + $0x50] sm:$0xff]  ;;  %v313_v18 = vld [vmem:[#allocation7 + $0x58] sm:$0xff]  ;;  %s1003_s5 = smov [#allocation10]  }
  0x93   : > { %682 = vmatprep.subr.bf16.mxu0 %v681_v5  ;;  %710 = vmatprep.subr.bf16.mxu1 %v681_v5  ;;  %v693_v16 = vpack.c.bf16 %v311_v15, %v310_v14  ;;  %v697_v19 = vpack.c.bf16 %v313_v18, %v312_v17  ;;  %v314_v20 = vld [vmem:[#allocation7 + $0x60] sm:$0xff]  ;;  %v315_v21 = vld [vmem:[#allocation7 + $0x68] sm:$0xff]  ;;  %v316_v23 = vld [vmem:[#allocation7 + $0x70] sm:$0xff]  ;;  %p919_p6 = pnand %p918_p1, %p1374_p13  ;;  %s921_s25 = sshll.u32 %s1003_s5, 4  ;;  %s922_s25 = int_to_ptr.vmem [resolvable:$false] %s921_s25 }
  0x94   : > { %665 = vmatprep.mubr.f32.mxu0 %v294_v9  ;;  %671 = vmatprep.mubr.f32.mxu1 %v298_v10  ;;  %v701_v22 = vpack.c.bf16 %v315_v21, %v314_v20  ;;  %v317_v24 = vld [vmem:[#allocation7 + $0x78] sm:$0xff]  ;;  %v295_v26 = vld [vmem:[%s1257_s24 + $0x8] sm:$0xff]  ;;  %v296_v28 = vld [vmem:[%s1257_s24 + $0x10] sm:$0xff]  ;;  %s923_s30 = scalar_lea.vmem %s922_s25, 2048  ;;  %p924_p4 = scmp.lt.s32.totalorder %s1297_s13, %s922_s25 }
  0x95   : > { %v705_v25 = vpack.c.bf16 %v317_v24, %v316_v23  ;;  %v299_v27 = vld [vmem:[%s1257_s24 + $0x28] sm:$0xff]  ;;  %v300_v29 = vld [vmem:[%s1257_s24 + $0x30] sm:$0xff]  ;;  %v297_v30 = vld [vmem:[%s1257_s24 + $0x18] sm:$0xff]  ;;  %p920_p10 = pneg %p919_p6  ;;  %p925_p5 = scmp.lt.s32.totalorder %s923_s30, %s917_s27 }
  0x96   : > { %684 = vmatpush3.bf16.msra.mxu0 %v681_v5  ;;  %718 = vmatpush3.bf16.msra.mxu1 %v681_v5  ;;  %v301_v31 = vld [vmem:[%s1257_s24 + $0x38] sm:$0xff]  ;;  %v287_v32 = vld [vmem:[%s1265_s29 + $0x8] sm:$0xff]  ;;  %v286_v34 = vld [vmem:[%s1265_s29] sm:$0xff] }
  0x97   : > { %686 = vmatprep.subr.bf16.mxu0 %v685_v8  ;;  %711 = vmatprep.subr.bf16.mxu1 %v685_v8  ;;  %v291_v33 = vld [vmem:[%s1265_s29 + $0x28] sm:$0xff]  ;;  %v290_v35 = vld [vmem:[%s1265_s29 + $0x20] sm:$0xff]  ;;  %v289_v45 = vld [vmem:[%s1265_s29 + $0x18] sm:$0xff]  ;;  %p926_p3 = por %p925_p5, %p924_p4 }
  0x98   : > { %v600_v37 = vld [vmem:[#allocation8] ss:$0 sm:$0xff]  ;;  %v293_v46 = vld [vmem:[%s1265_s29 + $0x38] sm:$0xff]  ;;  %v288_v49 = vld [vmem:[%s1265_s29 + $0x10] sm:$0xff] }
  0x99   : > { %v292_v50 = vld [vmem:[%s1265_s29 + $0x30] sm:$0xff]  ;;  %p927_p7 = pnand %p926_p3, %p920_p10 }
  0x9a   : > { %688 = vmatpush3.bf16.msra.mxu0 %v685_v8  ;;  %719 = vmatpush3.bf16.msra.mxu1 %v685_v8 }
  0x9b   : > { %690 = vmatprep.subr.bf16.mxu0 %v689_v13  ;;  %712 = vmatprep.subr.bf16.mxu1 %v689_v13 }
  0x9e   : > { %692 = vmatpush3.bf16.msra.mxu0 %v689_v13  ;;  %720 = vmatpush3.bf16.msra.mxu1 %v689_v13 }
  0x9f   : > { %694 = vmatprep.subr.bf16.mxu0 %v693_v16  ;;  %713 = vmatprep.subr.bf16.mxu1 %v693_v16 }
  0xa2   : > { %696 = vmatpush3.bf16.msra.mxu0 %v693_v16  ;;  %721 = vmatpush3.bf16.msra.mxu1 %v693_v16 }
  0xa3   : > { %698 = vmatprep.subr.bf16.mxu0 %v697_v19  ;;  %714 = vmatprep.subr.bf16.mxu1 %v697_v19 }
  0xa6   : > { %700 = vmatpush3.bf16.msra.mxu0 %v697_v19  ;;  %722 = vmatpush3.bf16.msra.mxu1 %v697_v19 }
  0xa7   : > { %702 = vmatprep.subr.bf16.mxu0 %v701_v22  ;;  %715 = vmatprep.subr.bf16.mxu1 %v701_v22 }
  0xaa   : > { %704 = vmatpush3.bf16.msra.mxu0 %v701_v22  ;;  %723 = vmatpush3.bf16.msra.mxu1 %v701_v22 }
  0xab   : > { %706 = vmatprep.subr.bf16.mxu0 %v705_v25  ;;  %716 = vmatprep.subr.bf16.mxu1 %v705_v25 }
  0xae   : > { %708 = vmatpush3.bf16.msra.mxu0 %v705_v25  ;;  %724 = vmatpush3.bf16.msra.mxu1 %v705_v25 }
  0xb1   : > { %666 = vmatmul.mubr.f32.vlgmr.msra.gmra.mrb[0].mxu0 %v295_v26  ;;  %672 = vmatmul.mubr.f32.vlgmr.msra.gmra.mrb[0].mxu1 %v299_v27 }
  0xb2   : > { %668 = vmatprep.mubr.f32.mxu0 %v296_v28  ;;  %674 = vmatprep.mubr.f32.mxu1 %v300_v29 }
  0xb5   : > { %669 = vmatmul.mubr.f32.gmra.mrb[2].mxu0 %v297_v30  ;;  %675 = vmatmul.mubr.f32.gmra.mrb[2].mxu1 %v301_v31 }
 0x184   : > { %v667_v36 = vpop.f32.mrb[0].mxu0  ;;  %v673_v38 = vpop.f32.mrb[0].mxu1 }
 0x185   : > { %v424_v39 = vadd.f32 %v667_v36, %v287_v32  ;;  %v428_v40 = vadd.f32 %v673_v38, %v291_v33  ;;  %v384_v41 = vpop.f32.mrb[1].mxu0  ;;  %v404_v42 = vpop.f32.mrb[1].mxu1 }
 0x186   : > { %v423_v43 = vadd.f32 %v384_v41, %v286_v34  ;;  %v427_v44 = vadd.f32 %v404_v42, %v290_v35 }
 0x187   : > { %v439_v47 = vadd.f32 %v600_v37, %v424_v39  ;;  %v443_v48 = vadd.f32 %v600_v37, %v428_v40 }
 0x188   : > { %v438_v51 = vadd.f32 %v600_v37, %v423_v43  ;;  %v442_v52 = vadd.f32 %v600_v37, %v427_v44  ;;  %v670_v53 = vpop.f32.mrb[2].mxu0  ;;  %v676_v54 = vpop.f32.mrb[2].mxu1 }
 0x189   : > { %447 = vst [vmem:[%s282_s21 + $0x8] sm:$0xff] %v439_v47  ;;  %451 = vst [vmem:[%s282_s21 + $0x28] sm:$0xff] %v443_v48  ;;  %v426_v55 = vadd.f32 %v670_v53, %v289_v45  ;;  %v430_v56 = vadd.f32 %v676_v54, %v293_v46  ;;  %v394_v57 = vpop.f32.mrb[3].mxu0  ;;  %v414_v58 = vpop.f32.mrb[3].mxu1 }
 0x18a   : > { %446 = vst [vmem:[%s282_s21] sm:$0xff] %v438_v51  ;;  %450 = vst [vmem:[%s282_s21 + $0x20] sm:$0xff] %v442_v52  ;;  %v425_v59 = vadd.f32 %v394_v57, %v288_v49  ;;  %v429_v60 = vadd.f32 %v414_v58, %v292_v50 }
 0x18b   : > { %v441_v61 = vadd.f32 %v600_v37, %v426_v55  ;;  %v445_v62 = vadd.f32 %v600_v37, %v430_v56 }
 0x18c   : > { %v440_v63 = vadd.f32 %v600_v37, %v425_v59  ;;  %v444_v0 = vadd.f32 %v600_v37, %v429_v60 }
 0x18d   : > { %449 = vst [vmem:[%s282_s21 + $0x18] sm:$0xff] %v441_v61  ;;  %453 = vst [vmem:[%s282_s21 + $0x38] sm:$0xff] %v445_v62 }
 0x18e   : > { %448 = vst [vmem:[%s282_s21 + $0x10] sm:$0xff] %v440_v63  ;;  %452 = vst [vmem:[%s282_s21 + $0x30] sm:$0xff] %v444_v0 }
 0x18f   : > { %930 = shalt.err (!%p927_p7)
}
 0x190   : > { %s931_s0 = scalar_lea.hbm %s1302_s11, 1024  ;;  %s935_s24 = scalar_lea.hbm %s1350_s4, 2048 }
 0x191   : > { %p932_p9 = scmp.ne.s32.totalorder %s1302_s11, %s931_s0  ;;  %p936_p11 = scmp.lt.u32.totalorder %s1302_s11, %s1350_s4 }
 0x192   : > { %p937_p2 = scmp.lt.u32.totalorder %s935_s24, %s931_s0  ;;  %p939_p1 = scmp.lt.u32.totalorder %s931_s0, %s1302_s11 }
 0x193   : > { %p933_p0 = pnand %p932_p9, %p1374_p13 }
 0x194   : > { %p938_p12 = por %p937_p2, %p936_p11 }
 0x195   : > { %p934_p8 = pneg %p933_p0 }
 0x196   : > { %p940_p6 = por %p939_p1, %p938_p12 }
 0x198   : > { %p941_p10 = pnand %p940_p6, %p934_p8 }
 0x19a   : > { %944 = shalt.err (!%p941_p10)
}
 0x19b   : > { %s1004_s29 = smov 128   ;;  %s1005_s21 = smov 8  }
 0x19c   : > { %737 = dma.vmem_to_hbm [thread:$0]  (%p1374_p13), %s1297_s13, 1024, %s1302_s11, %s455_s12, %s1004_s29, %s1004_s29, %s1005_s21  }
 0x19d PF: > { %s483_s6 = sand.u32 1, %s983_s15   ;;  %p1375_p4 = scmp.ne.s32.totalorder %s1360_s22, 0 }
 0x19e   : > { %p1376_p5 = scmp.ge.s32.totalorder %s995_s18, 2  ;;  %s484_s9 = scalar_lea.sflag [#allocation4], %s483_s6 }
 0x1a0   : > { %p754_p3 = pnand %p1376_p5, %p1375_p4 }
 0x1a2   : > { %978 = dma.done.wait (!%p754_p3), %s484_s9, 1024  }
 0x1a3   : > { %980 = vsyncadd (!%p754_p3), %s484_s9, 4294966272  ;;  %p21_p7 = scmp.ge.s32.totalorder %s1145_s10, 4   ;;  %s1377_s15 = smov %s987_s16 }
 0x1a4   : > { %s1378_s16 = smov %s991_s17  ;;  %s1379_s17 = smov %s1161_s20 }
 0x1a5   : > { %s1380_s18 = smov %s1145_s10  ;;  %23 = sbr.rel (!%p21_p7) target bundleno = 10 (0xa), region = 102 }
 0x1ac   :  { %489 = vsyncpa [#allocation3], 1 }
 0x1ad   :  { %491 = vsyncpa [#allocation3 + $0x1], 1 }
 0x1ae   :  { %492 = vsyncpa [#allocation6], 1 }
 0x1af   :  { %494 = vsyncpa [#allocation6 + $0x1], 1 }
 0x1b0   :  { %495 = vsyncpa [#allocation9], 1 }
 0x1b1   :  { %496 = vsyncpa [#allocation4], 1 }
 0x1b2   :  { %498 = vsyncpa [#allocation4 + $0x1], 1 }

// kernel: fno_forward.19
= control target key start
LH: loop header
LB: loop body
LE: loop exit
PB: predicated region body
PF: predicated region fallthrough
CT: control target
= control target key end

     0   :  { %10 = vsyncpa [#allocation3], 0  ;;  %s4848_s0 = inlined_call_operand.hbm [shape: f32[128,128], index: 0, kind: input, shape index: {}]   ;;  %s4849_s1 = inlined_call_operand.hbm [shape: f32[128,512], index: 1, kind: input, shape index: {}]   ;;  %s4850_s2 = inlined_call_operand.hbm [shape: f32[1,512], index: 2, kind: input, shape index: {}]   ;;  %s4851_s3 = inlined_call_operand.hbm [shape: f32[512,4], index: 3, kind: input, shape index: {}]   ;;  %s4852_s4 = inlined_call_operand.hbm [shape: f32[1,4], index: 4, kind: input, shape index: {}]   ;;  %s4853_s5 = inlined_call_operand.hbm [shape: f32[128,4], index: 5, kind: output, shape index: {}]  }
   0x1   :  { %12 = vsyncpa [#allocation3 + $0x1], 0 }
   0x2   :  { %13 = vsyncpa [#allocation6], 0 }
   0x3   :  { %14 = vsyncpa [#allocation9], 0 }
   0x4   :  { %15 = vsyncpa [#allocation4], 0 }
   0x5   :  { %17 = vsyncpa [#allocation4 + $0x1], 0  ;;  %s3668_s18 = smov 0   ;;  %s3670_s19 = smov 0  }
   0x6   :  { %s3672_s20 = smov 0   ;;  %s3674_s21 = smov 0  }
   0x7 LB: > { %s3689_s22 = sadd.s32 4294967295, %s3623_s21   ;;  %s2332_s23 = sadd.s32 4294967294, %s3623_s21   ;;  %s3623_s21 = sphi %s3674_s21, %s5050_s21   ;;  %s3619_s20 = sphi %s3672_s20, %s5049_s20   ;;  %s3615_s19 = sphi %s3670_s19, %s5048_s19   ;;  %s3611_s18 = sphi %s3668_s18, %s5047_s18  }
   0x8   : > { %p43_p0 = scmp.ne.s32.totalorder %s3615_s19, %s3611_s18  ;;  %p4854_p1 = scmp.eq.s32.totalorder %s3689_s22, 0 }
   0x9   : > { %p157_p3 = scmp.eq.s32.totalorder %s2332_s23, 1  ;;  %p2333_p5 = scmp.ge.s32.totalorder %s3623_s21, 1 }
   0xa   : > { %p3698_p4 = por %p4854_p1, %p43_p0  ;;  %p164_p7 = scmp.lt.s32.totalorder %s3623_s21, 3 }
   0xb   : > { %p3703_p6 = por %p157_p3, %p43_p0  ;;  %s3625_s27 = smov [#allocation5]  }
   0xc   : > { %s4886_s24 = scalar_select %p3698_p4, 1, 0 }
   0xd   : > { %s4887_s25 = scalar_select %p3703_p6, 1, 0 }
   0xe   : > { %p3708_p8 = pnand %p2333_p5, %p164_p7  ;;  %s176_s28 = sshll.u32 %s3625_s27, 4  ;;  %s3712_s28 = int_to_ptr.vmem [resolvable:$true] %s176_s28 }
   0xf   : > { %s3626_s30 = smov [#allocation8]   ;;  %s3407_s9 = scalar_lea.hbm %s4849_s1, 8192 }
  0x10   : > { %s4888_s26 = scalar_select %p3708_p8, 1, 0 }
  0x11   : > { %p3205_p9 = pneg %p3708_p8  ;;  %s200_s6 = sshll.u32 %s3626_s30, 4  ;;  %s3723_s6 = int_to_ptr.vmem [resolvable:$true] %s200_s6 }
  0x12   : > { %p3408_p12 = scmp.ne.s32.totalorder %s4849_s1, %s3407_s9  ;;  %p3414_p5 = scmp.lt.u32.totalorder %s3407_s9, %s4849_s1 }
  0x13   : > { %p3719_p11 = pnand %p3205_p9, %p4854_p1 }
  0x15   : > { %p3733_p13 = pneg %p3719_p11 }
  0x17   : > { %p3410_p0 = pnand %p3733_p13, %p3408_p12 }
  0x19   : > { %p3411_p3 = pneg %p3410_p0 }
  0x1b   : > { %p3416_p7 = pnand %p3414_p5, %p3411_p3 }
  0x1d   : > { %3419 = shalt.err (!%p3416_p7)
}
  0x1e   : > { %s3420_s15 = scalar_lea.vmem %s3712_s28, 8192  ;;  %p3428_p2 = scmp.lt.s32.totalorder %s3712_s28, %s3712_s28 }
  0x1f   : > { %p3421_p9 = scmp.ne.s32.totalorder %s3712_s28, %s3420_s15  ;;  %p3429_p6 = scmp.lt.s32.totalorder %s3420_s15, %s3420_s15 }
  0x21   : > { %p3423_p10 = pnand %p3421_p9, %p3733_p13  ;;  %p3430_p12 = por %p3429_p6, %p3428_p2 }
  0x23   : > { %p3424_p1 = pneg %p3423_p10 }
  0x25   : > { %p3431_p0 = pnand %p3430_p12, %p3424_p1 }
  0x27   : > { %3434 = shalt.err (!%p3431_p0)
}
  0x28   : > { %s3627_s16 = smov 512   ;;  %s3628_s17 = smov 32  }
  0x29   : > { %3208 = dma.hbm_to_vmem [thread:$0]  (!%p3719_p11), %s4849_s1, 8192, %s3712_s28, [#allocation6], %s3627_s16, %s3627_s16, %s3628_s17  }
  0x2a   : > { %s3435_s8 = scalar_lea.hbm %s4851_s3, 8192 }
  0x2b   : > { %p3436_p2 = scmp.ne.s32.totalorder %s4851_s3, %s3435_s8  ;;  %p3442_p10 = scmp.lt.u32.totalorder %s3435_s8, %s4851_s3 }
  0x2d   : > { %p3438_p1 = pnand %p3436_p2, %p3733_p13 }
  0x2f   : > { %p3439_p6 = pneg %p3438_p1 }
  0x31   : > { %p3444_p3 = pnand %p3442_p10, %p3439_p6 }
  0x33   : > { %3447 = shalt.err (!%p3444_p3)
}
  0x34   : > { %s3448_s28 = scalar_lea.vmem %s3723_s6, 8192  ;;  %p3456_p12 = scmp.lt.s32.totalorder %s3723_s6, %s3723_s6 }
  0x35   : > { %p3449_p5 = scmp.ne.s32.totalorder %s3723_s6, %s3448_s28  ;;  %p3457_p0 = scmp.lt.s32.totalorder %s3448_s28, %s3448_s28 }
  0x37   : > { %p3451_p7 = pnand %p3449_p5, %p3733_p13  ;;  %p3458_p2 = por %p3457_p0, %p3456_p12 }
  0x39   : > { %p3452_p9 = pneg %p3451_p7 }
  0x3b   : > { %p3459_p1 = pnand %p3458_p2, %p3452_p9 }
  0x3d   : > { %3462 = shalt.err (!%p3459_p1)
}
  0x3e   : > { %s3629_s14 = smov 128   ;;  %s3630_s15 = smov 8  }
  0x3f   : > { %3214 = dma.hbm_to_vmem [thread:$0]  (!%p3719_p11), %s4851_s3, 8192, %s3723_s6, [#allocation9], %s3629_s14, %s3629_s14, %s3630_s15  }
  0x40   : > { %s3631_s23 = smov [#allocation7]   ;;  %s3632_s30 = smov [#allocation10]  }
  0x41   : > { %s190_s27 = sshll.u32 %s3631_s23, 4  ;;  %s214_s7 = sshll.u32 %s3632_s30, 4  ;;  %s191_s27 = int_to_ptr.vmem [resolvable:$true] %s190_s27  ;;  %s3780_s7 = int_to_ptr.vmem [resolvable:$true] %s214_s7 }
  0x42   : > { %s3463_s10 = scalar_lea.hbm %s4850_s2, 64 }
  0x43   : > { %p3464_p6 = scmp.ne.s32.totalorder %s4850_s2, %s3463_s10  ;;  %p3470_p5 = scmp.lt.u32.totalorder %s3463_s10, %s4850_s2 }
  0x45   : > { %p3466_p10 = pnand %p3464_p6, %p3733_p13 }
  0x47   : > { %p3467_p3 = pneg %p3466_p10 }
  0x49   : > { %p3472_p7 = pnand %p3470_p5, %p3467_p3 }
  0x4b   : > { %3475 = shalt.err (!%p3472_p7)
}
  0x4c   : > { %s3476_s16 = scalar_lea.vmem %s191_s27, 64  ;;  %p3484_p2 = scmp.lt.s32.totalorder %s191_s27, %s191_s27 }
  0x4d   : > { %p3477_p9 = scmp.ne.s32.totalorder %s191_s27, %s3476_s16  ;;  %p3485_p1 = scmp.lt.s32.totalorder %s3476_s16, %s3476_s16 }
  0x4f   : > { %p3479_p12 = pnand %p3477_p9, %p3733_p13  ;;  %p3486_p4 = por %p3485_p1, %p3484_p2 }
  0x51   : > { %p3480_p0 = pneg %p3479_p12 }
  0x53   : > { %p3487_p8 = pnand %p3486_p4, %p3480_p0 }
  0x55   : > { %3490 = shalt.err (!%p3487_p8)
}
  0x56   : > { %3211 = dma.hbm_to_vmem [thread:$0]  (!%p3719_p11), %s4850_s2, 64, %s191_s27, [#allocation6]  }
  0x57   : > { %s3491_s9 = scalar_lea.hbm %s4852_s4, 16 }
  0x58   : > { %p3492_p6 = scmp.ne.s32.totalorder %s4852_s4, %s3491_s9  ;;  %p3498_p4 = scmp.lt.u32.totalorder %s3491_s9, %s4852_s4 }
  0x5a   : > { %p3494_p10 = pnand %p3492_p6, %p3733_p13 }
  0x5c   : > { %p3495_p3 = pneg %p3494_p10 }
  0x5e   : > { %p3500_p8 = pnand %p3498_p4, %p3495_p3 }
  0x60   : > { %3503 = shalt.err (!%p3500_p8)
}
  0x61   : > { %s3504_s27 = scalar_lea.vmem %s3780_s7, 16  ;;  %s3511_s6 = scalar_lea.vmem %s3780_s7, 32 }
  0x62   : > { %p3505_p5 = scmp.ne.s32.totalorder %s3780_s7, %s3504_s27  ;;  %p3512_p12 = scmp.lt.s32.totalorder %s3780_s7, %s3780_s7 }
  0x63   : > { %p3513_p0 = scmp.lt.s32.totalorder %s3511_s6, %s3504_s27 }
  0x64   : > { %p3507_p7 = pnand %p3505_p5, %p3733_p13 }
  0x65   : > { %p3514_p2 = por %p3513_p0, %p3512_p12 }
  0x66   : > { %p3508_p9 = pneg %p3507_p7 }
  0x68   : > { %p3515_p1 = pnand %p3514_p2, %p3508_p9 }
  0x6a   : > { %3518 = shalt.err (!%p3515_p1)
}
  0x6b   : > { %3217 = dma.hbm_to_vmem [thread:$0]  (!%p3719_p11), %s4852_s4, 16, %s3780_s7, [#allocation9]  }
  0x6c   : > { %s3825_s12 = sadd.s32 1, %s3623_s21   ;;  %s30_s23 = sadd.s32 1, %s3619_s20 }
  0x6d   : > { %s27_s29 = ssub.s32 %s3623_s21, %s3825_s12  ;;  %p37_p6 = scmp.ne.s32.totalorder %s3619_s20, %s3615_s19 }
  0x6e   : > { %p28_p13 = scmp.eq.s32.totalorder %s27_s29, 0  ;;  %p38_p10 = scmp.eq.s32.totalorder %s3623_s21, 0 }
  0x6f   : > { %p4891_p4 = scmp.eq.s32.totalorder %s3689_s22, 1  ;;  %p3230_p5 = scmp.lt.s32.totalorder %s3623_s21, 2 }
  0x70   : > { %s3834_s30 = scalar_select %p28_p13, %s3619_s20, %s30_s23  }
  0x71   : > { %p39_p3 = por %p38_p10, %p37_p6  ;;  %p3838_p8 = por %p4891_p4, %p37_p6 }
  0x72   : > { %s225_s9 = sand.u32 1, %s3619_s20   ;;  %s2359_s7 = sshll.u32 %s3623_s21, 10 }
  0x73   : > { %s2339_s10 = sshll.u32 %s225_s9, 6  ;;  %s3848_s28 = scalar_lea.hbm %s4848_s0, %s2359_s7 }
  0x74   : > { %s229_s27 = scalar_lea.vmem [#allocation2], %s2339_s10  ;;  %p3852_p11 = pnand %p3230_p5, %p39_p3 }
  0x75   : > { %s236_s6 = sshll.u32 %s229_s27, 4  ;;  %s3856_s17 = scalar_lea.sflag [#allocation3], %s225_s9  ;;  %s3850_s6 = int_to_ptr.vmem [resolvable:$true] %s236_s6 }
  0x76   : > { %s3519_s29 = scalar_lea.hbm %s3848_s28, 1024  ;;  %p3521_p9 = pneg %p3852_p11 }
  0x77   : > { %p3520_p7 = scmp.ne.s32.totalorder %s3848_s28, %s3519_s29  ;;  %s3524_s7 = scalar_lea.hbm %s4848_s0, 2048 }
  0x78   : > { %p3525_p2 = scmp.lt.u32.totalorder %s3848_s28, %s4848_s0  ;;  %p3526_p1 = scmp.lt.u32.totalorder %s3524_s7, %s3519_s29 }
  0x79   : > { %p3522_p12 = pnand %p3521_p9, %p3520_p7  ;;  %p3528_p6 = scmp.lt.u32.totalorder %s3519_s29, %s3848_s28 }
  0x7a   : > { %p3527_p13 = por %p3526_p1, %p3525_p2 }
  0x7b   : > { %p3523_p0 = pneg %p3522_p12 }
  0x7c   : > { %p3529_p10 = por %p3528_p6, %p3527_p13 }
  0x7e   : > { %p3530_p3 = pnand %p3529_p10, %p3523_p0 }
  0x80   : > { %3533 = shalt.err (!%p3530_p3)
}
  0x81   : > { %s3534_s9 = scalar_lea.vmem %s3850_s6, 1024  ;;  %s3633_s27 = smov [#allocation2]  }
  0x82   : > { %p3535_p4 = scmp.ne.s32.totalorder %s3850_s6, %s3534_s9  ;;  %s3539_s23 = sshll.u32 %s3633_s27, 4  ;;  %s3540_s23 = int_to_ptr.vmem [resolvable:$false] %s3539_s23 }
  0x83   : > { %s3541_s10 = scalar_lea.vmem %s3540_s23, 2048  ;;  %p3542_p12 = scmp.lt.s32.totalorder %s3850_s6, %s3540_s23 }
  0x84   : > { %p3537_p5 = pnand %p3535_p4, %p3521_p9  ;;  %p3543_p2 = scmp.lt.s32.totalorder %s3541_s10, %s3534_s9 }
  0x86   : > { %p3538_p7 = pneg %p3537_p5  ;;  %p3544_p1 = por %p3543_p2, %p3542_p12 }
  0x88   : > { %p3545_p13 = pnand %p3544_p1, %p3538_p7 }
  0x8a   : > { %3548 = shalt.err (!%p3545_p13)
}
  0x8b   : > { %3221 = dma.hbm_to_vmem [thread:$0]  (!%p3852_p11), %s3848_s28, 1024, %s3850_s6, %s3856_s17, %s3629_s14, %s3629_s14, %s3630_s15  }
  0x8c   : > { %p4894_p9 = scmp.ne.s32.totalorder %s4888_s26, 0 }
  0x8e   : > { %248 = sbr.rel (%p4894_p9) target bundleno = 873 (0x369), region = 40 }
  0x95   : > { %s3890_s29 = sand.u32 1, %s3615_s19   ;;  %p4895_p0 = scmp.ne.s32.totalorder %s4886_s24, 0 }
  0x96   : > { %s2343_s7 = sshll.u32 %s3890_s29, 6  ;;  %s251_s11 = scalar_lea.sflag [#allocation3], %s3890_s29 }
  0x97   : > { %s3896_s16 = scalar_lea.vmem [#allocation2], %s2343_s7 }
  0x98   : > { %3594 = dma.done.wait (%p4895_p0), %s251_s11, 1024  }
  0x99   : > { %3596 = vsyncadd (%p4895_p0), %s251_s11, 4294966272  ;;  %p4896_p11 = scmp.eq.s32.totalorder %s3689_s22, 0 }
  0x9b   : > { %3598 = dma.done.wait (%p4896_p11), [#allocation6], 8256   ;;  %p4897_p6 = pmov %p4896_p11 }
  0x9d   : > { %3600 = vsyncadd (%p4897_p6), [#allocation6], 4294959040  ;;  %p4898_p10 = pmov %p4897_p6 }
  0x9e   : > { %p4899_p3 = pmov %p4897_p6 }
  0x9f   : > { %3602 = dma.done.wait (%p4898_p10), [#allocation9], 8208  }
  0xa0   : > { %3604 = vsyncadd (%p4899_p3), [#allocation9], 4294959088  ;;  %v307_v0 = vld [vmem:[#allocation5] sm:$0xff]  ;;  %v667_v25 = vld [vmem:[#allocation5 + $0x8] sm:$0xff]  ;;  %s296_s24 = scalar_lea.vmem [#allocation11], %s2343_s7  ;;  %s2360_s26 = sshll.u32 %s3689_s22, 10 }
  0xa1   : > { %v308_v1 = vld [vmem:[#allocation5 + $0x20] sm:$0xff]  ;;  %v668_v26 = vld [vmem:[#allocation5 + $0x28] sm:$0xff]  ;;  %v3918_v31 = vld [vmem:[%s3896_s16 + $0x10] sm:$0xff]  ;;  %s2221_s14 = sshll.u32 %s296_s24, 4  ;;  %s4800_s6 = scalar_lea.hbm %s4853_s5, %s2360_s26  ;;  %s4802_s14 = int_to_ptr.vmem [resolvable:$true] %s2221_s14 }
  0xa2   : > { %v309_v2 = vld [vmem:[#allocation5 + $0x40] sm:$0xff]  ;;  %v2905_v3 = vpack.c.bf16 %v308_v1, %v307_v0  ;;  %v2937_v27 = vpack.c.bf16 %v668_v26, %v667_v25  ;;  %v669_v28 = vld [vmem:[#allocation5 + $0x48] sm:$0xff]  ;;  %v3923_v35 = vld [vmem:[%s3896_s16 + $0x18] sm:$0xff]  ;;  %s2208_s22 = scalar_lea.sflag [#allocation4], %s3890_s29  ;;  %s3549_s17 = scalar_lea.vmem %s4802_s14, 1024 }
  0xa3   : > { %v310_v4 = vld [vmem:[#allocation5 + $0x60] sm:$0xff]  ;;  %v670_v29 = vld [vmem:[#allocation5 + $0x68] sm:$0xff]  ;;  %v3934_v41 = vld [vmem:[%s3896_s16 + $0x30] sm:$0xff]  ;;  %p3550_p4 = scmp.ne.s32.totalorder %s4802_s14, %s3549_s17  ;;  %s3635_s13 = smov [#allocation11]  }
  0xa4   : > { %v2909_v5 = vpack.c.bf16 %v310_v4, %v309_v2  ;;  %v311_v6 = vld [vmem:[#allocation5 + $0x80] sm:$0xff]  ;;  %2906 = vmatprep.subr.bf16.mxu1 %v2905_v3  ;;  %v3915_v30 = vld [vmem:[%s3896_s16 + $0x8] sm:$0xff]  ;;  %v2941_v32 = vpack.c.bf16 %v670_v29, %v669_v28  ;;  %v3939_v45 = vld [vmem:[%s3896_s16 + $0x38] sm:$0xff]  ;;  %s3553_s9 = sshll.u32 %s3635_s13, 4  ;;  %s3554_s9 = int_to_ptr.vmem [resolvable:$false] %s3553_s9 }
  0xa5   : > { %v312_v7 = vld [vmem:[#allocation5 + $0xa0] sm:$0xff]  ;;  %2908 = vmatpush3.bf16.msra.mxu1 %v2905_v3  ;;  %v671_v33 = vld [vmem:[#allocation5 + $0x88] sm:$0xff]  ;;  %v1237_v56 = vld [vmem:[#allocation5 + $0x10] sm:$0xff]  ;;  %p3551_p5 = pnand %p3550_p4, %p3838_p8  ;;  %s3555_s27 = scalar_lea.vmem %s3554_s9, 2048 }
  0xa6   : > { %2910 = vmatprep.subr.bf16.mxu1 %v2909_v5  ;;  %v2913_v8 = vpack.c.bf16 %v312_v7, %v311_v6  ;;  %v3911_v9 = vld [vmem:[%s3896_s16] sm:$0xff]  ;;  %v672_v34 = vld [vmem:[#allocation5 + $0xa8] sm:$0xff]  ;;  %v1238_v57 = vld [vmem:[#allocation5 + $0x30] sm:$0xff]  ;;  %p3556_p12 = scmp.lt.s32.totalorder %s4802_s14, %s3554_s9  ;;  %p3557_p2 = scmp.lt.s32.totalorder %s3555_s27, %s3549_s17 }
  0xa7   : > { %v313_v10 = vld [vmem:[#allocation5 + $0xc0] sm:$0xff]  ;;  %2585 = vmatprep.mubr.f32.mxu1 %v3911_v9  ;;  %v2945_v37 = vpack.c.bf16 %v672_v34, %v671_v33  ;;  %v673_v38 = vld [vmem:[#allocation5 + $0xc8] sm:$0xff]  ;;  %v3033_v58 = vpack.c.bf16 %v1238_v57, %v1237_v56  ;;  %v1239_v59 = vld [vmem:[#allocation5 + $0x50] sm:$0xff]  ;;  %p3552_p7 = pneg %p3551_p5 }
  0xa8   : > { %v314_v11 = vld [vmem:[#allocation5 + $0xe0] sm:$0xff]  ;;  %v674_v39 = vld [vmem:[#allocation5 + $0xe8] sm:$0xff]  ;;  %v1240_v60 = vld [vmem:[#allocation5 + $0x70] sm:$0xff]  ;;  %p3558_p1 = por %p3557_p2, %p3556_p12 }
  0xa9   : > { %2912 = vmatpush3.bf16.msra.mxu1 %v2909_v5  ;;  %v2917_v12 = vpack.c.bf16 %v314_v11, %v313_v10  ;;  %v315_v13 = vld [vmem:[#allocation5 + $0x100] sm:$0xff]  ;;  %v3931_v40 = vld [vmem:[%s3896_s16 + $0x28] sm:$0xff]  ;;  %v2949_v42 = vpack.c.bf16 %v674_v39, %v673_v38  ;;  %v3037_v61 = vpack.c.bf16 %v1240_v60, %v1239_v59  ;;  %v1241_v62 = vld [vmem:[#allocation5 + $0x90] sm:$0xff] }
  0xaa   : > { %2914 = vmatprep.subr.bf16.mxu1 %v2913_v8  ;;  %v316_v14 = vld [vmem:[#allocation5 + $0x120] sm:$0xff]  ;;  %v675_v43 = vld [vmem:[#allocation5 + $0x108] sm:$0xff]  ;;  %v1242_v63 = vld [vmem:[#allocation5 + $0xb0] sm:$0xff]  ;;  %p3559_p13 = pnand %p3558_p1, %p3552_p7 }
  0xab   : > { %v2921_v15 = vpack.c.bf16 %v316_v14, %v315_v13  ;;  %v317_v16 = vld [vmem:[#allocation5 + $0x140] sm:$0xff]  ;;  %v676_v44 = vld [vmem:[#allocation5 + $0x128] sm:$0xff]  ;;  %v3041_v0 = vpack.c.bf16 %v1242_v63, %v1241_v62  ;;  %v1243_v1 = vld [vmem:[#allocation5 + $0xd0] sm:$0xff] }
  0xac   : > { %v318_v17 = vld [vmem:[#allocation5 + $0x160] sm:$0xff]  ;;  %v2953_v46 = vpack.c.bf16 %v676_v44, %v675_v43  ;;  %v677_v47 = vld [vmem:[#allocation5 + $0x148] sm:$0xff]  ;;  %v1244_v2 = vld [vmem:[#allocation5 + $0xf0] sm:$0xff] }
  0xad   : > { %2916 = vmatpush3.bf16.msra.mxu1 %v2913_v8  ;;  %v2925_v18 = vpack.c.bf16 %v318_v17, %v317_v16  ;;  %v319_v19 = vld [vmem:[#allocation5 + $0x180] sm:$0xff]  ;;  %v678_v48 = vld [vmem:[#allocation5 + $0x168] sm:$0xff]  ;;  %v3045_v3 = vpack.c.bf16 %v1244_v2, %v1243_v1  ;;  %v1245_v4 = vld [vmem:[#allocation5 + $0x110] sm:$0xff] }
  0xae   : > { %2918 = vmatprep.subr.bf16.mxu1 %v2917_v12  ;;  %v320_v20 = vld [vmem:[#allocation5 + $0x1a0] sm:$0xff]  ;;  %v2957_v49 = vpack.c.bf16 %v678_v48, %v677_v47  ;;  %v679_v50 = vld [vmem:[#allocation5 + $0x188] sm:$0xff]  ;;  %v1246_v5 = vld [vmem:[#allocation5 + $0x130] sm:$0xff] }
  0xaf   : > { %v2929_v21 = vpack.c.bf16 %v320_v20, %v319_v19  ;;  %v321_v22 = vld [vmem:[#allocation5 + $0x1c0] sm:$0xff]  ;;  %v680_v51 = vld [vmem:[#allocation5 + $0x1a8] sm:$0xff]  ;;  %v3049_v6 = vpack.c.bf16 %v1246_v5, %v1245_v4  ;;  %v1247_v7 = vld [vmem:[#allocation5 + $0x150] sm:$0xff] }
  0xb0   : > { %v322_v23 = vld [vmem:[#allocation5 + $0x1e0] sm:$0xff]  ;;  %v2961_v52 = vpack.c.bf16 %v680_v51, %v679_v50  ;;  %v681_v53 = vld [vmem:[#allocation5 + $0x1c8] sm:$0xff]  ;;  %v1248_v8 = vld [vmem:[#allocation5 + $0x170] sm:$0xff] }
  0xb1   : > { %2920 = vmatpush3.bf16.msra.mxu1 %v2917_v12  ;;  %v2933_v24 = vpack.c.bf16 %v322_v23, %v321_v22  ;;  %v3926_v36 = vld [vmem:[%s3896_s16 + $0x20] sm:$0xff]  ;;  %v682_v54 = vld [vmem:[#allocation5 + $0x1e8] sm:$0xff]  ;;  %v3053_v10 = vpack.c.bf16 %v1248_v8, %v1247_v7  ;;  %v1249_v11 = vld [vmem:[#allocation5 + $0x190] sm:$0xff] }
  0xb2   : > { %2922 = vmatprep.subr.bf16.mxu1 %v2921_v15  ;;  %v2965_v55 = vpack.c.bf16 %v682_v54, %v681_v53  ;;  %v1250_v12 = vld [vmem:[#allocation5 + $0x1b0] sm:$0xff]  ;;  %v1710_v17 = vld [vmem:[#allocation5 + $0x18] sm:$0xff] }
  0xb3   : > { %v3057_v13 = vpack.c.bf16 %v1250_v12, %v1249_v11  ;;  %v1251_v14 = vld [vmem:[#allocation5 + $0x1d0] sm:$0xff]  ;;  %v1712_v20 = vld [vmem:[#allocation5 + $0x58] sm:$0xff] }
  0xb4   : > { %v1714_v23 = vld [vmem:[#allocation5 + $0x98] sm:$0xff]  ;;  %v1012_v48 = vld [vmem:[#allocation8 + $0x88] sm:$0xff] }
  0xb5   : > { %2924 = vmatpush3.bf16.msra.mxu1 %v2921_v15  ;;  %v1252_v15 = vld [vmem:[#allocation5 + $0x1f0] sm:$0xff]  ;;  %v1716_v26 = vld [vmem:[#allocation5 + $0xd8] sm:$0xff] }
  0xb6   : > { %2926 = vmatprep.subr.bf16.mxu1 %v2925_v18  ;;  %v3061_v16 = vpack.c.bf16 %v1252_v15, %v1251_v14  ;;  %v1718_v29 = vld [vmem:[#allocation5 + $0x118] sm:$0xff]  ;;  %v1024_v59 = vld [vmem:[#allocation8 + $0xe8] sm:$0xff] }
  0xb7   : > { %v1720_v34 = vld [vmem:[#allocation5 + $0x158] sm:$0xff]  ;;  %v652_v1 = vld [vmem:[#allocation8 + $0x8] sm:$0xff] }
  0xb8   : > { %v1722_v39 = vld [vmem:[#allocation5 + $0x198] sm:$0xff] }
  0xb9   : > { %2928 = vmatpush3.bf16.msra.mxu1 %v2925_v18  ;;  %v1711_v18 = vld [vmem:[#allocation5 + $0x38] sm:$0xff] }
  0xba   : > { %2930 = vmatprep.subr.bf16.mxu1 %v2929_v21  ;;  %v3097_v19 = vpack.c.bf16 %v1711_v18, %v1710_v17  ;;  %v1724_v44 = vld [vmem:[#allocation5 + $0x1d8] sm:$0xff] }
  0xbb   : > { %v1013_v50 = vld [vmem:[#allocation8 + $0x90] sm:$0xff]  ;;  %v1014_v51 = vld [vmem:[#allocation8 + $0x98] sm:$0xff] }
  0xbc   : > { %v1018_v53 = vld [vmem:[#allocation8 + $0xb8] sm:$0xff] }
  0xbd   : > { %2932 = vmatpush3.bf16.msra.mxu1 %v2929_v21  ;;  %v1713_v21 = vld [vmem:[#allocation5 + $0x78] sm:$0xff] }
  0xbe   : > { %2934 = vmatprep.subr.bf16.mxu1 %v2933_v24  ;;  %v3101_v22 = vpack.c.bf16 %v1713_v21, %v1712_v20  ;;  %v1022_v56 = vld [vmem:[#allocation8 + $0xd8] sm:$0xff] }
  0xbf   : > { %v1026_v62 = vld [vmem:[#allocation8 + $0xf8] sm:$0xff] }
  0xc1   : > { %2936 = vmatpush3.bf16.msra.mxu1 %v2933_v24  ;;  %v1715_v24 = vld [vmem:[#allocation5 + $0xb8] sm:$0xff] }
  0xc2   : > { %2938 = vmatprep.subr.bf16.mxu1 %v2937_v27  ;;  %v3105_v25 = vpack.c.bf16 %v1715_v24, %v1714_v23 }
  0xc4   : > { %2586 = vmatmul.mubr.f32.vlgmr.msra.gmra.mrb[0].mxu1 %v3915_v30 }
  0xc5   : > { %2940 = vmatpush3.bf16.msra.mxu1 %v2937_v27  ;;  %2588 = vmatprep.mubr.f32.mxu1 %v3918_v31  ;;  %v1717_v27 = vld [vmem:[#allocation5 + $0xf8] sm:$0xff] }
  0xc6   : > { %2942 = vmatprep.subr.bf16.mxu1 %v2941_v32  ;;  %v3109_v28 = vpack.c.bf16 %v1717_v27, %v1716_v26 }
  0xc8   : > { %2589 = vmatmul.mubr.f32.gmra.mrb[2].mxu1 %v3923_v35 }
  0xc9   : > { %2944 = vmatpush3.bf16.msra.mxu1 %v2941_v32  ;;  %2591 = vmatprep.mubr.f32.mxu1 %v3926_v36  ;;  %v1719_v32 = vld [vmem:[#allocation5 + $0x138] sm:$0xff] }
  0xca   : > { %2946 = vmatprep.subr.bf16.mxu1 %v2945_v37  ;;  %v3113_v33 = vpack.c.bf16 %v1719_v32, %v1718_v29  ;;  %v653_v29 = vld [vmem:[#allocation8 + $0x10] sm:$0xff] }
  0xcc   : > { %2592 = vmatmul.mubr.f32.gmra.mrb[4].mxu1 %v3931_v40 }
  0xcd   : > { %2948 = vmatpush3.bf16.msra.mxu1 %v2945_v37  ;;  %2594 = vmatprep.mubr.f32.mxu1 %v3934_v41  ;;  %v1721_v37 = vld [vmem:[#allocation5 + $0x178] sm:$0xff] }
  0xce   : > { %2950 = vmatprep.subr.bf16.mxu1 %v2949_v42  ;;  %v3117_v38 = vpack.c.bf16 %v1721_v37, %v1720_v34  ;;  %v654_v37 = vld [vmem:[#allocation8 + $0x18] sm:$0xff] }
  0xd0   : > { %2595 = vmatmul.mubr.f32.gmra.mrb[6].mxu1 %v3939_v45 }
  0xd1   : > { %2952 = vmatpush3.bf16.msra.mxu1 %v2949_v42  ;;  %2629 = vmatprep.mubr.f32.mxu1 %v3911_v9  ;;  %v1723_v42 = vld [vmem:[#allocation5 + $0x1b8] sm:$0xff] }
  0xd2   : > { %2954 = vmatprep.subr.bf16.mxu1 %v2953_v46  ;;  %v3121_v43 = vpack.c.bf16 %v1723_v42, %v1722_v39  ;;  %v656_v39 = vld [vmem:[#allocation8 + $0x28] sm:$0xff] }
  0xd5   : > { %2956 = vmatpush3.bf16.msra.mxu1 %v2953_v46  ;;  %v1725_v46 = vld [vmem:[#allocation5 + $0x1f8] sm:$0xff] }
  0xd6   : > { %2958 = vmatprep.subr.bf16.mxu1 %v2957_v49  ;;  %v3125_v47 = vpack.c.bf16 %v1725_v46, %v1724_v44 }
  0xd9   : > { %2960 = vmatpush3.bf16.msra.mxu1 %v2957_v49 }
  0xda   : > { %2962 = vmatprep.subr.bf16.mxu1 %v2961_v52 }
  0xdd   : > { %2964 = vmatpush3.bf16.msra.mxu1 %v2961_v52  ;;  %v1017_v52 = vld [vmem:[#allocation8 + $0xb0] sm:$0xff] }
  0xde   : > { %2966 = vmatprep.subr.bf16.mxu1 %v2965_v55 }
  0xe1   : > { %2968 = vmatpush3.bf16.msra.mxu1 %v2965_v55  ;;  %v1021_v55 = vld [vmem:[#allocation8 + $0xd0] sm:$0xff] }
  0xe2   : > { %3034 = vmatprep.subr.bf16.mxu1 %v3033_v58  ;;  %v2989_v57 = vpack.c.bf16 %v1022_v56, %v1021_v55 }
  0xe4   : > { %2630 = vmatmul.mubr.f32.vlgmr.msra.gmra.mrb[8].mxu1 %v3915_v30 }
  0xe5   : > { %3036 = vmatpush3.bf16.msra.mxu1 %v3033_v58  ;;  %2632 = vmatprep.mubr.f32.mxu1 %v3918_v31  ;;  %v1023_v58 = vld [vmem:[#allocation8 + $0xe0] sm:$0xff] }
  0xe6   : > { %3038 = vmatprep.subr.bf16.mxu1 %v3037_v61  ;;  %v2993_v60 = vpack.c.bf16 %v1024_v59, %v1023_v58 }
  0xe8   : > { %2633 = vmatmul.mubr.f32.gmra.mrb[10].mxu1 %v3923_v35 }
  0xe9   : > { %3040 = vmatpush3.bf16.msra.mxu1 %v3037_v61  ;;  %2635 = vmatprep.mubr.f32.mxu1 %v3926_v36  ;;  %v1025_v61 = vld [vmem:[#allocation8 + $0xf0] sm:$0xff] }
  0xea   : > { %3042 = vmatprep.subr.bf16.mxu1 %v3041_v0  ;;  %v2997_v63 = vpack.c.bf16 %v1026_v62, %v1025_v61 }
  0xec   : > { %2636 = vmatmul.mubr.f32.gmra.mrb[12].mxu1 %v3931_v40 }
  0xed   : > { %3044 = vmatpush3.bf16.msra.mxu1 %v3041_v0  ;;  %2638 = vmatprep.mubr.f32.mxu1 %v3934_v41  ;;  %v651_v0 = vld [vmem:[#allocation8] sm:$0xff] }
  0xee   : > { %3046 = vmatprep.subr.bf16.mxu1 %v3045_v3  ;;  %v3966_v2 = vpack.c.bf16 %v652_v1, %v651_v0 }
  0xf0   : > { %2639 = vmatmul.mubr.f32.gmra.mrb[14].mxu1 %v3939_v45 }
  0xf1   : > { %3048 = vmatpush3.bf16.msra.mxu1 %v3045_v3  ;;  %2761 = vmatprep.mubr.f32.mxu1 %v3911_v9  ;;  %v3969_v3 = vld [vmem:[#allocation7] ss:$0 sm:$0xff] }
  0xf2   : > { %3050 = vmatprep.subr.bf16.mxu1 %v3049_v6 }
  0xf5   : > { %3052 = vmatpush3.bf16.msra.mxu1 %v3049_v6 }
  0xf6   : > { %3054 = vmatprep.subr.bf16.mxu1 %v3053_v10 }
  0xf9   : > { %3056 = vmatpush3.bf16.msra.mxu1 %v3053_v10 }
  0xfa   : > { %3058 = vmatprep.subr.bf16.mxu1 %v3057_v13 }
  0xfd   : > { %3060 = vmatpush3.bf16.msra.mxu1 %v3057_v13 }
  0xfe   : > { %3062 = vmatprep.subr.bf16.mxu1 %v3061_v16 }
 0x101   : > { %3064 = vmatpush3.bf16.msra.mxu1 %v3061_v16 }
 0x102   : > { %3098 = vmatprep.subr.bf16.mxu1 %v3097_v19 }
 0x104   : > { %2762 = vmatmul.mubr.f32.vlgmr.msra.gmra.mrb[16].mxu1 %v3915_v30 }
 0x105   : > { %3100 = vmatpush3.bf16.msra.mxu1 %v3097_v19  ;;  %2764 = vmatprep.mubr.f32.mxu1 %v3918_v31 }
 0x106   : > { %3102 = vmatprep.subr.bf16.mxu1 %v3101_v22 }
 0x108   : > { %2765 = vmatmul.mubr.f32.gmra.mrb[18].mxu1 %v3923_v35 }
 0x109   : > { %3104 = vmatpush3.bf16.msra.mxu1 %v3101_v22  ;;  %2767 = vmatprep.mubr.f32.mxu1 %v3926_v36 }
 0x10a   : > { %3106 = vmatprep.subr.bf16.mxu1 %v3105_v25 }
 0x10c   : > { %2768 = vmatmul.mubr.f32.gmra.mrb[20].mxu1 %v3931_v40 }
 0x10d   : > { %3108 = vmatpush3.bf16.msra.mxu1 %v3105_v25  ;;  %2770 = vmatprep.mubr.f32.mxu1 %v3934_v41 }
 0x10e   : > { %3110 = vmatprep.subr.bf16.mxu1 %v3109_v28 }
 0x110   : > { %2771 = vmatmul.mubr.f32.gmra.mrb[22].mxu1 %v3939_v45 }
 0x111   : > { %3112 = vmatpush3.bf16.msra.mxu1 %v3109_v28  ;;  %2849 = vmatprep.mubr.f32.mxu1 %v3911_v9  ;;  %v1011_v9 = vld [vmem:[#allocation8 + $0x80] sm:$0xff] }
 0x112   : > { %3114 = vmatprep.subr.bf16.mxu1 %v3113_v33  ;;  %v2969_v49 = vpack.c.bf16 %v1012_v48, %v1011_v9  ;;  %v3979_v48 = vpack.c.bf16 %v654_v37, %v653_v29 }
 0x114   : > { %2970 = vmatprep.subr.bf16.mxu0 %v2969_v49 }
 0x115   : > { %3116 = vmatpush3.bf16.msra.mxu1 %v3113_v33  ;;  %2972 = vmatpush3.bf16.msra.mxu0 %v2969_v49 }
 0x116   : > { %3118 = vmatprep.subr.bf16.mxu1 %v3117_v38 }
 0x119   : > { %3120 = vmatpush3.bf16.msra.mxu1 %v3117_v38  ;;  %v655_v38 = vld [vmem:[#allocation8 + $0x20] sm:$0xff] }
 0x11a   : > { %3122 = vmatprep.subr.bf16.mxu1 %v3121_v43  ;;  %v3981_v49 = vpack.c.bf16 %v656_v39, %v655_v38 }
 0x11d   : > { %3124 = vmatpush3.bf16.msra.mxu1 %v3121_v43 }
 0x11e   : > { %3126 = vmatprep.subr.bf16.mxu1 %v3125_v47 }
 0x121   : > { %3128 = vmatpush3.bf16.msra.mxu1 %v3125_v47 }
 0x124   : > { %2850 = vmatmul.mubr.f32.vlgmr.msra.gmra.mrb[24].mxu1 %v3915_v30  ;;  %v2973_v30 = vpack.c.bf16 %v1014_v51, %v1013_v50  ;;  %v657_v50 = vld [vmem:[#allocation8 + $0x30] sm:$0xff]  ;;  %v658_v51 = vld [vmem:[#allocation8 + $0x38] sm:$0xff] }
 0x125   : > { %2852 = vmatprep.mubr.f32.mxu1 %v3918_v31  ;;  %v1015_v31 = vld [vmem:[#allocation8 + $0xa0] sm:$0xff]  ;;  %v3988_v55 = vpack.c.bf16 %v658_v51, %v657_v50 }
 0x126   : > { %2974 = vmatprep.subr.bf16.mxu0 %v2973_v30 }
 0x127   : > { %2976 = vmatpush3.bf16.msra.mxu0 %v2973_v30  ;;  %4901 = vst [vmem:[#allocation17_spill] sm:$0xff] %v3988_v55 }
 0x128   : > { %2853 = vmatmul.mubr.f32.gmra.mrb[26].mxu1 %v3923_v35  ;;  %v1016_v35 = vld [vmem:[#allocation8 + $0xa8] sm:$0xff] }
 0x129   : > { %2855 = vmatprep.mubr.f32.mxu1 %v3926_v36  ;;  %v2977_v36 = vpack.c.bf16 %v1016_v35, %v1015_v31 }
 0x12b   : > { %2978 = vmatprep.subr.bf16.mxu0 %v2977_v36 }
 0x12c   : > { %2856 = vmatmul.mubr.f32.gmra.mrb[28].mxu1 %v3931_v40  ;;  %v2981_v40 = vpack.c.bf16 %v1018_v53, %v1017_v52  ;;  %2980 = vmatpush3.bf16.msra.mxu0 %v2977_v36  ;;  %v4857_v52 = vmov 1.0  }
 0x12d   : > { %2858 = vmatprep.mubr.f32.mxu1 %v3934_v41  ;;  %v1019_v41 = vld [vmem:[#allocation8 + $0xc0] sm:$0xff] }
 0x12e   : > { %2982 = vmatprep.subr.bf16.mxu0 %v2981_v40 }
 0x130   : > { %2859 = vmatmul.mubr.f32.gmra.mrb[30].mxu1 %v3939_v45  ;;  %2984 = vmatpush3.bf16.msra.mxu0 %v2981_v40  ;;  %v1020_v45 = vld [vmem:[#allocation8 + $0xc8] sm:$0xff] }
 0x131   : > { %v2985_v54 = vpack.c.bf16 %v1020_v45, %v1019_v41 }
 0x133   : > { %2986 = vmatprep.subr.bf16.mxu0 %v2985_v54 }
 0x134   : > { %2988 = vmatpush3.bf16.msra.mxu0 %v2985_v54 }
 0x135   : > { %2990 = vmatprep.subr.bf16.mxu0 %v2989_v57 }
 0x138   : > { %2992 = vmatpush3.bf16.msra.mxu0 %v2989_v57 }
 0x139   : > { %2994 = vmatprep.subr.bf16.mxu0 %v2993_v60 }
 0x13c   : > { %2996 = vmatpush3.bf16.msra.mxu0 %v2993_v60 }
 0x13d   : > { %2998 = vmatprep.subr.bf16.mxu0 %v2997_v63 }
 0x140   : > { %3000 = vmatpush3.bf16.msra.mxu0 %v2997_v63 }
 0x141   : > { %3002 = vmatprep.subr.bf16.mxu0 %v3966_v2 }
 0x197   : > { %v2587_v4 = vpop.f32.mrb[0].mxu1 }
 0x198   : > { %v402_v5 = vadd.f32 %v2587_v4, %v3969_v3  ;;  %v396_v6 = vpop.f32.mrb[1].mxu1 }
 0x199   : > { %v397_v7 = vadd.f32 %v3969_v3, %v396_v6 }
 0x19a   : > { %v444_v8 = vmul.f32 0.70710677, %v402_v5  ;;  %v3977_v47 = vmul.f32 0.5, %v402_v5 }
 0x19b   : > { %v443_v10 = vmul.f32 0.70710677, %v397_v7  ;;  %v2590_v11 = vpop.f32.mrb[2].mxu1  ;;  %v3983_v30 = vmul.f32 0.5, %v397_v7 }
 0x19c   : > { %v468_v12 = vand.u32 2147483647, %v444_v8  ;;  %v412_v13 = vadd.f32 %v2590_v11, %v3969_v3  ;;  %v406_v14 = vpop.f32.mrb[3].mxu1  ;;  %vm452_vm0 = vcmp.lt.f32.partialorder %v444_v8, 0.0 }
 0x19d   : > { %v467_v15 = vand.u32 2147483647, %v443_v10  ;;  %v407_v17 = vadd.f32 %v3969_v3, %v406_v14  ;;  %4900 = vst [vmem:[#allocation16_spill] sm:$0xff] %v3983_v30  ;;  %vm451_vm1 = vcmp.lt.f32.partialorder %v443_v10, 0.0  ;;  %v3986_v36 = vsel %vm452_vm0, -1.0, %v4857_v52 }
 0x19e   : > { %v476_v16 = vmul.f32 0.3275911, %v468_v12  ;;  %v446_v19 = vmul.f32 0.70710677, %v412_v13  ;;  %v580_v22 = vsub.f32 0.0, %v468_v12  ;;  %v3991_v56 = vsel %vm451_vm1, -1.0, %v4857_v52 }
 0x19f   : > { %v475_v18 = vmul.f32 0.3275911, %v467_v15  ;;  %v2593_v21 = vpop.f32.mrb[4].mxu1  ;;  %v445_v26 = vmul.f32 0.70710677, %v407_v17  ;;  %v579_v32 = vsub.f32 0.0, %v467_v15 }
 0x1a0   : > { %v484_v20 = vadd.f32 1.0, %v476_v16  ;;  %v470_v24 = vand.u32 2147483647, %v446_v19  ;;  %v416_v25 = vpop.f32.mrb[5].mxu1  ;;  %v422_v33 = vadd.f32 %v2593_v21, %v3969_v3  ;;  %v588_v42 = vmul.f32 %v580_v22, %v468_v12  ;;  %4902 = vst [vmem:[#allocation18_spill] sm:$0xff] %v3991_v56 }
 0x1a1   : > { %v483_v23 = vadd.f32 1.0, %v475_v18  ;;  %v469_v43 = vand.u32 2147483647, %v445_v26  ;;  %v417_v46 = vadd.f32 %v3969_v3, %v416_v25  ;;  %v587_v31 = vmul.f32 %v579_v32, %v467_v15 }
 0x1a2   : > { %3279 = vrcp.f32 %v484_v20  ;;  %v478_v27 = vmul.f32 0.3275911, %v470_v24  ;;  %v448_v44 = vmul.f32 0.70710677, %v422_v33  ;;  %v582_v35 = vsub.f32 0.0, %v470_v24 }
 0x1a3   : > { %v2596_v28 = vpop.f32.mrb[6].mxu1  ;;  %3281 = vrcp.f32 %v483_v23  ;;  %v597_v53 = vmul.f32 1.442695, %v588_v42  ;;  %vm454_vm2 = vcmp.lt.f32.partialorder %v446_v19, 0.0  ;;  %v581_v40 = vsub.f32 0.0, %v469_v43 }
 0x1a4   : > { %v426_v34 = vpop.f32.mrb[7].mxu1  ;;  %v486_v9 = vadd.f32 1.0, %v478_v27  ;;  %v477_v41 = vmul.f32 0.3275911, %v469_v43  ;;  %v472_v45 = vand.u32 2147483647, %v448_v44  ;;  %v432_v58 = vadd.f32 %v2596_v28, %v3969_v3 }
 0x1a5   : > { %v447_v54 = vmul.f32 0.70710677, %v417_v46  ;;  %v3993_v57 = vmul.f32 0.5, %v412_v13  ;;  %v595_v60 = vmul.f32 1.442695, %v587_v31  ;;  %v590_v61 = vmul.f32 %v582_v35, %v470_v24 }
 0x1a6   : > { %3283 = vrcp.f32 %v486_v9  ;;  %v3998_v62 = vmul.f32 0.5, %v407_v17  ;;  %vm453_vm3 = vcmp.lt.f32.partialorder %v445_v26, 0.0  ;;  %v4003_v0 = vsel %vm454_vm2, -1.0, %v4857_v52 }
 0x1a7   : > { %4903 = vst [vmem:[#allocation19_spill] sm:$0xff] %v3993_v57  ;;  %4905 = vst [vmem:[#allocation21_spill] sm:$0xff] %v4003_v0  ;;  %v589_v1 = vmul.f32 %v581_v40, %v469_v43  ;;  %v427_v4 = vadd.f32 %v3969_v3, %v426_v34  ;;  %3285 = vpow2.f32 %v597_v53  ;;  %v485_v5 = vadd.f32 1.0, %v477_v41  ;;  %v4029_v34 = vld [vmem:[#allocation7 + $0x1] ss:$0 sm:$0xff] }
 0x1a8   : > { %4904 = vst [vmem:[#allocation20_spill] sm:$0xff] %v3998_v62  ;;  %v480_v6 = vmul.f32 0.3275911, %v472_v45  ;;  %v471_v7 = vand.u32 2147483647, %v447_v54  ;;  %v4009_v11 = vsel %vm453_vm3, -1.0, %v4857_v52  ;;  %3287 = vpow2.f32 %v595_v60 }
 0x1a9   : > { %4906 = vst [vmem:[#allocation22_spill] sm:$0xff] %v4009_v11  ;;  %v584_v12 = vsub.f32 0.0, %v472_v45  ;;  %v450_v13 = vmul.f32 0.70710677, %v432_v58  ;;  %v601_v14 = vmul.f32 1.442695, %v590_v61  ;;  %3289 = vrcp.f32 %v485_v5 }
 0x1aa   : > { %v4011_v15 = vmul.f32 0.5, %v422_v33  ;;  %vm456_vm4 = vcmp.lt.f32.partialorder %v448_v44, 0.0  ;;  %v599_v3 = vmul.f32 1.442695, %v589_v1  ;;  %vm455_vm5 = vcmp.lt.f32.partialorder %v447_v54, 0.0 }
 0x1ab   : > { %v4014_v17 = vmul.f32 0.70710677, %v427_v4  ;;  %v479_v18 = vmul.f32 0.3275911, %v471_v7  ;;  %v583_v19 = vsub.f32 0.0, %v471_v7  ;;  %v488_v22 = vadd.f32 1.0, %v480_v6 }
 0x1ac   : > { %v3996_v59 = vpop.eup %3279  ;;  %4907 = vst [vmem:[#allocation23_spill] sm:$0xff] %v4011_v15  ;;  %v592_v23 = vmul.f32 %v584_v12, %v472_v45  ;;  %v474_v24 = vand.u32 2147483647, %v450_v13  ;;  %3291 = vpow2.f32 %v601_v14  ;;  %v4018_v25 = vsel %vm456_vm4, -1.0, %v4857_v52 }
 0x1ad   : > { %v508_v63 = vmul.f32 1.0614054, %v3996_v59  ;;  %v4006_v8 = vpop.eup %3281  ;;  %4908 = vst [vmem:[#allocation24_spill] sm:$0xff] %v4018_v25  ;;  %v4020_v26 = vmul.f32 0.5, %v417_v46  ;;  %v4023_v27 = vsel %vm455_vm5, -1.0, %v4857_v52  ;;  %3293 = vpow2.f32 %v599_v3 }
 0x1ae   : > { %v507_v20 = vmul.f32 1.0614054, %v4006_v8  ;;  %4910 = vst [vmem:[#allocation26_spill] sm:$0xff] %v4023_v27  ;;  %v586_v32 = vsub.f32 0.0, %v474_v24  ;;  %v473_v33 = vand.u32 2147483647, %v4014_v17  ;;  %v591_v38 = vmul.f32 %v583_v19, %v471_v7 }
 0x1af   : > { %v516_v10 = vadd.f32 -1.4531521, %v508_v63  ;;  %4909 = vst [vmem:[#allocation25_spill] sm:$0xff] %v4020_v26  ;;  %v487_v37 = vadd.f32 1.0, %v479_v18  ;;  %v4031_v39 = vmul.f32 0.5, %v432_v58  ;;  %3295 = vrcp.f32 %v488_v22  ;;  %v660_v22 = vld [vmem:[#allocation8 + $0x48] sm:$0xff] }
 0x1b0   : > { %v4025_v28 = vpop.eup %3283  ;;  %v515_v42 = vadd.f32 -1.4531521, %v507_v20  ;;  %v605_v44 = vmul.f32 1.442695, %v592_v23  ;;  %v585_v46 = vsub.f32 0.0, %v473_v33  ;;  %vm458_vm6 = vcmp.lt.f32.partialorder %v450_v13, 0.0 }
 0x1b1   : > { %v524_v16 = vmul.f32 %v3996_v59, %v516_v10  ;;  %4911 = vst [vmem:[#allocation27_spill] sm:$0xff] %v4025_v28  ;;  %4912 = vst [vmem:[#allocation28_spill] sm:$0xff] %v4031_v39  ;;  %v3286_v50 = vpop.eup %3285  ;;  %v482_v51 = vmul.f32 0.3275911, %v474_v24  ;;  %v510_v53 = vmul.f32 1.0614054, %v4025_v28  ;;  %v594_v41 = vmul.f32 %v586_v32, %v474_v24 }
 0x1b2   : > { %v481_v45 = vmul.f32 0.3275911, %v473_v33  ;;  %v4039_v58 = vpop.eup %3287  ;;  %v603_v60 = vmul.f32 1.442695, %v591_v38  ;;  %v4041_v61 = vmul.f32 0.5, %v427_v4  ;;  %v523_v1 = vmul.f32 %v4006_v8, %v515_v42  ;;  %v661_v23 = vld [vmem:[#allocation8 + $0x50] sm:$0xff] }
 0x1b3   : > { %v532_v21 = vadd.f32 1.4214138, %v524_v16  ;;  %v4047_v6 = vsel %vm458_vm6, -1.0, %v4857_v52  ;;  %v593_v7 = vmul.f32 %v585_v46, %v473_v33  ;;  %v4052_v13 = vpop.eup %3289  ;;  %v490_v14 = vadd.f32 1.0, %v482_v51  ;;  %v662_v46 = vld [vmem:[#allocation8 + $0x58] sm:$0xff] }
 0x1b4   : > { %4913 = vst [vmem:[#allocation29_spill] sm:$0xff] %v4041_v61  ;;  %4914 = vst [vmem:[#allocation30_spill] sm:$0xff] %v4047_v6  ;;  %vm457_vm7 = vcmp.lt.f32.partialorder %v4014_v17, 0.0  ;;  %v518_v3 = vadd.f32 -1.4531521, %v510_v53  ;;  %3297 = vrcp.f32 %v487_v37  ;;  %v489_v20 = vadd.f32 1.0, %v481_v45 }
 0x1b5   : > { %v540_v29 = vmul.f32 %v3996_v59, %v532_v21  ;;  %4915 = vst [vmem:[#allocation31_spill] sm:$0xff] %v4052_v13  ;;  %v609_v19 = vmul.f32 1.442695, %v594_v41  ;;  %v659_v21 = vld [vmem:[#allocation8 + $0x40] sm:$0xff]  ;;  %3299 = vpow2.f32 %v605_v44  ;;  %v531_v33 = vadd.f32 1.4214138, %v523_v1 }
 0x1b6   : > { %v4059_v24 = vpop.eup %3291  ;;  %3301 = vpow2.f32 %v603_v60  ;;  %v607_v42 = vmul.f32 1.442695, %v593_v7  ;;  %v4074_v44 = vsel %vm457_vm7, -1.0, %v4857_v52  ;;  %v4076_v51 = vpack.c.bf16 %v660_v22, %v659_v21  ;;  %v663_v45 = vld [vmem:[#allocation8 + $0x60] sm:$0xff]  ;;  %v664_v60 = vld [vmem:[#allocation8 + $0x68] sm:$0xff] }
 0x1b7   : > { %v548_v43 = vadd.f32 -0.28449672, %v540_v29  ;;  %v2631_v9 = vpop.f32.mrb[8].mxu1  ;;  %4916 = vst [vmem:[#allocation32_spill] sm:$0xff] %v4059_v24  ;;  %v4065_v38 = vpop.eup %3293  ;;  %3303 = vrcp.f32 %v490_v14  ;;  %4918 = vst [vmem:[#allocation34_spill] sm:$0xff] %v4074_v44  ;;  %v4085_v1 = vmul.f32 %v4025_v28, %v518_v3  ;;  %v4088_v7 = vpack.c.bf16 %v662_v46, %v661_v23 }
 0x1b8   : > { %v762_v31 = vadd.f32 %v2631_v9, %v4029_v34  ;;  %v756_v35 = vpop.f32.mrb[9].mxu1  ;;  %4917 = vst [vmem:[#allocation33_spill] sm:$0xff] %v4065_v38  ;;  %4919 = vst [vmem:[#allocation35_spill] sm:$0xff] %v4076_v51  ;;  %3305 = vpow2.f32 %v609_v19  ;;  %v666_v19 = vld [vmem:[#allocation8 + $0x78] sm:$0xff]  ;;  %v4096_v52 = vpack.c.bf16 %v664_v60, %v663_v45 }
 0x1b9   : > { %v556_v40 = vmul.f32 %v3996_v59, %v548_v43  ;;  %v4037_v54 = vadd.f32 %v4029_v34, %v756_v35  ;;  %v4079_v35 = vmul.f32 1.0614054, %v4052_v13  ;;  %v4081_v53 = vpop.eup %3295  ;;  %4922 = vst [vmem:[#allocation38_spill] sm:$0xff] %v4085_v1  ;;  %3307 = vrcp.f32 %v489_v20  ;;  %4923 = vst [vmem:[#allocation39_spill] sm:$0xff] %v4088_v7 }
 0x1ba   : > { %v4043_v63 = vmul.f32 0.70710677, %v762_v31  ;;  %4921 = vst [vmem:[#allocation37_spill] sm:$0xff] %v4081_v53  ;;  %3309 = vpow2.f32 %v607_v42  ;;  %v4090_v14 = vmul.f32 0.5, %v762_v31  ;;  %4924 = vst [vmem:[#allocation40_spill] sm:$0xff] %v4096_v52 }
 0x1bb   : > { %v564_v5 = vadd.f32 0.2548296, %v556_v40  ;;  %v4050_v10 = vmul.f32 0.70710677, %v4037_v54  ;;  %v2634_v12 = vpop.f32.mrb[10].mxu1  ;;  %4920 = vst [vmem:[#allocation36_spill] sm:$0xff] %v4079_v35 }
 0x1bc   : > { %v4056_v4 = vadd.f32 %v2634_v12, %v4029_v34  ;;  %v766_v16 = vpop.f32.mrb[11].mxu1  ;;  %v665_v12 = vld [vmem:[#allocation8 + $0x70] sm:$0xff]  ;;  %vm812_vm8 = vcmp.lt.f32.partialorder %v4043_v63, 0.0  ;;  %v4101_v39 = vmul.f32 0.5, %v4037_v54 }
 0x1bd   : > { %v572_v18 = vmul.f32 %v3996_v59, %v564_v5  ;;  %v827_v29 = vand.u32 2147483647, %v4050_v10  ;;  %v828_v59 = vand.u32 2147483647, %v4043_v63  ;;  %v4069_v37 = vadd.f32 %v4029_v34, %v766_v16 }
 0x1be   : > { %v4063_v32 = vmul.f32 0.70710677, %v4056_v4  ;;  %v539_v5 = vmul.f32 %v4006_v8, %v531_v33  ;;  %v4103_v61 = vpack.c.bf16 %v666_v19, %v665_v12  ;;  %v4105_v6 = vpop.eup %3297  ;;  %v4929_v12 = vmov 1.0  }
 0x1bf   : > { %v2637_v43 = vpop.f32.mrb[12].mxu1  ;;  %v612_v40 = vmul.f32 %v3286_v50, %v572_v18  ;;  %v835_v17 = vmul.f32 0.3275911, %v827_v29  ;;  %v940_v16 = vsub.f32 0.0, %v828_v59  ;;  %v4093_v50 = vmul.f32 0.70710677, %v4069_v37 }
 0x1c0   : > { %v776_v9 = vpop.f32.mrb[13].mxu1  ;;  %v830_v41 = vand.u32 2147483647, %v4063_v32  ;;  %v836_v21 = vmul.f32 0.3275911, %v828_v59  ;;  %v939_v22 = vsub.f32 0.0, %v827_v29  ;;  %v782_v3 = vadd.f32 %v2637_v43, %v4029_v34 }
 0x1c1   : > { %v620_v33 = vsub.f32 1.0, %v612_v40  ;;  %v829_v42 = vand.u32 2147483647, %v4093_v50  ;;  %v843_v31 = vadd.f32 1.0, %v835_v17  ;;  %4925 = vst [vmem:[#allocation41_spill] sm:$0xff] %v4103_v61  ;;  %4926 = vst [vmem:[#allocation42_spill] sm:$0xff] %v4105_v6  ;;  %v948_v44 = vmul.f32 %v940_v16, %v828_v59  ;;  %v4109_v40 = vpop.eup %3299 }
 0x1c2   : > { %v838_v23 = vmul.f32 0.3275911, %v830_v41  ;;  %v942_v46 = vsub.f32 0.0, %v830_v41  ;;  %v808_v15 = vmul.f32 0.70710677, %v782_v3  ;;  %4927 = vst [vmem:[#allocation43_spill] sm:$0xff] %v4109_v40  ;;  %v947_v26 = vmul.f32 %v939_v22, %v827_v29  ;;  %v4113_v27 = vpop.eup %3301 }
 0x1c3   : > { %v2640_v18 = vpop.f32.mrb[14].mxu1  ;;  %v837_v43 = vmul.f32 0.3275911, %v829_v42  ;;  %v4107_v45 = vadd.f32 -0.28449672, %v539_v5  ;;  %v844_v60 = vadd.f32 1.0, %v836_v21  ;;  %v777_v25 = vadd.f32 %v4029_v34, %v776_v9  ;;  %v4121_v19 = vpop.eup %3303 }
 0x1c4   : > { %v786_v20 = vpop.f32.mrb[15].mxu1  ;;  %v792_v17 = vadd.f32 %v2640_v18, %v4029_v34  ;;  %4928 = vst [vmem:[#allocation44_spill] sm:$0xff] %v4113_v27  ;;  %v628_v54 = vmul.f32 %v620_v33, %v3986_v36  ;;  %v4119_v59 = vsel %vm812_vm8, -1.0, %v4929_v12  ;;  %v846_v16 = vadd.f32 1.0, %v838_v23  ;;  %4930 = vst [vmem:[#allocation45_spill] sm:$0xff] %v4121_v19  ;;  %v4123_v9 = vpop.eup %3305 }
 0x1c5   : > { %v950_v5 = vmul.f32 %v942_v46, %v830_v41  ;;  %3311 = vrcp.f32 %v843_v31  ;;  %v845_v21 = vadd.f32 1.0, %v837_v43  ;;  %v941_v29 = vsub.f32 0.0, %v829_v42  ;;  %4931 = vst [vmem:[#allocation46_spill] sm:$0xff] %v4123_v9  ;;  %v4129_v63 = vpop.eup %3307 }
 0x1c6   : > { %v807_v22 = vmul.f32 0.70710677, %v777_v25  ;;  %v957_v18 = vmul.f32 1.442695, %v948_v44  ;;  %v4126_v62 = vmul.f32 0.5, %v4056_v4  ;;  %v787_v33 = vadd.f32 %v4029_v34, %v786_v20  ;;  %4932 = vst [vmem:[#allocation47_spill] sm:$0xff] %v4129_v63  ;;  %v4132_v46 = vpop.eup %3309 }
 0x1c7   : > { %v832_v36 = vand.u32 2147483647, %v808_v15  ;;  %3313 = vrcp.f32 %v844_v60  ;;  %v955_v23 = vmul.f32 1.442695, %v947_v26  ;;  %vm814_vm9 = vcmp.lt.f32.partialorder %v4063_v32, 0.0  ;;  %4933 = vst [vmem:[#allocation48_spill] sm:$0xff] %v4132_v46 }
 0x1c8   : > { %v810_v41 = vmul.f32 0.70710677, %v792_v17  ;;  %v636_v31 = vadd.f32 1.0, %v628_v54  ;;  %3315 = vrcp.f32 %v846_v16  ;;  %v961_v43 = vmul.f32 1.442695, %v950_v5 }
 0x1c9   : > { %vm813_vm10 = vcmp.lt.f32.partialorder %v4093_v50, 0.0  ;;  %3317 = vrcp.f32 %v845_v21  ;;  %v949_v4 = vmul.f32 %v941_v29, %v829_v42  ;;  %v944_v44 = vsub.f32 0.0, %v832_v36 }
 0x1ca   : > { %v831_v9 = vand.u32 2147483647, %v807_v22  ;;  %3319 = vpow2.f32 %v957_v18  ;;  %v4136_v34 = vmul.f32 0.5, %v4069_v37  ;;  %v840_v20 = vmul.f32 0.3275911, %v832_v36 }
 0x1cb   : > { %v4138_v26 = vmul.f32 0.70710677, %v787_v33  ;;  %3321 = vpow2.f32 %v955_v23  ;;  %v4143_v60 = vsel %vm814_vm9, -1.0, %v4929_v12  ;;  %v834_v16 = vand.u32 2147483647, %v810_v41 }
 0x1cc   : > { %v943_v54 = vsub.f32 0.0, %v831_v9  ;;  %v4146_v50 = vmul.f32 %v636_v31, %v3977_v47  ;;  %v4149_v42 = vsel %vm813_vm10, -1.0, %v4929_v12  ;;  %v4151_v5 = vmul.f32 0.5, %v782_v3  ;;  %v4161_v3 = vld [vmem:[#allocation7 + $0x2] ss:$0 sm:$0xff] }
 0x1cd   : > { %vm816_vm11 = vcmp.lt.f32.partialorder %v808_v15, 0.0  ;;  %3323 = vpow2.f32 %v961_v43  ;;  %v959_v37 = vmul.f32 1.442695, %v949_v4  ;;  %v952_v21 = vmul.f32 %v944_v44, %v832_v36 }
 0x1ce   : > { %4934 = vst [vmem:[#allocation49_spill] sm:$0xff] %v4146_v50  ;;  %4935 = vst [vmem:[#allocation50_spill] sm:$0xff] %v4151_v5  ;;  %v946_v29 = vsub.f32 0.0, %v834_v16  ;;  %v848_v18 = vadd.f32 1.0, %v840_v20  ;;  %vm815_vm12 = vcmp.lt.f32.partialorder %v807_v22, 0.0  ;;  %v4157_v47 = vsel %vm816_vm11, -1.0, %v4929_v12 }
 0x1cf   : > { %v839_v32 = vmul.f32 0.3275911, %v831_v9  ;;  %v833_v23 = vand.u32 2147483647, %v4138_v26  ;;  %v4154_v46 = vpop.eup %3311  ;;  %v4159_v31 = vmul.f32 0.5, %v777_v25  ;;  %v951_v40 = vmul.f32 %v943_v54, %v831_v9 }
 0x1d0   : > { %vm818_vm13 = vcmp.lt.f32.partialorder %v810_v41, 0.0  ;;  %v4163_v15 = vmul.f32 0.5, %v792_v17  ;;  %v842_v36 = vmul.f32 0.3275911, %v834_v16  ;;  %v4165_v43 = vmul.f32 0.5, %v787_v33 }
 0x1d1   : > { %4936 = vst [vmem:[#allocation51_spill] sm:$0xff] %v4159_v31  ;;  %v945_v4 = vsub.f32 0.0, %v833_v23  ;;  %v4167_v44 = vpop.eup %3313  ;;  %3325 = vpow2.f32 %v959_v37  ;;  %v965_v20 = vmul.f32 1.442695, %v952_v21  ;;  %v4171_v27 = vsel %vm815_vm12, -1.0, %v4929_v12 }
 0x1d2   : > { %4937 = vst [vmem:[#allocation52_spill] sm:$0xff] %v4163_v15  ;;  %4938 = vst [vmem:[#allocation53_spill] sm:$0xff] %v4165_v43  ;;  %v954_v25 = vmul.f32 %v946_v29, %v834_v16  ;;  %v4173_v57 = vpop.eup %3315  ;;  %3327 = vrcp.f32 %v848_v18  ;;  %v847_v9 = vadd.f32 1.0, %v839_v32  ;;  %v4176_v17 = vsel %vm818_vm13, -1.0, %v4929_v12 }
 0x1d3   : > { %4939 = vst [vmem:[#allocation54_spill] sm:$0xff] %v4176_v17  ;;  %v867_v33 = vmul.f32 1.0614054, %v4154_v46  ;;  %v4179_v54 = vpop.eup %3317  ;;  %v963_v11 = vmul.f32 1.442695, %v951_v40  ;;  %vm817_vm14 = vcmp.lt.f32.partialorder %v4138_v26, 0.0  ;;  %v953_v18 = vmul.f32 %v945_v4, %v833_v23 }
 0x1d4   : > { %v841_v37 = vmul.f32 0.3275911, %v833_v23  ;;  %v4183_v16 = vpop.eup %3319  ;;  %v850_v29 = vadd.f32 1.0, %v842_v36  ;;  %v868_v0 = vmul.f32 1.0614054, %v4167_v44  ;;  %3329 = vpow2.f32 %v965_v20 }
 0x1d5   : > { %v4187_v38 = vpop.eup %3321  ;;  %v969_v24 = vmul.f32 1.442695, %v954_v25  ;;  %v870_v40 = vmul.f32 1.0614054, %v4173_v57  ;;  %3331 = vrcp.f32 %v847_v9  ;;  %vm811_vm15 = vcmp.lt.f32.partialorder %v4050_v10, 0.0 }
 0x1d6   : > { %v869_v36 = vmul.f32 1.0614054, %v4179_v54  ;;  %v849_v4 = vadd.f32 1.0, %v841_v37  ;;  %3333 = vpow2.f32 %v963_v11  ;;  %v4203_v9 = vsel %vm817_vm14, -1.0, %v4929_v12 }
 0x1d7   : > { %v2763_v41 = vpop.f32.mrb[16].mxu1  ;;  %v4194_v23 = vpop.eup %3323  ;;  %4940 = vst [vmem:[#allocation55_spill] sm:$0xff] %v4203_v9  ;;  %v967_v6 = vmul.f32 1.442695, %v953_v18  ;;  %3335 = vrcp.f32 %v850_v29  ;;  %v555_v37 = vmul.f32 %v4006_v8, %v4107_v45  ;;  %v878_v1 = vadd.f32 -1.4531521, %v870_v40 }
 0x1d8   : > { %v1332_v22 = vadd.f32 %v2763_v41, %v4161_v3  ;;  %v1326_v21 = vpop.f32.mrb[17].mxu1  ;;  %v875_v41 = vadd.f32 -1.4531521, %v867_v33  ;;  %v876_v33 = vadd.f32 -1.4531521, %v868_v0  ;;  %3337 = vpow2.f32 %v969_v24 }
 0x1d9   : > { %v1327_v32 = vadd.f32 %v4161_v3, %v1326_v21  ;;  %3339 = vrcp.f32 %v849_v4  ;;  %v877_v35 = vadd.f32 -1.4531521, %v869_v36  ;;  %v4221_v24 = vsel %vm811_vm15, -1.0, %v4929_v12 }
 0x1da   : > { %v4189_v19 = vmul.f32 0.70710677, %v1332_v22  ;;  %v883_v11 = vmul.f32 %v4154_v46, %v875_v41  ;;  %3341 = vpow2.f32 %v967_v6  ;;  %v884_v45 = vmul.f32 %v4167_v44, %v876_v33 }
 0x1db   : > { %v2766_v63 = vpop.f32.mrb[18].mxu1  ;;  %v1373_v53 = vmul.f32 0.70710677, %v1327_v32  ;;  %v4214_v26 = vpop.eup %3325  ;;  %v4225_v4 = vmul.f32 0.5, %v1332_v22  ;;  %v4231_v30 = vmul.f32 %v4173_v57, %v878_v1  ;;  %v4240_v22 = vmul.f32 %v4179_v54, %v877_v35 }
 0x1dc   : > { %v1398_v21 = vand.u32 2147483647, %v4189_v19  ;;  %v4198_v20 = vadd.f32 %v2766_v63, %v4161_v3  ;;  %v1336_v25 = vpop.f32.mrb[19].mxu1  ;;  %v4216_v50 = vpop.eup %3327  ;;  %v891_v6 = vadd.f32 1.4214138, %v883_v11  ;;  %vm1382_vm0 = vcmp.lt.f32.partialorder %v4189_v19, 0.0 }
 0x1dd   : > { %v4206_v13 = vadd.f32 %v4161_v3, %v1336_v25  ;;  %v1397_v0 = vand.u32 2147483647, %v1373_v53  ;;  %4941 = vst [vmem:[#allocation56_spill] sm:$0xff] %v4225_v4  ;;  %vm1381_vm1 = vcmp.lt.f32.partialorder %v1373_v53, 0.0  ;;  %v4245_v7 = vmul.f32 0.5, %v1327_v32 }
 0x1de   : > { %v1406_v28 = vmul.f32 0.3275911, %v1398_v21  ;;  %v4211_v63 = vmul.f32 0.70710677, %v4198_v20  ;;  %v1510_v25 = vsub.f32 0.0, %v1398_v21  ;;  %v4233_v10 = vpop.eup %3329  ;;  %v899_v35 = vmul.f32 %v4154_v46, %v891_v6 }
 0x1df   : > { %v2769_v29 = vpop.f32.mrb[20].mxu1  ;;  %v1509_v40 = vsub.f32 0.0, %v1397_v0  ;;  %v1375_v41 = vmul.f32 0.70710677, %v4206_v13  ;;  %v1405_v33 = vmul.f32 0.3275911, %v1397_v0 }
 0x1e0   : > { %v1414_v18 = vadd.f32 1.0, %v1406_v28  ;;  %v1346_v61 = vpop.f32.mrb[21].mxu1  ;;  %v563_v28 = vadd.f32 0.2548296, %v555_v37  ;;  %v1400_v36 = vand.u32 2147483647, %v4211_v63  ;;  %v4242_v37 = vpop.eup %3331  ;;  %v1518_v4 = vmul.f32 %v1510_v25, %v1398_v21 }
 0x1e1   : > { %v1347_v1 = vadd.f32 %v4161_v3, %v1346_v61  ;;  %4942 = vst [vmem:[#allocation57_spill] sm:$0xff] %v4245_v7  ;;  %v1517_v17 = vmul.f32 %v1509_v40, %v1397_v0  ;;  %v1399_v43 = vand.u32 2147483647, %v1375_v41  ;;  %v4247_v51 = vpop.eup %3333  ;;  %v892_v56 = vadd.f32 1.4214138, %v884_v45 }
 0x1e2   : > { %3343 = vrcp.f32 %v1414_v18  ;;  %v1352_v18 = vadd.f32 %v2769_v29, %v4161_v3  ;;  %v1512_v11 = vsub.f32 0.0, %v1400_v36  ;;  %v4250_v29 = vsel %vm1382_vm0, -1.0, %v4929_v12  ;;  %v4253_v9 = vpop.eup %3335 }
 0x1e3   : > { %v4228_v52 = vpop.f32.mrb[22].mxu1  ;;  %4943 = vst [vmem:[#allocation58_spill] sm:$0xff] %v4250_v29  ;;  %v1408_v5 = vmul.f32 0.3275911, %v1400_v36  ;;  %v4256_v53 = vsel %vm1381_vm1, -1.0, %v4929_v12  ;;  %v1413_v61 = vadd.f32 1.0, %v1405_v33  ;;  %v4258_v0 = vpop.eup %3337  ;;  %v4264_v31 = vmul.f32 %v4006_v8, %v563_v28 }
 0x1e4   : > { %v4237_v15 = vpop.f32.mrb[23].mxu1  ;;  %v1378_v19 = vmul.f32 0.70710677, %v1352_v18  ;;  %4944 = vst [vmem:[#allocation59_spill] sm:$0xff] %v4256_v53  ;;  %v1511_v32 = vsub.f32 0.0, %v1399_v43  ;;  %4945 = vst [vmem:[#allocation60_spill] sm:$0xff] %v4258_v0  ;;  %v1520_v40 = vmul.f32 %v1512_v11, %v1400_v36  ;;  %v4261_v7 = vpop.eup %3339 }
 0x1e5   : > { %v1377_v21 = vmul.f32 0.70710677, %v1347_v1  ;;  %v1527_v25 = vmul.f32 1.442695, %v1518_v4  ;;  %vm1384_vm2 = vcmp.lt.f32.partialorder %v4211_v63, 0.0  ;;  %vm1383_vm3 = vcmp.lt.f32.partialorder %v1375_v41, 0.0  ;;  %v4266_v55 = vpop.eup %3341 }
 0x1e6   : > { %v1525_v29 = vmul.f32 1.442695, %v1517_v17  ;;  %v1407_v6 = vmul.f32 0.3275911, %v1399_v43  ;;  %v1402_v45 = vand.u32 2147483647, %v1378_v19  ;;  %3345 = vrcp.f32 %v1413_v61 }
 0x1e7   : > { %v4269_v33 = vmul.f32 0.5, %v4198_v20  ;;  %v1416_v53 = vadd.f32 1.0, %v1408_v5  ;;  %v4272_v4 = vmul.f32 0.5, %v4206_v13  ;;  %v907_v63 = vadd.f32 -0.28449672, %v899_v35 }
 0x1e8   : > { %v4277_v17 = vsel %vm1384_vm2, -1.0, %v4929_v12  ;;  %v1519_v11 = vmul.f32 %v1511_v32, %v1399_v43  ;;  %v1401_v0 = vand.u32 2147483647, %v1377_v21  ;;  %3347 = vpow2.f32 %v1527_v25 }
 0x1e9   : > { %4946 = vst [vmem:[#allocation61_spill] sm:$0xff] %v4269_v33  ;;  %4947 = vst [vmem:[#allocation62_spill] sm:$0xff] %v4272_v4  ;;  %v1531_v28 = vmul.f32 1.442695, %v1520_v40  ;;  %v4282_v20 = vsel %vm1383_vm3, -1.0, %v4929_v12  ;;  %3349 = vpow2.f32 %v1525_v29  ;;  %v1415_v13 = vadd.f32 1.0, %v1407_v6 }
 0x1ea   : > { %4948 = vst [vmem:[#allocation63_spill] sm:$0xff] %v4277_v17  ;;  %v1410_v5 = vmul.f32 0.3275911, %v1402_v45  ;;  %v1514_v35 = vsub.f32 0.0, %v1402_v45  ;;  %3351 = vrcp.f32 %v1416_v53  ;;  %v4284_v61 = vmul.f32 0.5, %v1352_v18 }
 0x1eb   : > { %vm1386_vm4 = vcmp.lt.f32.partialorder %v1378_v19, 0.0  ;;  %v1529_v4 = vmul.f32 1.442695, %v1519_v11  ;;  %v1409_v43 = vmul.f32 0.3275911, %v1401_v0  ;;  %v1513_v32 = vsub.f32 0.0, %v1401_v0 }
 0x1ec   : > { %v4274_v36 = vpop.eup %3343  ;;  %4949 = vst [vmem:[#allocation64_spill] sm:$0xff] %v4284_v61  ;;  %v915_v17 = vmul.f32 %v4154_v46, %v907_v63  ;;  %3353 = vpow2.f32 %v1531_v28  ;;  %v4288_v41 = vmul.f32 0.5, %v1347_v1  ;;  %vm1385_vm5 = vcmp.lt.f32.partialorder %v1377_v21, 0.0 }
 0x1ed   : > { %v1438_v8 = vmul.f32 1.0614054, %v4274_v36  ;;  %3355 = vrcp.f32 %v1415_v13  ;;  %v4291_v29 = vsel %vm1386_vm4, -1.0, %v4929_v12  ;;  %v1418_v40 = vadd.f32 1.0, %v1410_v5 }
 0x1ee   : > { %4950 = vst [vmem:[#allocation65_spill] sm:$0xff] %v4288_v41  ;;  %4951 = vst [vmem:[#allocation66_spill] sm:$0xff] %v4291_v29  ;;  %v1522_v53 = vmul.f32 %v1514_v35, %v1402_v45  ;;  %v1362_v18 = vadd.f32 %v4228_v52, %v4161_v3  ;;  %v923_v19 = vadd.f32 0.2548296, %v915_v17  ;;  %v900_v6 = vmul.f32 %v4167_v44, %v892_v56 }
 0x1ef   : > { %v1446_v33 = vadd.f32 -1.4531521, %v1438_v8  ;;  %v893_v63 = vadd.f32 1.4214138, %v4240_v22  ;;  %3357 = vpow2.f32 %v1529_v4  ;;  %v1417_v1 = vadd.f32 1.0, %v1409_v43 }
 0x1f0   : > { %v1521_v21 = vmul.f32 %v1513_v32, %v1401_v0  ;;  %v931_v8 = vmul.f32 %v4154_v46, %v923_v19  ;;  %v908_v28 = vadd.f32 -0.28449672, %v900_v6  ;;  %v4302_v13 = vpop.eup %3345  ;;  %3359 = vrcp.f32 %v1418_v40 }
 0x1f1   : > { %v1454_v25 = vmul.f32 %v4274_v36, %v1446_v33  ;;  %v4298_v33 = vsel %vm1385_vm5, -1.0, %v4929_v12  ;;  %v901_v45 = vmul.f32 %v4179_v54, %v893_v63  ;;  %v1535_v52 = vmul.f32 1.442695, %v1522_v53 }
 0x1f2   : > { %4952 = vst [vmem:[#allocation67_spill] sm:$0xff] %v4298_v33  ;;  %v4304_v17 = vmul.f32 0.5, %v1362_v18  ;;  %v1357_v56 = vadd.f32 %v4161_v3, %v4237_v15  ;;  %v4308_v22 = vpop.eup %3347  ;;  %v4310_v4 = vmul.f32 0.70710677, %v1362_v18  ;;  %v971_v0 = vmul.f32 %v4187_v38, %v931_v8 }
 0x1f3   : > { %v1462_v11 = vadd.f32 1.4214138, %v1454_v25  ;;  %v916_v46 = vmul.f32 %v4167_v44, %v908_v28  ;;  %v909_v5 = vadd.f32 -0.28449672, %v901_v45  ;;  %v4316_v43 = vpop.eup %3349  ;;  %3361 = vrcp.f32 %v1417_v1 }
 0x1f4   : > { %4953 = vst [vmem:[#allocation68_spill] sm:$0xff] %v4304_v17  ;;  %v4318_v32 = vmul.f32 0.5, %v1357_v56  ;;  %v894_v25 = vadd.f32 1.4214138, %v4231_v30  ;;  %v871_v3 = vmul.f32 1.0614054, %v4242_v37  ;;  %v4322_v15 = vpop.eup %3351  ;;  %3363 = vpow2.f32 %v1535_v52 }
 0x1f5   : > { %v1470_v40 = vmul.f32 %v4274_v36, %v1462_v11  ;;  %v1533_v53 = vmul.f32 1.442695, %v1521_v21  ;;  %v979_v38 = vsub.f32 1.0, %v971_v0  ;;  %v924_v18 = vadd.f32 0.2548296, %v916_v46 }
 0x1f6   : > { %4954 = vst [vmem:[#allocation69_spill] sm:$0xff] %v4318_v32  ;;  %v4327_v6 = vmul.f32 0.70710677, %v1357_v56  ;;  %v917_v63 = vmul.f32 %v4179_v54, %v909_v5  ;;  %v902_v1 = vmul.f32 %v4173_v57, %v894_v25  ;;  %v879_v8 = vadd.f32 -1.4531521, %v871_v3  ;;  %v4331_v28 = vpop.eup %3353 }
 0x1f7   : > { %v4314_v35 = vpop.f32.mrb[24].mxu1  ;;  %v987_v30 = vmul.f32 %v979_v38, %v4221_v24  ;;  %v932_v45 = vmul.f32 %v4167_v44, %v924_v18  ;;  %v872_v21 = vmul.f32 1.0614054, %v4216_v50  ;;  %v4338_v0 = vpop.eup %3355  ;;  %vm1388_vm6 = vcmp.lt.f32.partialorder %v4310_v4, 0.0 }
 0x1f8   : > { %v4325_v19 = vpop.f32.mrb[25].mxu1  ;;  %v925_v56 = vadd.f32 0.2548296, %v917_v63  ;;  %v910_v46 = vadd.f32 -0.28449672, %v902_v1  ;;  %v887_v5 = vmul.f32 %v4242_v37, %v879_v8  ;;  %3365 = vpow2.f32 %v1533_v53 }
 0x1f9   : > { %v873_v25 = vmul.f32 1.0614054, %v4261_v7  ;;  %v1478_v3 = vadd.f32 -0.28449672, %v1470_v40  ;;  %v995_v52 = vadd.f32 1.0, %v987_v30  ;;  %v972_v24 = vmul.f32 %v4183_v16, %v932_v45  ;;  %v4346_v18 = vpop.eup %3357 }
 0x1fa   : > { %v880_v38 = vadd.f32 -1.4531521, %v872_v21  ;;  %v933_v17 = vmul.f32 %v4179_v54, %v925_v56  ;;  %v918_v32 = vmul.f32 %v4173_v57, %v910_v46  ;;  %v895_v61 = vadd.f32 1.4214138, %v887_v5  ;;  %v4357_v45 = vpop.eup %3359 }
 0x1fb   : > { %v4336_v11 = vpop.f32.mrb[26].mxu1  ;;  %v881_v63 = vadd.f32 -1.4531521, %v873_v25  ;;  %v4351_v1 = vand.u32 2147483647, %v4310_v4  ;;  %v1003_v8 = vmul.f32 %v995_v52, %v4101_v39  ;;  %v980_v40 = vsub.f32 1.0, %v972_v24 }
 0x1fc   : > { %v4344_v44 = vpop.f32.mrb[27].mxu1  ;;  %v888_v30 = vmul.f32 %v4216_v50, %v880_v38  ;;  %v973_v21 = vmul.f32 %v4214_v26, %v933_v17  ;;  %v926_v41 = vadd.f32 0.2548296, %v918_v32  ;;  %v903_v54 = vmul.f32 %v4242_v37, %v895_v61 }
 0x1fd   : > { %v889_v56 = vmul.f32 %v4261_v7, %v881_v63  ;;  %v1486_v5 = vmul.f32 %v4274_v36, %v1478_v3  ;;  %2673 = vmatprep.mubr.f32.mxu0 %v1003_v8  ;;  %v988_v39 = vmul.f32 %v980_v40, %v4119_v59  ;;  %v874_v52 = vmul.f32 1.0614054, %v4253_v9  ;;  %v4367_v24 = vpop.eup %3361 }
 0x1fe   : > { %v896_v25 = vadd.f32 1.4214138, %v888_v30  ;;  %v981_v38 = vsub.f32 1.0, %v973_v21  ;;  %v934_v26 = vmul.f32 %v4173_v57, %v926_v41  ;;  %v911_v17 = vadd.f32 -0.28449672, %v903_v54  ;;  %v4381_v41 = vpop.eup %3363 }
 0x1ff   : > { %v4355_v16 = vpop.f32.mrb[28].mxu1  ;;  %v897_v32 = vadd.f32 1.4214138, %v889_v56  ;;  %v996_v61 = vadd.f32 1.0, %v988_v39  ;;  %v882_v29 = vadd.f32 -1.4531521, %v874_v52 }
 0x200   : > { %v4362_v46 = vpop.f32.mrb[29].mxu1  ;;  %v904_v63 = vmul.f32 %v4216_v50, %v896_v25  ;;  %v989_v3 = vmul.f32 %v981_v38, %v4149_v42  ;;  %v974_v59 = vmul.f32 %v4194_v23, %v934_v26  ;;  %v919_v8 = vmul.f32 %v4242_v37, %v911_v17  ;;  %v4377_v30 = vld [vmem:[#allocation7 + $0x3] ss:$0 sm:$0xff] }
 0x201   : > { %v905_v40 = vmul.f32 %v4261_v7, %v897_v32  ;;  %v1494_v53 = vadd.f32 0.2548296, %v1486_v5  ;;  %v1004_v21 = vmul.f32 %v996_v61, %v4090_v14  ;;  %v890_v56 = vmul.f32 %v4253_v9, %v882_v29 }
 0x202   : > { %v912_v54 = vadd.f32 -0.28449672, %v904_v63  ;;  %v997_v39 = vadd.f32 1.0, %v989_v3  ;;  %v982_v42 = vsub.f32 1.0, %v974_v59  ;;  %v927_v25 = vadd.f32 0.2548296, %v919_v8 }
 0x203   : > { %v4371_v33 = vpop.f32.mrb[30].mxu1  ;;  %v913_v23 = vadd.f32 -0.28449672, %v905_v40  ;;  %v4388_v52 = vsel %vm1388_vm6, -1.0, %v4929_v12  ;;  %2674 = vmatmul.mubr.f32.vlgmr.msra.gmra.mrb[0].mxu0 %v1004_v21  ;;  %v898_v26 = vadd.f32 1.4214138, %v890_v56  ;;  %v4393_v5 = vadd.f32 %v4314_v35, %v4377_v30 }
 0x204   : > { %v4379_v57 = vpop.f32.mrb[31].mxu1  ;;  %v920_v38 = vmul.f32 %v4216_v50, %v912_v54  ;;  %3004 = vmatpush3.bf16.msra.mxu0 %v3966_v2  ;;  %v1005_v14 = vmul.f32 %v997_v39, %v4136_v34  ;;  %v990_v29 = vmul.f32 %v982_v42, %v4143_v60  ;;  %v935_v17 = vmul.f32 %v4242_v37, %v927_v25 }
 0x205   : > { %v921_v4 = vmul.f32 %v4261_v7, %v913_v23  ;;  %v1516_v32 = vsub.f32 0.0, %v4351_v1  ;;  %3006 = vmatprep.subr.bf16.mxu0 %v3979_v48  ;;  %v906_v63 = vmul.f32 %v4253_v9, %v898_v26  ;;  %v4404_v35 = vmul.f32 0.70710677, %v4393_v5 }
 0x206   : > { %v928_v61 = vadd.f32 0.2548296, %v920_v38  ;;  %v1502_v2 = vmul.f32 %v4274_v36, %v1494_v53  ;;  %2676 = vmatprep.mubr.f32.mxu0 %v1005_v14  ;;  %v998_v34 = vadd.f32 1.0, %v990_v29  ;;  %v975_v60 = vmul.f32 %v4247_v51, %v935_v17  ;;  %v4416_v53 = vpop.eup %3365  ;;  %v4955_v17 = vld [vmem:[#allocation17_spill] sm:$0xff] }
 0x207   : > { %v929_v3 = vadd.f32 0.2548296, %v921_v4  ;;  %v1403_v37 = vand.u32 2147483647, %v4327_v6  ;;  %v914_v8 = vadd.f32 -0.28449672, %v906_v63  ;;  %v611_v36 = vmul.f32 %v4039_v58, %v4264_v31 }
 0x208   : > { %v936_v59 = vmul.f32 %v4216_v50, %v928_v61  ;;  %v1871_v40 = vand.u32 2147483647, %v4404_v35  ;;  %v1006_v21 = vmul.f32 %v998_v34, %v4126_v62  ;;  %3008 = vmatpush3.bf16.msra.mxu0 %v3979_v48  ;;  %v983_v54 = vsub.f32 1.0, %v975_v60  ;;  %v4956_v4 = vld [vmem:[#allocation51_spill] sm:$0xff]  ;;  %v4958_v34 = vld [vmem:[#allocation60_spill] sm:$0xff] }
 0x209   : > { %v937_v56 = vmul.f32 %v4261_v7, %v929_v3  ;;  %v1412_v51 = vmul.f32 0.3275911, %v4351_v1  ;;  %3010 = vmatprep.subr.bf16.mxu0 %v3981_v49  ;;  %v922_v39 = vmul.f32 %v4253_v9, %v914_v8  ;;  %v1542_v62 = vmul.f32 %v4308_v22, %v1502_v2  ;;  %v4960_v8 = vld [vmem:[#allocation18_spill] sm:$0xff] }
 0x20a   : > { %v976_v50 = vmul.f32 %v4233_v10, %v936_v59  ;;  %v1879_v42 = vmul.f32 0.3275911, %v1871_v40  ;;  %2677 = vmatmul.mubr.f32.gmra.mrb[2].mxu0 %v1006_v21  ;;  %v991_v48 = vmul.f32 %v983_v54, %v4171_v27  ;;  %v4427_v58 = vadd.f32 %v4377_v30, %v4325_v19 }
 0x20b   : > { %v977_v7 = vmul.f32 %v4266_v55, %v937_v56  ;;  %v1524_v31 = vmul.f32 %v1516_v32, %v4351_v1  ;;  %v930_v23 = vadd.f32 0.2548296, %v922_v39  ;;  %v1411_v10 = vmul.f32 0.3275911, %v1403_v37  ;;  %v4957_v32 = vld [vmem:[#allocation55_spill] sm:$0xff] }
 0x20c   : > { %v984_v25 = vsub.f32 1.0, %v976_v50  ;;  %v1887_v38 = vadd.f32 1.0, %v1879_v42  ;;  %v999_v26 = vadd.f32 1.0, %v991_v48  ;;  %3012 = vmatpush3.bf16.msra.mxu0 %v3981_v49  ;;  %v619_v22 = vsub.f32 1.0, %v611_v36  ;;  %v4961_v36 = vld [vmem:[#allocation50_spill] sm:$0xff]  ;;  %v4962_v39 = vld [vmem:[#allocation35_spill] sm:$0xff] }
 0x20d   : > { %v985_v14 = vsub.f32 1.0, %v977_v7  ;;  %v1515_v29 = vsub.f32 0.0, %v1403_v37  ;;  %3014 = vmatprep.subr.bf16.mxu0 %v4955_v17  ;;  %v938_v55 = vmul.f32 %v4253_v9, %v930_v23  ;;  %v1550_v19 = vsub.f32 1.0, %v1542_v62  ;;  %v4963_v42 = vld [vmem:[#allocation58_spill] sm:$0xff]  ;;  %v4964_v48 = vld [vmem:[#allocation53_spill] sm:$0xff] }
 0x20e   : > { %v992_v27 = vmul.f32 %v984_v25, %v4157_v47  ;;  %3367 = vrcp.f32 %v1887_v38  ;;  %v1007_v1 = vmul.f32 %v999_v26, %v4956_v4  ;;  %v4437_v63 = vmul.f32 0.70710677, %v4427_v58  ;;  %v4965_v25 = vld [vmem:[#allocation54_spill] sm:$0xff]  ;;  %v4969_v4 = vld [vmem:[#allocation52_spill] sm:$0xff] }
 0x20f   : > { %v993_v61 = vmul.f32 %v985_v14, %v4957_v32  ;;  %v1420_v2 = vadd.f32 1.0, %v1412_v51  ;;  %v978_v60 = vmul.f32 %v4958_v34, %v938_v55  ;;  %v4442_v47 = vadd.f32 %v4336_v11, %v4377_v30 }
 0x210   : > { %v1000_v49 = vadd.f32 1.0, %v992_v27  ;;  %v1539_v3 = vmul.f32 1.442695, %v1524_v31  ;;  %2679 = vmatprep.mubr.f32.mxu0 %v1007_v1  ;;  %3016 = vmatpush3.bf16.msra.mxu0 %v4955_v17  ;;  %v1983_v59 = vsub.f32 0.0, %v1871_v40  ;;  %v627_v21 = vmul.f32 %v619_v22, %v4960_v8  ;;  %v4967_v27 = vld [vmem:[#allocation39_spill] sm:$0xff]  ;;  %v4973_v8 = vld [vmem:[#allocation40_spill] sm:$0xff] }
 0x211   : > { %4959 = vst [vmem:[#allocation17_spill] sm:$0xff] %v4442_v47  ;;  %v1001_v9 = vadd.f32 1.0, %v993_v61  ;;  %v1419_v54 = vadd.f32 1.0, %v1411_v10  ;;  %v1523_v56 = vmul.f32 %v1515_v29, %v1403_v37  ;;  %v986_v51 = vsub.f32 1.0, %v978_v60  ;;  %3018 = vmatprep.subr.bf16.mxu0 %v4962_v39 }
 0x212   : > { %v1008_v50 = vmul.f32 %v1000_v49, %v4961_v36  ;;  %v1558_v62 = vmul.f32 %v1550_v19, %v4963_v42  ;;  %v1870_v7 = vand.u32 2147483647, %v4437_v63  ;;  %v4452_v31 = vmul.f32 0.70710677, %v4442_v47  ;;  %v4970_v49 = vld [vmem:[#allocation16_spill] sm:$0xff] }
 0x213   : > { %v1009_v11 = vmul.f32 %v1001_v9, %v4964_v48  ;;  %3369 = vrcp.f32 %v1420_v2  ;;  %vm1387_vm7 = vcmp.lt.f32.partialorder %v4327_v6, 0.0  ;;  %v994_v37 = vmul.f32 %v986_v51, %v4965_v25 }
 0x214   : > { %2680 = vmatmul.mubr.f32.gmra.mrb[4].mxu0 %v1008_v50  ;;  %v4458_v23 = vadd.f32 %v4377_v30, %v4344_v44  ;;  %3371 = vpow2.f32 %v1539_v3  ;;  %v1991_v38 = vmul.f32 %v1983_v59, %v1871_v40  ;;  %v635_v10 = vadd.f32 1.0, %v627_v21  ;;  %v4974_v21 = vld [vmem:[#allocation56_spill] sm:$0xff] }
 0x215   : > { %2682 = vmatprep.mubr.f32.mxu0 %v1009_v11  ;;  %v1982_v26 = vsub.f32 0.0, %v1870_v7  ;;  %3020 = vmatpush3.bf16.msra.mxu0 %v4962_v39  ;;  %v1002_v14 = vadd.f32 1.0, %v994_v37  ;;  %v1873_v22 = vand.u32 2147483647, %v4452_v31  ;;  %v4468_v17 = vadd.f32 %v4355_v16, %v4377_v30 }
 0x216   : > { %4966 = vst [vmem:[#allocation51_spill] sm:$0xff] %v4458_v23  ;;  %v4463_v29 = vmul.f32 0.70710677, %v4458_v23  ;;  %3022 = vmatprep.subr.bf16.mxu0 %v4967_v27  ;;  %v1566_v44 = vadd.f32 1.0, %v1558_v62  ;;  %v4473_v40 = vsel %vm1387_vm7, -1.0, %v4929_v12  ;;  %3373 = vrcp.f32 %v1419_v54 }
 0x217   : > { %4968 = vst [vmem:[#allocation55_spill] sm:$0xff] %v4468_v17  ;;  %v1537_v55 = vmul.f32 1.442695, %v1523_v56  ;;  %v1010_v1 = vmul.f32 %v1002_v14, %v4969_v4  ;;  %v1878_v32 = vmul.f32 0.3275911, %v1870_v7  ;;  %v1985_v61 = vsub.f32 0.0, %v1873_v22 }
 0x218   : > { %v4475_v19 = vpop.eup %3367  ;;  %v1872_v2 = vand.u32 2147483647, %v4463_v29  ;;  %vm1855_vm8 = vcmp.lt.f32.partialorder %v4404_v35, 0.0  ;;  %v643_v34 = vmul.f32 %v635_v10, %v4970_v49  ;;  %v4485_v6 = vadd.f32 %v4377_v30, %v4362_v46 }
 0x219   : > { %v1911_v16 = vmul.f32 1.0614054, %v4475_v19  ;;  %3024 = vmatpush3.bf16.msra.mxu0 %v4967_v27  ;;  %v2000_v60 = vmul.f32 1.442695, %v1991_v38  ;;  %v1990_v3 = vmul.f32 %v1982_v26, %v1870_v7  ;;  %v1881_v9 = vmul.f32 0.3275911, %v1873_v22 }
 0x21a   : > { %4971 = vst [vmem:[#allocation60_spill] sm:$0xff] %v4485_v6  ;;  %2683 = vmatmul.mubr.f32.gmra.mrb[6].mxu0 %v1010_v1  ;;  %v4488_v59 = vmul.f32 0.70710677, %v4468_v17  ;;  %3026 = vmatprep.subr.bf16.mxu0 %v4973_v8  ;;  %v4492_v54 = vmul.f32 %v1566_v44, %v4974_v21  ;;  %3375 = vpow2.f32 %v1537_v55  ;;  %v1984_v36 = vsub.f32 0.0, %v1872_v2  ;;  %v1581_v27 = vld [vmem:[#allocation8 + $0x100] sm:$0xff]  ;;  %v1582_v1 = vld [vmem:[#allocation8 + $0x108] sm:$0xff] }
 0x21b   : > { %v1919_v56 = vadd.f32 -1.4531521, %v1911_v16  ;;  %2717 = vmatprep.mubr.f32.mxu0 %v643_v34  ;;  %v1886_v50 = vadd.f32 1.0, %v1878_v32  ;;  %v1993_v51 = vmul.f32 %v1985_v61, %v1873_v22  ;;  %v1880_v46 = vmul.f32 0.3275911, %v1872_v2  ;;  %v1583_v21 = vld [vmem:[#allocation8 + $0x110] sm:$0xff] }
 0x21c   : > { %4972 = vst [vmem:[#allocation18_spill] sm:$0xff] %v4488_v59  ;;  %v1875_v39 = vand.u32 2147483647, %v4488_v59  ;;  %v4496_v42 = vmul.f32 0.5, %v4393_v5  ;;  %v4501_v62 = vsel %vm1855_vm8, -1.0, %v4929_v12  ;;  %3377 = vpow2.f32 %v2000_v60  ;;  %v4978_v5 = vld [vmem:[#allocation41_spill] sm:$0xff] }
 0x21d   : > { %4976 = vst [vmem:[#allocation35_spill] sm:$0xff] %v4501_v62  ;;  %v1927_v48 = vmul.f32 %v4475_v19, %v1919_v56  ;;  %v4505_v11 = vmul.f32 0.70710677, %v4485_v6  ;;  %3028 = vmatpush3.bf16.msra.mxu0 %v4973_v8  ;;  %v4508_v7 = vpop.eup %3369  ;;  %v1998_v25 = vmul.f32 1.442695, %v1990_v3  ;;  %v1889_v37 = vadd.f32 1.0, %v1881_v9 }
 0x21e   : > { %4975 = vst [vmem:[#allocation50_spill] sm:$0xff] %v4496_v42  ;;  %v1987_v38 = vsub.f32 0.0, %v1875_v39  ;;  %3030 = vmatprep.subr.bf16.mxu0 %v4978_v5  ;;  %v4511_v10 = vpop.eup %3371  ;;  %v1992_v26 = vmul.f32 %v1984_v36, %v1872_v2  ;;  %v4516_v22 = vadd.f32 %v4371_v33, %v4377_v30  ;;  %3379 = vrcp.f32 %v1886_v50  ;;  %v1584_v56 = vld [vmem:[#allocation8 + $0x118] sm:$0xff] }
 0x21f   : > { %4977 = vst [vmem:[#allocation58_spill] sm:$0xff] %v4505_v11  ;;  %v1935_v35 = vadd.f32 1.4214138, %v1927_v48  ;;  %v1874_v14 = vand.u32 2147483647, %v4505_v11  ;;  %v1888_v55 = vadd.f32 1.0, %v1880_v46  ;;  %3381 = vpow2.f32 %v1998_v25 }
 0x220   : > { %4979 = vst [vmem:[#allocation53_spill] sm:$0xff] %v4516_v22  ;;  %v2004_v44 = vmul.f32 1.442695, %v1993_v51  ;;  %v1883_v4 = vmul.f32 0.3275911, %v1875_v39  ;;  %v4518_v32 = vpop.eup %3373  ;;  %v1995_v16 = vmul.f32 %v1987_v38, %v1875_v39  ;;  %v4523_v2 = vmul.f32 0.5, %v4427_v58 }
 0x221   : > { %v1943_v61 = vmul.f32 %v4475_v19, %v1935_v35  ;;  %v1882_v49 = vmul.f32 0.3275911, %v1874_v14  ;;  %v1986_v34 = vsub.f32 0.0, %v1874_v14  ;;  %3032 = vmatpush3.bf16.msra.mxu0 %v4978_v5  ;;  %v4526_v33 = vmul.f32 0.70710677, %v4516_v22  ;;  %v4982_v51 = vld [vmem:[#allocation49_spill] sm:$0xff] }
 0x222   : > { %v4530_v60 = vadd.f32 %v4377_v30, %v4379_v57  ;;  %3383 = vrcp.f32 %v1889_v37  ;;  %v2002_v9 = vmul.f32 1.442695, %v1992_v26  ;;  %v3065_v8 = vpack.c.bf16 %v1582_v1, %v1581_v27  ;;  %v4984_v35 = vld [vmem:[#allocation36_spill] sm:$0xff]  ;;  %v1588_v17 = vld [vmem:[#allocation8 + $0x138] sm:$0xff] }
 0x223   : > { %4980 = vst [vmem:[#allocation54_spill] sm:$0xff] %v4526_v33  ;;  %v1951_v3 = vadd.f32 -0.28449672, %v1943_v61  ;;  %3385 = vpow2.f32 %v2004_v44  ;;  %v1891_v36 = vadd.f32 1.0, %v1883_v4  ;;  %v1994_v50 = vmul.f32 %v1986_v34, %v1874_v14  ;;  %v4985_v14 = vld [vmem:[#allocation38_spill] sm:$0xff]  ;;  %v4986_v61 = vld [vmem:[#allocation31_spill] sm:$0xff] }
 0x224   : > { %4981 = vst [vmem:[#allocation39_spill] sm:$0xff] %v4530_v60  ;;  %v1877_v58 = vand.u32 2147483647, %v4526_v33  ;;  %2718 = vmatmul.mubr.f32.vlgmr.msra.gmra.mrb[0].mxu0 %v4982_v51  ;;  %v4534_v46 = vpop.eup %3375  ;;  %3387 = vrcp.f32 %v1888_v55  ;;  %v2008_v30 = vmul.f32 1.442695, %v1995_v16  ;;  %v1890_v57 = vadd.f32 1.0, %v1882_v49  ;;  %3066 = vmatprep.subr.bf16.mxu0 %v3065_v8 }
 0x225   : > { %v1959_v39 = vmul.f32 %v4475_v19, %v1951_v3  ;;  %v4538_v37 = vmul.f32 0.70710677, %v4530_v60  ;;  %3068 = vmatpush3.bf16.msra.mxu0 %v3065_v8  ;;  %v3069_v38 = vpack.c.bf16 %v1584_v56, %v1583_v21  ;;  %3389 = vpow2.f32 %v2002_v9  ;;  %v4987_v49 = vld [vmem:[#allocation27_spill] sm:$0xff] }
 0x226   : > { %v1885_v48 = vmul.f32 0.3275911, %v1877_v58  ;;  %v1989_v25 = vsub.f32 0.0, %v1877_v58  ;;  %v517_v26 = vadd.f32 -1.4531521, %v4984_v35  ;;  %v3378_v44 = vpop.eup %3377  ;;  %vm1854_vm9 = vcmp.lt.f32.partialorder %v4437_v63, 0.0 }
 0x227   : > { %4983 = vst [vmem:[#allocation52_spill] sm:$0xff] %v4538_v37  ;;  %v1967_v5 = vadd.f32 0.2548296, %v1959_v39  ;;  %v534_v27 = vadd.f32 1.4214138, %v4985_v14  ;;  %3391 = vrcp.f32 %v1891_v36  ;;  %3070 = vmatprep.subr.bf16.mxu0 %v3069_v38  ;;  %v1585_v51 = vld [vmem:[#allocation8 + $0x120] sm:$0xff] }
 0x228   : > { %v2006_v55 = vmul.f32 1.442695, %v1994_v50  ;;  %v1876_v4 = vand.u32 2147483647, %v4538_v37  ;;  %3393 = vpow2.f32 %v2008_v30  ;;  %v525_v16 = vmul.f32 %v4986_v61, %v517_v26  ;;  %v4547_v3 = vpop.eup %3379  ;;  %v1586_v36 = vld [vmem:[#allocation8 + $0x128] sm:$0xff]  ;;  %v4988_v35 = vld [vmem:[#allocation42_spill] sm:$0xff] }
 0x229   : > { %v1975_v1 = vmul.f32 %v4475_v19, %v1967_v5  ;;  %v542_v34 = vmul.f32 %v4987_v49, %v534_v27  ;;  %v1893_v9 = vadd.f32 1.0, %v1885_v48  ;;  %v1997_v8 = vmul.f32 %v1989_v25, %v1877_v58  ;;  %3072 = vmatpush3.bf16.msra.mxu0 %v3069_v38  ;;  %v4550_v19 = vpop.eup %3381  ;;  %v4990_v58 = vld [vmem:[#allocation37_spill] sm:$0xff] }
 0x22a   : > { %v1884_v21 = vmul.f32 0.3275911, %v1876_v4  ;;  %v1988_v56 = vsub.f32 0.0, %v1876_v4  ;;  %3395 = vrcp.f32 %v1890_v57  ;;  %v533_v50 = vadd.f32 1.4214138, %v525_v16 }
 0x22b   : > { %v550_v39 = vadd.f32 -0.28449672, %v542_v34  ;;  %v511_v14 = vmul.f32 1.0614054, %v4988_v35  ;;  %v4552_v30 = vmul.f32 %v3378_v44, %v1975_v1  ;;  %v4557_v5 = vsel %vm1854_vm9, -1.0, %v4929_v12 }
 0x22c   : > { %3397 = vpow2.f32 %v2006_v55  ;;  %v512_v48 = vmul.f32 1.0614054, %v4990_v58  ;;  %v4560_v25 = vpop.eup %3383  ;;  %v1892_v38 = vadd.f32 1.0, %v1884_v21  ;;  %v541_v57 = vmul.f32 %v4986_v61, %v533_v50  ;;  %v1587_v21 = vld [vmem:[#allocation8 + $0x130] sm:$0xff] }
 0x22d   : > { %4989 = vst [vmem:[#allocation16_spill] sm:$0xff] %v4552_v30  ;;  %v558_v26 = vmul.f32 %v4987_v49, %v550_v39  ;;  %v519_v27 = vadd.f32 -1.4531521, %v511_v14  ;;  %v4564_v16 = vpop.eup %3385  ;;  %3399 = vrcp.f32 %v1893_v9  ;;  %v4566_v44 = vmul.f32 1.442695, %v1997_v8  ;;  %v4992_v14 = vld [vmem:[#allocation47_spill] sm:$0xff] }
 0x22e   : > { %4991 = vst [vmem:[#allocation40_spill] sm:$0xff] %v4564_v16  ;;  %v520_v1 = vadd.f32 -1.4531521, %v512_v48  ;;  %v3073_v63 = vpack.c.bf16 %v1586_v36, %v1585_v51  ;;  %v4568_v34 = vpop.eup %3387  ;;  %v1996_v55 = vmul.f32 %v1988_v56, %v1876_v4  ;;  %v549_v22 = vadd.f32 -0.28449672, %v541_v57  ;;  %v4993_v8 = vld [vmem:[#allocation45_spill] sm:$0xff] }
 0x22f   : > { %v566_v60 = vadd.f32 0.2548296, %v558_v26  ;;  %v527_v33 = vmul.f32 %v4988_v35, %v519_v27  ;;  %v513_v9 = vmul.f32 1.0614054, %v4992_v14  ;;  %v514_v6 = vmul.f32 1.0614054, %v4993_v8  ;;  %v4575_v48 = vpop.eup %3389 }
 0x230   : > { %v528_v39 = vmul.f32 %v4990_v58, %v520_v1  ;;  %3074 = vmatprep.subr.bf16.mxu0 %v3073_v63  ;;  %4994 = vst [vmem:[#allocation56_spill] sm:$0xff] %v4575_v48  ;;  %3401 = vrcp.f32 %v1892_v38  ;;  %v557_v4 = vmul.f32 %v4986_v61, %v549_v22  ;;  %v1589_v36 = vld [vmem:[#allocation8 + $0x140] sm:$0xff]  ;;  %v1590_v57 = vld [vmem:[#allocation8 + $0x148] sm:$0xff]  ;;  %v3077_v47 = vpack.c.bf16 %v1588_v17, %v1587_v21 }
 0x231   : > { %v574_v56 = vmul.f32 %v4987_v49, %v566_v60  ;;  %v535_v51 = vadd.f32 1.4214138, %v527_v33  ;;  %3076 = vmatpush3.bf16.msra.mxu0 %v3073_v63  ;;  %v4579_v26 = vpop.eup %3391  ;;  %v521_v1 = vadd.f32 -1.4531521, %v513_v9  ;;  %v522_v50 = vadd.f32 -1.4531521, %v514_v6 }
 0x232   : > { %v536_v27 = vadd.f32 1.4214138, %v528_v39  ;;  %v4581_v37 = vpop.eup %3393  ;;  %v4583_v42 = vmul.f32 1.442695, %v1996_v55  ;;  %v565_v59 = vadd.f32 0.2548296, %v557_v4  ;;  %3078 = vmatprep.subr.bf16.mxu0 %v3077_v47  ;;  %v3081_v4 = vpack.c.bf16 %v1590_v57, %v1589_v36 }
 0x233   : > { %4995 = vst [vmem:[#allocation41_spill] sm:$0xff] %v4581_v37  ;;  %v4996_v38 = vld [vmem:[#allocation32_spill] sm:$0xff]  ;;  %v543_v22 = vmul.f32 %v4988_v35, %v535_v51  ;;  %v1591_v60 = vld [vmem:[#allocation8 + $0x150] sm:$0xff]  ;;  %v1592_v33 = vld [vmem:[#allocation8 + $0x158] sm:$0xff]  ;;  %v529_v63 = vmul.f32 %v4992_v14, %v521_v1  ;;  %v530_v39 = vmul.f32 %v4993_v8, %v522_v50  ;;  %v1437_v17 = vmul.f32 1.0614054, %v4302_v13 }
 0x234   : > { %v614_v23 = vmul.f32 %v4996_v38, %v574_v56  ;;  %v544_v49 = vmul.f32 %v4990_v58, %v536_v27  ;;  %v4591_v6 = vpop.eup %3395  ;;  %v573_v55 = vmul.f32 %v4986_v61, %v565_v59  ;;  %v1593_v56 = vld [vmem:[#allocation8 + $0x160] sm:$0xff]  ;;  %v1594_v51 = vld [vmem:[#allocation8 + $0x168] sm:$0xff]  ;;  %v3085_v11 = vpack.c.bf16 %v1592_v33, %v1591_v60  ;;  %v1596_v59 = vld [vmem:[#allocation8 + $0x178] sm:$0xff] }
 0x235   : > { %v551_v9 = vadd.f32 -0.28449672, %v543_v22  ;;  %3080 = vmatpush3.bf16.msra.mxu0 %v3077_v47  ;;  %v537_v37 = vadd.f32 1.4214138, %v529_v63  ;;  %v538_v1 = vadd.f32 1.4214138, %v530_v39  ;;  %v3089_v22 = vpack.c.bf16 %v1594_v51, %v1593_v56 }
 0x236   : > { %v622_v21 = vsub.f32 1.0, %v614_v23  ;;  %v4594_v38 = vpop.eup %3397  ;;  %v552_v27 = vadd.f32 -0.28449672, %v544_v49  ;;  %v4998_v50 = vld [vmem:[#allocation33_spill] sm:$0xff]  ;;  %v1445_v62 = vadd.f32 -1.4531521, %v1437_v17  ;;  %3082 = vmatprep.subr.bf16.mxu0 %v3081_v4  ;;  %3403 = vpow2.f32 %v4583_v42 }
 0x237   : > { %4997 = vst [vmem:[#allocation49_spill] sm:$0xff] %v4594_v38  ;;  %v613_v12 = vmul.f32 %v4998_v50, %v573_v55  ;;  %v4999_v16 = vld [vmem:[#allocation21_spill] sm:$0xff]  ;;  %v559_v30 = vmul.f32 %v4988_v35, %v551_v9  ;;  %v4599_v47 = vpop.eup %3399  ;;  %v545_v36 = vmul.f32 %v4992_v14, %v537_v37  ;;  %v546_v57 = vmul.f32 %v4993_v8, %v538_v1  ;;  %v2054_v63 = vld [vmem:[#allocation8 + $0x180] sm:$0xff] }
 0x238   : > { %v630_v48 = vmul.f32 %v622_v21, %v4999_v16  ;;  %v1595_v23 = vld [vmem:[#allocation8 + $0x170] sm:$0xff]  ;;  %v560_v61 = vmul.f32 %v4990_v58, %v552_v27  ;;  %v1453_v16 = vmul.f32 %v4302_v13, %v1445_v62  ;;  %v2055_v39 = vld [vmem:[#allocation8 + $0x188] sm:$0xff]  ;;  %v5001_v38 = vld [vmem:[#allocation19_spill] sm:$0xff]  ;;  %vm1857_vm10 = vcmp.lt.f32.partialorder %v4452_v31, 0.0 }
 0x239   : > { %v621_v60 = vsub.f32 1.0, %v613_v12  ;;  %v567_v49 = vadd.f32 0.2548296, %v559_v30  ;;  %3084 = vmatpush3.bf16.msra.mxu0 %v3081_v4  ;;  %v553_v55 = vadd.f32 -0.28449672, %v545_v36  ;;  %v3093_v9 = vpack.c.bf16 %v1596_v59, %v1595_v23  ;;  %v5000_v27 = vld [vmem:[#allocation22_spill] sm:$0xff] }
 0x23a   : > { %v638_v33 = vadd.f32 1.0, %v630_v48  ;;  %v568_v17 = vadd.f32 0.2548296, %v560_v61  ;;  %v554_v21 = vadd.f32 -0.28449672, %v546_v57  ;;  %3086 = vmatprep.subr.bf16.mxu0 %v3085_v11  ;;  %v4605_v50 = vpop.eup %3401  ;;  %v4613_v56 = vpack.c.bf16 %v2055_v39, %v2054_v63  ;;  %v5002_v61 = vld [vmem:[#allocation44_spill] sm:$0xff] }
 0x23b   : > { %v629_v37 = vmul.f32 %v621_v60, %v5000_v27  ;;  %v575_v12 = vmul.f32 %v4988_v35, %v567_v49  ;;  %v1461_v48 = vadd.f32 1.4214138, %v1453_v16  ;;  %v561_v62 = vmul.f32 %v4992_v14, %v553_v55  ;;  %v5005_v27 = vld [vmem:[#allocation26_spill] sm:$0xff] }
 0x23c   : > { %v646_v1 = vmul.f32 %v638_v33, %v5001_v38  ;;  %v576_v30 = vmul.f32 %v4990_v58, %v568_v17  ;;  %v562_v4 = vmul.f32 %v4993_v8, %v554_v21  ;;  %v1439_v36 = vmul.f32 1.0614054, %v4338_v0  ;;  %v5003_v38 = vld [vmem:[#allocation43_spill] sm:$0xff]  ;;  %v5004_v33 = vld [vmem:[#allocation20_spill] sm:$0xff] }
 0x23d   : > { %v637_v51 = vadd.f32 1.0, %v629_v37  ;;  %v615_v23 = vmul.f32 %v5002_v61, %v575_v12  ;;  %v1469_v59 = vmul.f32 %v4302_v13, %v1461_v48  ;;  %3088 = vmatpush3.bf16.msra.mxu0 %v3085_v11  ;;  %v569_v35 = vadd.f32 0.2548296, %v561_v62  ;;  %v5006_v62 = vld [vmem:[#allocation24_spill] sm:$0xff] }
 0x23e   : > { %v616_v57 = vmul.f32 %v5003_v38, %v576_v30  ;;  %v570_v60 = vadd.f32 0.2548296, %v562_v4  ;;  %3090 = vmatprep.subr.bf16.mxu0 %v3089_v22  ;;  %v1440_v58 = vmul.f32 1.0614054, %v4322_v15  ;;  %v1447_v39 = vadd.f32 -1.4531521, %v1439_v36 }
 0x23f   : > { %v645_v49 = vmul.f32 %v637_v51, %v5004_v33  ;;  %v623_v16 = vsub.f32 1.0, %v615_v23  ;;  %v1477_v63 = vadd.f32 -0.28449672, %v1469_v59  ;;  %v577_v55 = vmul.f32 %v4992_v14, %v569_v35  ;;  %v5007_v51 = vld [vmem:[#allocation48_spill] sm:$0xff]  ;;  %v5008_v23 = vld [vmem:[#allocation46_spill] sm:$0xff] }
 0x240   : > { %v624_v17 = vsub.f32 1.0, %v616_v57  ;;  %v578_v21 = vmul.f32 %v4993_v8, %v570_v60  ;;  %v1448_v11 = vadd.f32 -1.4531521, %v1440_v58  ;;  %v1455_v48 = vmul.f32 %v4338_v0, %v1447_v39  ;;  %v2057_v39 = vld [vmem:[#allocation8 + $0x198] sm:$0xff] }
 0x241   : > { %2720 = vmatprep.mubr.f32.mxu0 %v645_v49  ;;  %v631_v37 = vmul.f32 %v623_v16, %v5005_v27  ;;  %v1485_v12 = vmul.f32 %v4302_v13, %v1477_v63  ;;  %3092 = vmatpush3.bf16.msra.mxu0 %v3089_v22  ;;  %v1441_v30 = vmul.f32 1.0614054, %v4367_v24  ;;  %v617_v61 = vmul.f32 %v5007_v51, %v577_v55  ;;  %v2056_v63 = vld [vmem:[#allocation8 + $0x190] sm:$0xff] }
 0x242   : > { %2721 = vmatmul.mubr.f32.gmra.mrb[2].mxu0 %v646_v1  ;;  %v632_v4 = vmul.f32 %v624_v17, %v5006_v62  ;;  %v618_v14 = vmul.f32 %v5008_v23, %v578_v21  ;;  %3094 = vmatprep.subr.bf16.mxu0 %v3093_v9  ;;  %v1442_v8 = vmul.f32 1.0614054, %v4357_v45  ;;  %v1463_v38 = vadd.f32 1.4214138, %v1455_v48  ;;  %v5009_v1 = vld [vmem:[#allocation25_spill] sm:$0xff]  ;;  %v5010_v17 = vld [vmem:[#allocation23_spill] sm:$0xff] }
 0x243   : > { %v639_v59 = vadd.f32 1.0, %v631_v37  ;;  %v1493_v36 = vadd.f32 0.2548296, %v1485_v12  ;;  %v1456_v57 = vmul.f32 %v4322_v15, %v1448_v11  ;;  %v625_v35 = vsub.f32 1.0, %v617_v61  ;;  %v5011_v21 = vld [vmem:[#allocation34_spill] sm:$0xff] }
 0x244   : > { %v640_v22 = vadd.f32 1.0, %v632_v4  ;;  %v626_v60 = vsub.f32 1.0, %v618_v14  ;;  %v1471_v49 = vmul.f32 %v4338_v0, %v1463_v38  ;;  %v5012_v11 = vld [vmem:[#allocation30_spill] sm:$0xff]  ;;  %v1449_v42 = vadd.f32 -1.4531521, %v1441_v30  ;;  %v2059_v38 = vld [vmem:[#allocation8 + $0x1a8] sm:$0xff] }
 0x245   : > { %v647_v58 = vmul.f32 %v639_v59, %v5009_v1  ;;  %v1501_v33 = vmul.f32 %v4302_v13, %v1493_v36  ;;  %3096 = vmatpush3.bf16.msra.mxu0 %v3093_v9  ;;  %v1464_v16 = vadd.f32 1.4214138, %v1456_v57  ;;  %v633_v27 = vmul.f32 %v625_v35, %v5011_v21  ;;  %v2058_v36 = vld [vmem:[#allocation8 + $0x1a0] sm:$0xff] }
 0x246   : > { %v648_v55 = vmul.f32 %v640_v22, %v5010_v17  ;;  %v634_v37 = vmul.f32 %v626_v60, %v5012_v11  ;;  %3130 = vmatprep.subr.bf16.mxu0 %v4613_v56  ;;  %v1479_v48 = vadd.f32 -0.28449672, %v1471_v49  ;;  %v1450_v9 = vadd.f32 -1.4531521, %v1442_v8  ;;  %v5014_v22 = vld [vmem:[#allocation28_spill] sm:$0xff]  ;;  %v5015_v1 = vld [vmem:[#allocation59_spill] sm:$0xff] }
 0x247   : > { %2723 = vmatprep.mubr.f32.mxu0 %v647_v58  ;;  %v1541_v12 = vmul.f32 %v4316_v43, %v1501_v33  ;;  %v1472_v13 = vmul.f32 %v4322_v15, %v1464_v16  ;;  %v641_v62 = vadd.f32 1.0, %v633_v27  ;;  %v4642_v51 = vpack.c.bf16 %v2057_v39, %v2056_v63  ;;  %v5013_v43 = vld [vmem:[#allocation29_spill] sm:$0xff] }
 0x248   : > { %2724 = vmatmul.mubr.f32.gmra.mrb[4].mxu0 %v648_v55  ;;  %v642_v4 = vadd.f32 1.0, %v634_v37  ;;  %v1457_v61 = vmul.f32 %v4367_v24, %v1449_v42  ;;  %v1487_v14 = vmul.f32 %v4338_v0, %v1479_v48  ;;  %v1458_v30 = vmul.f32 %v4357_v45, %v1450_v9  ;;  %v2060_v42 = vld [vmem:[#allocation8 + $0x1b0] sm:$0xff]  ;;  %v4658_v48 = vpop.eup %3403 }
 0x249   : > { %v1549_v23 = vsub.f32 1.0, %v1541_v12  ;;  %v1480_v59 = vadd.f32 -0.28449672, %v1472_v13  ;;  %v649_v57 = vmul.f32 %v641_v62, %v5013_v43  ;;  %v1443_v60 = vmul.f32 1.0614054, %v4518_v32  ;;  %v2061_v12 = vld [vmem:[#allocation8 + $0x1b8] sm:$0xff] }
 0x24a   : > { %v650_v35 = vmul.f32 %v642_v4, %v5014_v22  ;;  %v1465_v8 = vadd.f32 1.4214138, %v1457_v61  ;;  %v1495_v33 = vadd.f32 0.2548296, %v1487_v14  ;;  %v1466_v16 = vadd.f32 1.4214138, %v1458_v30 }
 0x24b   : > { %v1557_v58 = vmul.f32 %v1549_v23, %v5015_v1  ;;  %v1488_v49 = vmul.f32 %v4322_v15, %v1480_v59  ;;  %2726 = vmatprep.mubr.f32.mxu0 %v649_v57  ;;  %v4653_v39 = vpack.c.bf16 %v2059_v38, %v2058_v36  ;;  %v1451_v17 = vadd.f32 -1.4531521, %v1443_v60  ;;  %v5016_v61 = vld [vmem:[#allocation57_spill] sm:$0xff]  ;;  %v2062_v57 = vld [vmem:[#allocation8 + $0x1c0] sm:$0xff] }
 0x24c   : > { %v1473_v63 = vmul.f32 %v4367_v24, %v1465_v8  ;;  %v1444_v55 = vmul.f32 1.0614054, %v4508_v7  ;;  %2727 = vmatmul.mubr.f32.gmra.mrb[6].mxu0 %v650_v35  ;;  %v1503_v27 = vmul.f32 %v4338_v0, %v1495_v33  ;;  %v1474_v37 = vmul.f32 %v4357_v45, %v1466_v16  ;;  %v2063_v22 = vld [vmem:[#allocation8 + $0x1c8] sm:$0xff]  ;;  %v2065_v16 = vld [vmem:[#allocation8 + $0x1d8] sm:$0xff] }
 0x24d   : > { %v1565_v21 = vadd.f32 1.0, %v1557_v58  ;;  %v1496_v11 = vadd.f32 0.2548296, %v1488_v49  ;;  %v1459_v9 = vmul.f32 %v4518_v32, %v1451_v17  ;;  %v1910_v4 = vmul.f32 1.0614054, %v4547_v3  ;;  %v2064_v49 = vld [vmem:[#allocation8 + $0x1d0] sm:$0xff] }
 0x24e   : > { %v1481_v13 = vadd.f32 -0.28449672, %v1473_v63  ;;  %v1452_v62 = vadd.f32 -1.4531521, %v1444_v55  ;;  %v1543_v14 = vmul.f32 %v4346_v18, %v1503_v27  ;;  %v1482_v0 = vadd.f32 -0.28449672, %v1474_v37 }
 0x24f   : > { %v1573_v23 = vmul.f32 %v1565_v21, %v5016_v61  ;;  %v1504_v59 = vmul.f32 %v4322_v15, %v1496_v11  ;;  %v1467_v36 = vadd.f32 1.4214138, %v1459_v9  ;;  %v1918_v43 = vadd.f32 -1.4531521, %v1910_v4  ;;  %v2066_v37 = vld [vmem:[#allocation8 + $0x1e0] sm:$0xff] }
 0x250   : > { %v1489_v30 = vmul.f32 %v4367_v24, %v1481_v13  ;;  %v1460_v38 = vmul.f32 %v4508_v7, %v1452_v62  ;;  %v1551_v35 = vsub.f32 1.0, %v1543_v14  ;;  %v1490_v60 = vmul.f32 %v4357_v45, %v1482_v0  ;;  %v5017_v13 = vld [vmem:[#allocation63_spill] sm:$0xff] }
 0x251   : > { %2805 = vmatprep.mubr.f32.mxu0 %v1573_v23  ;;  %v1544_v8 = vmul.f32 %v4331_v28, %v1504_v59  ;;  %v4669_v1 = vpack.c.bf16 %v2061_v12, %v2060_v42  ;;  %v1475_v18 = vmul.f32 %v4518_v32, %v1467_v36  ;;  %v1926_v33 = vmul.f32 %v4547_v3, %v1918_v43  ;;  %v2067_v42 = vld [vmem:[#allocation8 + $0x1e8] sm:$0xff]  ;;  %v5018_v23 = vld [vmem:[#allocation62_spill] sm:$0xff] }
 0x252   : > { %2806 = vmatmul.mubr.f32.vlgmr.msra.gmra.mrb[0].mxu0 %v4492_v54  ;;  %v1497_v15 = vadd.f32 0.2548296, %v1489_v30  ;;  %v1468_v58 = vadd.f32 1.4214138, %v1460_v38  ;;  %v1559_v63 = vmul.f32 %v1551_v35, %v4282_v20  ;;  %v1498_v28 = vadd.f32 0.2548296, %v1490_v60 }
 0x253   : > { %3132 = vmatpush3.bf16.msra.mxu0 %v4613_v56  ;;  %v1552_v17 = vsub.f32 1.0, %v1544_v8  ;;  %v4676_v55 = vpack.c.bf16 %v2063_v22, %v2062_v57  ;;  %v1483_v21 = vadd.f32 -0.28449672, %v1475_v18  ;;  %v1934_v11 = vadd.f32 1.4214138, %v1926_v33  ;;  %v5019_v43 = vld [vmem:[#allocation61_spill] sm:$0xff] }
 0x254   : > { %3134 = vmatprep.subr.bf16.mxu0 %v4642_v51  ;;  %v1505_v54 = vmul.f32 %v4367_v24, %v1497_v15  ;;  %v1476_v27 = vmul.f32 %v4508_v7, %v1468_v58  ;;  %v1567_v12 = vadd.f32 1.0, %v1559_v63  ;;  %v1506_v20 = vmul.f32 %v4357_v45, %v1498_v28  ;;  %v5021_v58 = vld [vmem:[#allocation66_spill] sm:$0xff] }
 0x255   : > { %v1560_v9 = vmul.f32 %v1552_v17, %v5017_v13  ;;  %v4683_v56 = vpack.c.bf16 %v2065_v16, %v2064_v49  ;;  %v1491_v4 = vmul.f32 %v4518_v32, %v1483_v21  ;;  %v1942_v24 = vmul.f32 %v4547_v3, %v1934_v11 }
 0x256   : > { %v1545_v62 = vmul.f32 %v4416_v53, %v1505_v54  ;;  %v1484_v61 = vadd.f32 -0.28449672, %v1476_v27  ;;  %v1575_v14 = vmul.f32 %v1567_v12, %v5018_v23  ;;  %v1546_v0 = vmul.f32 %v4381_v41, %v1506_v20  ;;  %v5023_v20 = vld [vmem:[#allocation64_spill] sm:$0xff] }
 0x257   : > { %v1568_v59 = vadd.f32 1.0, %v1560_v9  ;;  %3136 = vmatpush3.bf16.msra.mxu0 %v4642_v51  ;;  %v4691_v30 = vpack.c.bf16 %v2067_v42, %v2066_v37  ;;  %v1499_v45 = vadd.f32 0.2548296, %v1491_v4  ;;  %v1950_v38 = vadd.f32 -0.28449672, %v1942_v24  ;;  %v5020_v51 = vld [vmem:[#allocation67_spill] sm:$0xff] }
 0x258   : > { %v1553_v36 = vsub.f32 1.0, %v1545_v62  ;;  %3138 = vmatprep.subr.bf16.mxu0 %v4653_v39  ;;  %v1492_v53 = vmul.f32 %v4508_v7, %v1484_v61  ;;  %2808 = vmatprep.mubr.f32.mxu0 %v1575_v14  ;;  %v1554_v22 = vsub.f32 1.0, %v1546_v0  ;;  %v1912_v35 = vmul.f32 1.0614054, %v4568_v34  ;;  %v5022_v42 = vld [vmem:[#allocation65_spill] sm:$0xff] }
 0x259   : > { %v1576_v57 = vmul.f32 %v1568_v59, %v5019_v43  ;;  %v1913_v8 = vmul.f32 1.0614054, %v4560_v25  ;;  %v1507_v41 = vmul.f32 %v4518_v32, %v1499_v45  ;;  %v1958_v18 = vmul.f32 %v4547_v3, %v1950_v38 }
 0x25a   : > { %v1561_v60 = vmul.f32 %v1553_v36, %v5020_v51  ;;  %v1500_v15 = vadd.f32 0.2548296, %v1492_v53  ;;  %v1562_v33 = vmul.f32 %v1554_v22, %v5021_v58  ;;  %v1920_v49 = vadd.f32 -1.4531521, %v1912_v35  ;;  %v5025_v58 = vld [vmem:[#allocation68_spill] sm:$0xff] }
 0x25b   : > { %2809 = vmatmul.mubr.f32.gmra.mrb[2].mxu0 %v1576_v57  ;;  %v1921_v16 = vadd.f32 -1.4531521, %v1913_v8  ;;  %v1914_v63 = vmul.f32 1.0614054, %v4591_v6  ;;  %v1547_v28 = vmul.f32 %v4534_v46, %v1507_v41  ;;  %v1966_v21 = vadd.f32 0.2548296, %v1958_v18 }
 0x25c   : > { %v1569_v17 = vadd.f32 1.0, %v1561_v60  ;;  %3140 = vmatpush3.bf16.msra.mxu0 %v4653_v39  ;;  %v1508_v54 = vmul.f32 %v4508_v7, %v1500_v15  ;;  %v1570_v27 = vadd.f32 1.0, %v1562_v33  ;;  %v1928_v32 = vmul.f32 %v4568_v34, %v1920_v49  ;;  %v5024_v57 = vld [vmem:[#allocation69_spill] sm:$0xff] }
 0x25d   : > { %3142 = vmatprep.subr.bf16.mxu0 %v4669_v1  ;;  %v1929_v11 = vmul.f32 %v4560_v25, %v1921_v16  ;;  %v1922_v37 = vadd.f32 -1.4531521, %v1914_v63  ;;  %v1555_v13 = vsub.f32 1.0, %v1547_v28  ;;  %v1974_v46 = vmul.f32 %v4547_v3, %v1966_v21  ;;  %v2069_v16 = vld [vmem:[#allocation8 + $0x1f8] sm:$0xff] }
 0x25e   : > { %v1577_v12 = vmul.f32 %v1569_v17, %v5022_v42  ;;  %v1548_v9 = vmul.f32 %v4511_v10, %v1508_v54  ;;  %v1578_v39 = vmul.f32 %v1570_v27, %v5023_v20  ;;  %v1936_v62 = vadd.f32 1.4214138, %v1928_v32 }
 0x25f   : > { %v1937_v7 = vadd.f32 1.4214138, %v1929_v11  ;;  %v1930_v4 = vmul.f32 %v4591_v6, %v1922_v37  ;;  %v1563_v61 = vmul.f32 %v1555_v13, %v4473_v40  ;;  %v2014_v23 = vmul.f32 %v4550_v19, %v1974_v46  ;;  %v5026_v13 = vld [vmem:[#allocation35_spill] sm:$0xff] }
 0x260   : > { %2811 = vmatprep.mubr.f32.mxu0 %v1577_v12  ;;  %v1556_v24 = vsub.f32 1.0, %v1548_v9  ;;  %3144 = vmatpush3.bf16.msra.mxu0 %v4669_v1  ;;  %v1915_v14 = vmul.f32 1.0614054, %v4579_v26  ;;  %v1944_v10 = vmul.f32 %v4568_v34, %v1936_v62  ;;  %v1916_v0 = vmul.f32 1.0614054, %v4605_v50  ;;  %v5027_v9 = vld [vmem:[#allocation16_spill] sm:$0xff] }
 0x261   : > { %2812 = vmatmul.mubr.f32.gmra.mrb[4].mxu0 %v1578_v39  ;;  %3146 = vmatprep.subr.bf16.mxu0 %v4676_v55  ;;  %v1945_v3 = vmul.f32 %v4560_v25, %v1937_v7  ;;  %v1938_v59 = vadd.f32 1.4214138, %v1930_v4  ;;  %v1571_v40 = vadd.f32 1.0, %v1563_v61  ;;  %v2022_v1 = vsub.f32 1.0, %v2014_v23  ;;  %v5029_v62 = vld [vmem:[#allocation56_spill] sm:$0xff]  ;;  %v5032_v23 = vld [vmem:[#allocation58_spill] sm:$0xff] }
 0x262   : > { %v1564_v36 = vmul.f32 %v1556_v24, %v4388_v52  ;;  %v1923_v45 = vadd.f32 -1.4531521, %v1915_v14  ;;  %vm1856_vm11 = vcmp.lt.f32.partialorder %v4463_v29, 0.0  ;;  %v1952_v19 = vadd.f32 -0.28449672, %v1944_v10  ;;  %v2068_v52 = vld [vmem:[#allocation8 + $0x1f0] sm:$0xff] }
 0x263   : > { %v1953_v53 = vadd.f32 -0.28449672, %v1945_v3  ;;  %v1946_v38 = vmul.f32 %v4591_v6, %v1938_v59  ;;  %v1924_v43 = vadd.f32 -1.4531521, %v1916_v0  ;;  %v1579_v22 = vmul.f32 %v1571_v40, %v5024_v57  ;;  %v5030_v7 = vld [vmem:[#allocation40_spill] sm:$0xff]  ;;  %v5033_v0 = vld [vmem:[#allocation49_spill] sm:$0xff] }
 0x264   : > { %v1572_v35 = vadd.f32 1.0, %v1564_v36  ;;  %v2030_v8 = vmul.f32 %v2022_v1, %v4557_v5  ;;  %3148 = vmatpush3.bf16.msra.mxu0 %v4676_v55  ;;  %v1931_v51 = vmul.f32 %v4579_v26, %v1923_v45  ;;  %v1960_v60 = vmul.f32 %v4568_v34, %v1952_v19 }
 0x265   : > { %3150 = vmatprep.subr.bf16.mxu0 %v4683_v56  ;;  %v1961_v41 = vmul.f32 %v4560_v25, %v1953_v53  ;;  %v1954_v15 = vadd.f32 -0.28449672, %v1946_v38  ;;  %v1932_v18 = vmul.f32 %v4605_v50, %v1924_v43  ;;  %2814 = vmatprep.mubr.f32.mxu0 %v1579_v22  ;;  %v1917_v55 = vmul.f32 1.0614054, %v4599_v47 }
 0x266   : > { %v1580_v33 = vmul.f32 %v1572_v35, %v5025_v58  ;;  %v2038_v49 = vadd.f32 1.0, %v2030_v8  ;;  %v1939_v5 = vadd.f32 1.4214138, %v1931_v51  ;;  %v1968_v63 = vadd.f32 0.2548296, %v1960_v60  ;;  %v5035_v51 = vld [vmem:[#allocation18_spill] sm:$0xff] }
 0x267   : > { %v1969_v17 = vadd.f32 0.2548296, %v1961_v41  ;;  %v1962_v28 = vmul.f32 %v4591_v6, %v1954_v15  ;;  %v1940_v54 = vadd.f32 1.4214138, %v1932_v18  ;;  %3405 = vpow2.f32 %v4566_v44  ;;  %v5036_v15 = vld [vmem:[#allocation50_spill] sm:$0xff] }
 0x268   : > { %2815 = vmatmul.mubr.f32.gmra.mrb[6].mxu0 %v1580_v33  ;;  %v2046_v21 = vmul.f32 %v2038_v49, %v4523_v2  ;;  %v1947_v27 = vmul.f32 %v4579_v26, %v1939_v5  ;;  %v1925_v32 = vadd.f32 -1.4531521, %v1917_v55  ;;  %v1976_v11 = vmul.f32 %v4568_v34, %v1968_v63  ;;  %v5037_v33 = vld [vmem:[#allocation41_spill] sm:$0xff]  ;;  %v5038_v5 = vld [vmem:[#allocation52_spill] sm:$0xff] }
 0x269   : > { %3152 = vmatpush3.bf16.msra.mxu0 %v4683_v56  ;;  %v1977_v37 = vmul.f32 %v4560_v25, %v1969_v17  ;;  %v1970_v42 = vadd.f32 0.2548296, %v1962_v28  ;;  %v1948_v12 = vmul.f32 %v4605_v50, %v1940_v54  ;;  %v5028_v46 = vsub.f32 1.0, %v5027_v9  ;;  %v5039_v17 = vld [vmem:[#allocation17_spill] sm:$0xff] }
 0x26a   : > { %2893 = vmatprep.mubr.f32.mxu0 %v2046_v21  ;;  %3154 = vmatprep.subr.bf16.mxu0 %v4691_v30  ;;  %v3157_v2 = vpack.c.bf16 %v2069_v16, %v2068_v52  ;;  %v1955_v44 = vadd.f32 -0.28449672, %v1947_v27  ;;  %v1933_v39 = vmul.f32 %v4599_v47, %v1925_v32  ;;  %v2016_v56 = vmul.f32 %v5029_v62, %v1976_v11  ;;  %v5040_v27 = vld [vmem:[#allocation60_spill] sm:$0xff]  ;;  %v5043_v62 = vld [vmem:[#allocation39_spill] sm:$0xff] }
 0x26b   : > { %v2031_v20 = vmul.f32 %v5028_v46, %v5026_v13  ;;  %v2017_v34 = vmul.f32 %v5030_v7, %v1977_v37  ;;  %v1978_v25 = vmul.f32 %v4591_v6, %v1970_v42  ;;  %v1956_v4 = vadd.f32 -0.28449672, %v1948_v12  ;;  %v5041_v46 = vld [vmem:[#allocation55_spill] sm:$0xff] }
 0x26c   : > { %v5031_v61 = vmov 1.0   ;;  %vm1858_vm12 = vcmp.lt.f32.partialorder %v5032_v23, 0.0  ;;  %v1963_v14 = vmul.f32 %v4579_v26, %v1955_v44  ;;  %v1941_v10 = vadd.f32 1.4214138, %v1933_v39  ;;  %v5044_v23 = vld [vmem:[#allocation53_spill] sm:$0xff] }
 0x26d   : > { %v1865_v24 = vsel %vm1857_vm10, -1.0, %v5031_v61  ;;  %3156 = vmatpush3.bf16.msra.mxu0 %v4691_v30  ;;  %v2024_v3 = vsub.f32 1.0, %v2016_v56  ;;  %v2025_v59 = vsub.f32 1.0, %v2017_v34  ;;  %v2018_v40 = vmul.f32 %v5033_v0, %v1978_v25  ;;  %v5034_v30 = vld [vmem:[#allocation51_spill] sm:$0xff] }
 0x26e   : > { %v1964_v36 = vmul.f32 %v4605_v50, %v1956_v4  ;;  %v2039_v1 = vadd.f32 1.0, %v2031_v20  ;;  %v1864_v6 = vsel %vm1856_vm11, -1.0, %v5031_v61  ;;  %3158 = vmatprep.subr.bf16.mxu0 %v3157_v2  ;;  %v1971_v31 = vadd.f32 0.2548296, %v1963_v14 }
 0x26f   : > { %v1949_v45 = vmul.f32 %v4599_v47, %v1941_v10  ;;  %v2032_v19 = vmul.f32 %v2024_v3, %v1864_v6  ;;  %v2033_v53 = vmul.f32 %v2025_v59, %v1865_v24  ;;  %v2026_v38 = vsub.f32 1.0, %v2018_v40  ;;  %v2353_v59 = vld [vmem:[#allocation10] ss:$0 sm:$0xff] }
 0x270   : > { %v1972_v43 = vadd.f32 0.2548296, %v1964_v36  ;;  %v1840_v57 = vmul.f32 0.5, %v5034_v30  ;;  %v1866_v22 = vsel %vm1858_vm12, -1.0, %v5031_v61  ;;  %v1979_v35 = vmul.f32 %v4579_v26, %v1971_v31 }
 0x271   : > { %v1957_v8 = vadd.f32 -0.28449672, %v1949_v45  ;;  %vm1859_vm13 = vcmp.lt.f32.partialorder %v5035_v51, 0.0  ;;  %3160 = vmatpush3.bf16.msra.mxu0 %v3157_v2  ;;  %v2040_v29 = vadd.f32 1.0, %v2032_v19  ;;  %v2034_v52 = vmul.f32 %v2026_v38, %v1866_v22  ;;  %v3406_v41 = vpop.eup %3405  ;;  %v5042_v2 = vld [vmem:[#allocation54_spill] sm:$0xff] }
 0x272   : > { %v1980_v60 = vmul.f32 %v4605_v50, %v1972_v43  ;;  %v2047_v18 = vmul.f32 %v2039_v1, %v5036_v15  ;;  %v2041_v58 = vadd.f32 1.0, %v2033_v53  ;;  %v2019_v49 = vmul.f32 %v5037_v33, %v1979_v35 }
 0x273   : > { %v1965_v16 = vmul.f32 %v4599_v47, %v1957_v8  ;;  %vm1860_vm14 = vcmp.lt.f32.partialorder %v5038_v5, 0.0  ;;  %v2048_v55 = vmul.f32 %v2040_v29, %v1840_v57  ;;  %v2042_v26 = vadd.f32 1.0, %v2034_v52 }
 0x274   : > { %v2020_v63 = vmul.f32 %v4658_v48, %v1980_v60  ;;  %v1841_v28 = vmul.f32 0.5, %v5039_v17  ;;  %2894 = vmatmul.mubr.f32.vlgmr.msra.gmra.mrb[0].mxu0 %v2047_v18  ;;  %v2027_v54 = vsub.f32 1.0, %v2019_v49  ;;  %v1867_v50 = vsel %vm1859_vm13, -1.0, %v5031_v61 }
 0x275   : > { %v1973_v21 = vadd.f32 0.2548296, %v1965_v16  ;;  %v1842_v32 = vmul.f32 0.5, %v5040_v27  ;;  %2896 = vmatprep.mubr.f32.mxu0 %v2048_v55  ;;  %v1868_v37 = vsel %vm1860_vm14, -1.0, %v5031_v61  ;;  %v1843_v20 = vmul.f32 0.5, %v5041_v46 }
 0x276   : > { %v2028_v11 = vsub.f32 1.0, %v2020_v63  ;;  %v2049_v42 = vmul.f32 %v2041_v58, %v1841_v28  ;;  %v2035_v12 = vmul.f32 %v2027_v54, %v1867_v50  ;;  %vm1861_vm15 = vcmp.lt.f32.partialorder %v5042_v2, 0.0 }
 0x277   : > { %v1981_v13 = vmul.f32 %v4599_v47, %v1973_v21  ;;  %v2050_v48 = vmul.f32 %v2042_v26, %v1842_v32  ;;  %v1844_v56 = vmul.f32 0.5, %v5043_v62  ;;  %v1869_v4 = vsel %vm1861_vm15, -1.0, %v5031_v61 }
 0x278   : > { %v2036_v9 = vmul.f32 %v2028_v11, %v1868_v37  ;;  %2897 = vmatmul.mubr.f32.gmra.mrb[2].mxu0 %v2049_v42  ;;  %v2043_v44 = vadd.f32 1.0, %v2035_v12  ;;  %v1845_v14 = vmul.f32 0.5, %v5044_v23  ;;  %vm2198_vm0 = vcmask 31744  }
 0x279   : > { %v2021_v39 = vmul.f32 %v3406_v41, %v1981_v13  ;;  %2899 = vmatprep.mubr.f32.mxu0 %v2050_v48 }
 0x27a   : > { %v2044_v7 = vadd.f32 1.0, %v2036_v9  ;;  %v2051_v34 = vmul.f32 %v2043_v44, %v1843_v20 }
 0x27b   : > { %v2029_v25 = vsub.f32 1.0, %v2021_v39 }
 0x27c   : > { %v2052_v24 = vmul.f32 %v2044_v7, %v1844_v56  ;;  %2900 = vmatmul.mubr.f32.gmra.mrb[4].mxu0 %v2051_v34 }
 0x27d   : > { %v2037_v47 = vmul.f32 %v2029_v25, %v1869_v4 }
 0x27e   : > { %2902 = vmatprep.mubr.f32.mxu0 %v2052_v24 }
 0x27f   : > { %v2045_v10 = vadd.f32 1.0, %v2037_v47 }
 0x281   : > { %v2053_v3 = vmul.f32 %v2045_v10, %v1845_v14 }
 0x283   : > { %2903 = vmatmul.mubr.f32.gmra.mrb[6].mxu0 %v2053_v3 }
 0x347   : > { %v2895_v0 = vpop.f32.mrb[0].mxu0 }
 0x348   : > { %v2191_v40 = vadd.f32 %v2895_v0, %v2353_v59  ;;  %v2136_v36 = vpop.f32.mrb[1].mxu0 }
 0x349   : > { %v2190_v1 = vadd.f32 %v2353_v59, %v2136_v36 }
 0x34a   : > { %2200 = vst.msk [vmem:[%s296_s24 + $0x8] sm:$0xff] %vm2198_vm0, %v2191_v40 }
 0x34b   : > { %2199 = vst.msk [vmem:[%s296_s24] sm:$0xff] %vm2198_vm0, %v2190_v1  ;;  %v2898_v61 = vpop.f32.mrb[2].mxu0 }
 0x34c   : > { %v2193_v6 = vadd.f32 %v2898_v61, %v2353_v59  ;;  %v2146_v31 = vpop.f32.mrb[3].mxu0 }
 0x34d   : > { %v2192_v45 = vadd.f32 %v2353_v59, %v2146_v31 }
 0x34e   : > { %2202 = vst.msk [vmem:[%s296_s24 + $0x18] sm:$0xff] %vm2198_vm0, %v2193_v6 }
 0x34f   : > { %2201 = vst.msk [vmem:[%s296_s24 + $0x10] sm:$0xff] %vm2198_vm0, %v2192_v45  ;;  %v2901_v19 = vpop.f32.mrb[4].mxu0 }
 0x350   : > { %v2195_v53 = vadd.f32 %v2901_v19, %v2353_v59  ;;  %v2156_v38 = vpop.f32.mrb[5].mxu0 }
 0x351   : > { %v2194_v43 = vadd.f32 %v2353_v59, %v2156_v38 }
 0x352   : > { %2204 = vst.msk [vmem:[%s296_s24 + $0x28] sm:$0xff] %vm2198_vm0, %v2195_v53 }
 0x353   : > { %2203 = vst.msk [vmem:[%s296_s24 + $0x20] sm:$0xff] %vm2198_vm0, %v2194_v43 }
 0x356   : > { %v2904_v30 = vpop.f32.mrb[6].mxu0 }
 0x357   : > { %v2197_v57 = vadd.f32 %v2904_v30, %v2353_v59  ;;  %v2166_v22 = vpop.f32.mrb[7].mxu0 }
 0x358   : > { %v2196_v35 = vadd.f32 %v2353_v59, %v2166_v22 }
 0x359   : > { %2206 = vst.msk [vmem:[%s296_s24 + $0x38] sm:$0xff] %vm2198_vm0, %v2197_v57 }
 0x35a   : > { %2205 = vst.msk [vmem:[%s296_s24 + $0x30] sm:$0xff] %vm2198_vm0, %v2196_v35 }
 0x35b   : > { %3562 = shalt.err (!%p3559_p13)
}
 0x35c   : > { %s3563_s23 = scalar_lea.hbm %s4800_s6, 1024  ;;  %s3567_s11 = scalar_lea.hbm %s4853_s5, 2048 }
 0x35d   : > { %p3564_p9 = scmp.ne.s32.totalorder %s4800_s6, %s3563_s23  ;;  %p3568_p6 = scmp.lt.u32.totalorder %s4800_s6, %s4853_s5 }
 0x35e   : > { %p3569_p10 = scmp.lt.u32.totalorder %s3567_s11, %s3563_s23  ;;  %p3571_p4 = scmp.lt.u32.totalorder %s3563_s23, %s4800_s6 }
 0x35f   : > { %p3565_p0 = pnand %p3564_p9, %p3838_p8 }
 0x360   : > { %p3570_p3 = por %p3569_p10, %p3568_p6 }
 0x361   : > { %p3566_p11 = pneg %p3565_p0 }
 0x362   : > { %p3572_p5 = por %p3571_p4, %p3570_p3 }
 0x364   : > { %p3573_p7 = pnand %p3572_p5, %p3566_p11 }
 0x366   : > { %3576 = shalt.err (!%p3573_p7)
}
 0x367   : > { %s3636_s26 = smov 128   ;;  %s3637_s15 = smov 8  }
 0x368   : > { %3203 = dma.vmem_to_hbm [thread:$0]  (%p3838_p8), %s4802_s14, 1024, %s4800_s6, %s2208_s22, %s3636_s26, %s3636_s26, %s3637_s15  }
 0x369 PF: > { %s2236_s28 = sand.u32 1, %s3611_s18   ;;  %p5045_p12 = scmp.ne.s32.totalorder %s4887_s25, 0 }
 0x36a   : > { %p5046_p2 = scmp.ge.s32.totalorder %s3623_s21, 2  ;;  %s2237_s17 = scalar_lea.sflag [#allocation4], %s2236_s28 }
 0x36c   : > { %p3223_p1 = pnand %p5046_p2, %p5045_p12 }
 0x36e   : > { %3606 = dma.done.wait (!%p3223_p1), %s2237_s17, 1024  }
 0x36f   : > { %3608 = vsyncadd (!%p3223_p1), %s2237_s17, 4294966272  ;;  %p20_p13 = scmp.ge.s32.totalorder %s3825_s12, 4   ;;  %s5047_s18 = smov %s3615_s19 }
 0x370   : > { %s5048_s19 = smov %s3619_s20  ;;  %s5049_s20 = smov %s3834_s30 }
 0x371   : > { %s5050_s21 = smov %s3825_s12  ;;  %22 = sbr.rel (!%p20_p13) target bundleno = 7 (0x7), region = 101 }
 0x378   :  { %2242 = vsyncpa [#allocation3], 1 }
 0x379   :  { %2244 = vsyncpa [#allocation3 + $0x1], 1 }
 0x37a   :  { %2245 = vsyncpa [#allocation6], 1 }
 0x37b   :  { %2246 = vsyncpa [#allocation9], 1 }
 0x37c   :  { %2247 = vsyncpa [#allocation4], 1 }
 0x37d   :  { %2249 = vsyncpa [#allocation4 + $0x1], 1 }

</bundles_post_ra>
